<compile_context>
chip_gen: v5e
topology: v5e:2x2
jax: 0.10.0
libtpu: 0.0.40
codegen_flags: <defaults>
</compile_context>

<pallas_src>
import jax
import jax.numpy as jnp
from jax import lax
from jax.experimental import pallas as pl
from jax.experimental.pallas import tpu as pltpu


def _make_dw3x3_kernel(H, W, c_block, c_chunk):
    S = H * W
    PAD = W + 1                                    # max |flat tap offset| = W+1
    OFFS = [(dy - 1) * W + (dx - 1) for dy in range(3) for dx in range(3)]
    n_chunks = c_block // c_chunk

    def kernel(x_ref, w_ref, o_ref, xp_ref):
        # x_ref : (c_block, S)        input plane, channels on sublanes
        # w_ref : (c_block, 9)        flattened 3x3 per-channel filters
        # o_ref : (c_block, S)        output plane
        # xp_ref: (c_block, S+2*PAD)  zero-haloed plane (single lane-tile wide)

        # Zero-haloed plane: full zero + interior overwrite (cheapest store
        # pattern when halo and payload live in the same lane tile).
        xp_ref[...] = jnp.zeros_like(xp_ref)
        xp_ref[:, PAD:PAD + S] = x_ref[...].astype(jnp.float32)

        # Column-validity masks (lane-indexed, shared across channels/chunks).
        col = lax.broadcasted_iota(jnp.int32, (1, S), 1) % W
        mask_l = col != 0          # dx == 0 taps read column x-1: invalid at x == 0
        mask_r = col != (W - 1)    # dx == 2 taps read column x+1: invalid at x == W-1

        def chunk_body(j, carry):
            r0 = pl.multiple_of(j * c_chunk, 8)
            rows = pl.ds(r0, c_chunk)
            wv = w_ref[rows, :].astype(jnp.float32)       # (c_chunk, 9)

            def tap(k):
                lo = PAD + OFFS[k]
                t = xp_ref[rows, pl.ds(lo, S)]            # (c_chunk, S), shifted tap
                dx = k % 3
                if dx == 0:
                    t = jnp.where(mask_l, t, 0.0)
                elif dx == 2:
                    t = jnp.where(mask_r, t, 0.0)
                return t * wv[:, k:k + 1]                 # per-channel scale

            acc = tap(4)                                  # centre tap: no mask
            for k in (0, 1, 2, 3, 5, 6, 7, 8):
                acc = acc + tap(k)
            o_ref[rows, :] = acc.astype(o_ref.dtype)
            return carry

        # Not unrolled on purpose: bounds vreg live ranges to one channel chunk.
        lax.fori_loop(0, n_chunks, chunk_body, 0)

    return kernel


def depthwise_conv3x3(x_nchw, weight):
    """PyTorch-equivalent depthwise Conv2d(C, C, 3, stride=1, padding=1,
    groups=C, bias=False).  x_nchw: (N, C, H, W); weight: (C, 1, 3, 3)."""
    N, C, H, W = x_nchw.shape
    S = H * W

    # Layout-preserving reshapes only (bitcasts, no HBM round trips).
    x2 = x_nchw.reshape(N, C, S)
    w2 = weight.reshape(C, 9)

    # Two channel blocks: one per TensorCore on v7x, two serial steps on v5e/v6e.
    if C % 2 == 0 and (C // 2) % 8 == 0:
        c_block = C // 2
    else:
        c_block = C
    # Largest 8-aligned chunk (<=192 rows) dividing the block -> acc <= 24 vregs.
    c_chunk = c_block
    start = min(c_block, 192)
    start -= start % 8
    for cand in range(start, 7, -8):
        if cand > 0 and c_block % cand == 0:
            c_chunk = cand
            break

    kernel = _make_dw3x3_kernel(H, W, c_block, c_chunk)
    grid = (N, C // c_block)

    out = pl.pallas_call(
        kernel,
        out_shape=jax.ShapeDtypeStruct((N, C, S), x_nchw.dtype),
        grid_spec=pltpu.PrefetchScalarGridSpec(
            num_scalar_prefetch=0,
            grid=grid,
            in_specs=[
                pl.BlockSpec((None, c_block, S), lambda n, i: (n, i, 0)),
                pl.BlockSpec((c_block, 9), lambda n, i: (i, 0)),
            ],
            out_specs=pl.BlockSpec((None, c_block, S), lambda n, i: (n, i, 0)),
            scratch_shapes=[pltpu.VMEM((c_block, S + 2 * (W + 1)), jnp.float32)],
        ),
        compiler_params=pltpu.CompilerParams(
            dimension_semantics=("parallel", "parallel")),
    )(x2, w2)

    return out.reshape(N, C, H, W)


def _reference(x_nchw, weight):
    C = x_nchw.shape[1]
    k = jnp.transpose(weight.reshape(C, 3, 3), (1, 2, 0))[:, :, None, :]  # HWIO
    return lax.conv_general_dilated(
        x_nchw, k,
        window_strides=(1, 1),
        padding=((1, 1), (1, 1)),
        dimension_numbers=("NCHW", "HWIO", "NCHW"),
        feature_group_count=C,
    )


if __name__ == "__main__":
    key = jax.random.PRNGKey(0)
    kx, kw = jax.random.split(key)

    N, C, H, W = 1, 1104, 7, 7          # matches M.forward(x201)
    x = jax.random.normal(kx, (N, C, H, W), dtype=jnp.float32)
    w = jax.random.normal(kw, (C, 1, 3, 3), dtype=jnp.float32) * 0.1

    fwd = jax.jit(depthwise_conv3x3)
    out = jax.block_until_ready(fwd(x, w))
    ref = jax.block_until_ready(_reference(x, w))

    assert out.shape == (N, C, H, W)
    assert jnp.allclose(out, ref, atol=1e-4, rtol=1e-4), "mismatch vs reference"

    print("KERNEL_OK")
</pallas_src>

<mosaic_0001>
module attributes {stable_mosaic.version = 11 : i64} {
  func.func @kernel(%arg0: i32, %arg1: i32, %arg2: memref<1x552x49xf32, #tpu.memory_space<vmem>>, %arg3: memref<552x9xf32, #tpu.memory_space<vmem>>, %arg4: memref<1x552x49xf32, #tpu.memory_space<vmem>>, %arg5: memref<552x65xf32, #tpu.memory_space<vmem>>) attributes {dimension_semantics = [#tpu.dimension_semantics<parallel>, #tpu.dimension_semantics<parallel>], iteration_bounds = array<i64: 1, 2>, scalar_prefetch = 0 : i64, scratch_operands = 1 : i64, tpu.core_type = #tpu.core_type<tc>, window_params = [{transform_indices = @transform_0, window_bounds = array<i64: 1, 552, 49>}, {transform_indices = @transform_1, window_bounds = array<i64: 552, 9>}, {transform_indices = @transform_2, window_bounds = array<i64: 1, 552, 49>}]} {
    %cst = arith.constant 0.000000e+00 : f32
    %0 = vector.broadcast %cst : f32 to vector<552x65xf32>
    %c0 = arith.constant 0 : index
    %c0_0 = arith.constant 0 : index
    %1 = vector.load %arg5[%c0, %c0_0] : memref<552x65xf32, #tpu.memory_space<vmem>>, vector<552x65xf32>
    tpu.vector_store %arg5[%c0, %c0_0], %0 {strides = array<i32>} : memref<552x65xf32, #tpu.memory_space<vmem>>, vector<552x65xf32>,
    %c0_1 = arith.constant 0 : index
    %c0_2 = arith.constant 0 : index
    %c0_3 = arith.constant 0 : index
    %2 = vector.load %arg2[%c0_1, %c0_2, %c0_3] : memref<1x552x49xf32, #tpu.memory_space<vmem>>, vector<1x552x49xf32>
    %3 = vector.shape_cast %2 : vector<1x552x49xf32> to vector<552x49xf32>
    %c0_4 = arith.constant 0 : index
    %c8 = arith.constant 8 : index
    %4 = vector.load %arg5[%c0_4, %c8] : memref<552x65xf32, #tpu.memory_space<vmem>>, vector<552x49xf32>
    tpu.vector_store %arg5[%c0_4, %c8], %3 {strides = array<i32>} : memref<552x65xf32, #tpu.memory_space<vmem>>, vector<552x49xf32>,
    %5 = tpu.iota {dimensions = array<i32: 1>} : vector<1x49xi32>
    %c7_i32 = arith.constant 7 : i32
    %c0_i32 = arith.constant 0 : i32
    %6 = arith.cmpi eq, %c7_i32, %c0_i32 : i32
    %c1_i32 = arith.constant 1 : i32
    %7 = arith.select %6, %c1_i32, %c7_i32 : i32
    %8 = vector.broadcast %7 : i32 to vector<1x49xi32>
    %9 = arith.remsi %5, %8 : vector<1x49xi32>
    %c0_i32_5 = arith.constant 0 : i32
    %10 = vector.broadcast %c0_i32_5 : i32 to vector<1x49xi32>
    %11 = arith.cmpi ne, %9, %10 : vector<1x49xi32>
    %c0_i32_6 = arith.constant 0 : i32
    %12 = vector.broadcast %c0_i32_6 : i32 to vector<1x49xi32>
    %13 = arith.cmpi slt, %9, %12 : vector<1x49xi32>
    %c0_i32_7 = arith.constant 0 : i32
    %14 = arith.cmpi slt, %7, %c0_i32_7 : i32
    %15 = vector.broadcast %14 : i1 to vector<1x49xi1>
    %16 = vector.broadcast %15 : vector<1x49xi1> to vector<1x49xi1>
    %17 = arith.xori %13, %16 : vector<1x49xi1>
    %18 = arith.andi %17, %11 : vector<1x49xi1>
    %19 = vector.broadcast %7 : i32 to vector<1x49xi32>
    %20 = arith.addi %9, %19 : vector<1x49xi32>
    %21 = arith.select %18, %20, %9 : vector<1x49xi1>, vector<1x49xi32>
    %c0_i32_8 = arith.constant 0 : i32
    %22 = vector.broadcast %c0_i32_8 : i32 to vector<1x49xi32>
    %23 = arith.cmpi ne, %21, %22 : vector<1x49xi32>
    %c6_i32 = arith.constant 6 : i32
    %24 = vector.broadcast %c6_i32 : i32 to vector<1x49xi32>
    %25 = arith.cmpi ne, %21, %24 : vector<1x49xi32>
    %c0_i32_9 = arith.constant 0 : i32
    %c3_i32 = arith.constant 3 : i32
    %26 = arith.addi %c0_i32_9, %c3_i32 : i32
    %c1_i32_10 = arith.constant 1 : i32
    scf.for %arg6 = %c0_i32_9 to %26 step %c1_i32_10  : i32 {
      %c184_i32 = arith.constant 184 : i32
      %27 = arith.muli %arg6, %c184_i32 : i32
      %28 = tpu.assume_multiple %27, 8 : i32
      %29 = arith.index_cast %28 : i32 to index
      %c0_12 = arith.constant 0 : index
      %30 = vector.load %arg3[%29, %c0_12] : memref<552x9xf32, #tpu.memory_space<vmem>>, vector<184x9xf32>
      %31 = arith.index_cast %28 : i32 to index
      %c8_13 = arith.constant 8 : index
      %32 = vector.load %arg5[%31, %c8_13] : memref<552x65xf32, #tpu.memory_space<vmem>>, vector<184x49xf32>
      %33 = vector.extract_strided_slice %30 {offsets = [0, 4], sizes = [184, 1], strides = [1, 1]} : vector<184x9xf32> to vector<184x1xf32>
      %34 = vector.broadcast %33 : vector<184x1xf32> to vector<184x49xf32>
      %35 = arith.mulf %32, %34 : vector<184x49xf32>
      %36 = arith.index_cast %28 : i32 to index
      %c0_14 = arith.constant 0 : index
      %37 = vector.load %arg5[%36, %c0_14] : memref<552x65xf32, #tpu.memory_space<vmem>>, vector<184x49xf32>
      %cst_15 = arith.constant 0.000000e+00 : f32
      %38 = vector.shape_cast %23 : vector<1x49xi1> to vector<1x49xi1>
      %39 = vector.broadcast %38 : vector<1x49xi1> to vector<184x49xi1>
      %40 = vector.broadcast %cst_15 : f32 to vector<184x49xf32>
      %41 = arith.select %39, %37, %40 : vector<184x49xi1>, vector<184x49xf32>
      %42 = vector.extract_strided_slice %30 {offsets = [0, 0], sizes = [184, 1], strides = [1, 1]} : vector<184x9xf32> to vector<184x1xf32>
      %43 = vector.broadcast %42 : vector<184x1xf32> to vector<184x49xf32>
      %44 = arith.mulf %41, %43 : vector<184x49xf32>
      %45 = arith.addf %35, %44 : vector<184x49xf32>
      %46 = arith.index_cast %28 : i32 to index
      %c1 = arith.constant 1 : index
      %47 = vector.load %arg5[%46, %c1] : memref<552x65xf32, #tpu.memory_space<vmem>>, vector<184x49xf32>
      %48 = vector.extract_strided_slice %30 {offsets = [0, 1], sizes = [184, 1], strides = [1, 1]} : vector<184x9xf32> to vector<184x1xf32>
      %49 = vector.broadcast %48 : vector<184x1xf32> to vector<184x49xf32>
      %50 = arith.mulf %47, %49 : vector<184x49xf32>
      %51 = arith.addf %45, %50 : vector<184x49xf32>
      %52 = arith.index_cast %28 : i32 to index
      %c2 = arith.constant 2 : index
      %53 = vector.load %arg5[%52, %c2] : memref<552x65xf32, #tpu.memory_space<vmem>>, vector<184x49xf32>
      %cst_16 = arith.constant 0.000000e+00 : f32
      %54 = vector.shape_cast %25 : vector<1x49xi1> to vector<1x49xi1>
      %55 = vector.broadcast %54 : vector<1x49xi1> to vector<184x49xi1>
      %56 = vector.broadcast %cst_16 : f32 to vector<184x49xf32>
      %57 = arith.select %55, %53, %56 : vector<184x49xi1>, vector<184x49xf32>
      %58 = vector.extract_strided_slice %30 {offsets = [0, 2], sizes = [184, 1], strides = [1, 1]} : vector<184x9xf32> to vector<184x1xf32>
      %59 = vector.broadcast %58 : vector<184x1xf32> to vector<184x49xf32>
      %60 = arith.mulf %57, %59 : vector<184x49xf32>
      %61 = arith.addf %51, %60 : vector<184x49xf32>
      %62 = arith.index_cast %28 : i32 to index
      %c7 = arith.constant 7 : index
      %63 = vector.load %arg5[%62, %c7] : memref<552x65xf32, #tpu.memory_space<vmem>>, vector<184x49xf32>
      %cst_17 = arith.constant 0.000000e+00 : f32
      %64 = vector.shape_cast %23 : vector<1x49xi1> to vector<1x49xi1>
      %65 = vector.broadcast %64 : vector<1x49xi1> to vector<184x49xi1>
      %66 = vector.broadcast %cst_17 : f32 to vector<184x49xf32>
      %67 = arith.select %65, %63, %66 : vector<184x49xi1>, vector<184x49xf32>
      %68 = vector.extract_strided_slice %30 {offsets = [0, 3], sizes = [184, 1], strides = [1, 1]} : vector<184x9xf32> to vector<184x1xf32>
      %69 = vector.broadcast %68 : vector<184x1xf32> to vector<184x49xf32>
      %70 = arith.mulf %67, %69 : vector<184x49xf32>
      %71 = arith.addf %61, %70 : vector<184x49xf32>
      %72 = arith.index_cast %28 : i32 to index
      %c9 = arith.constant 9 : index
      %73 = vector.load %arg5[%72, %c9] : memref<552x65xf32, #tpu.memory_space<vmem>>, vector<184x49xf32>
      %cst_18 = arith.constant 0.000000e+00 : f32
      %74 = vector.shape_cast %25 : vector<1x49xi1> to vector<1x49xi1>
      %75 = vector.broadcast %74 : vector<1x49xi1> to vector<184x49xi1>
      %76 = vector.broadcast %cst_18 : f32 to vector<184x49xf32>
      %77 = arith.select %75, %73, %76 : vector<184x49xi1>, vector<184x49xf32>
      %78 = vector.extract_strided_slice %30 {offsets = [0, 5], sizes = [184, 1], strides = [1, 1]} : vector<184x9xf32> to vector<184x1xf32>
      %79 = vector.broadcast %78 : vector<184x1xf32> to vector<184x49xf32>
      %80 = arith.mulf %77, %79 : vector<184x49xf32>
      %81 = arith.addf %71, %80 : vector<184x49xf32>
      %82 = arith.index_cast %28 : i32 to index
      %c14 = arith.constant 14 : index
      %83 = vector.load %arg5[%82, %c14] : memref<552x65xf32, #tpu.memory_space<vmem>>, vector<184x49xf32>
      %cst_19 = arith.constant 0.000000e+00 : f32
      %84 = vector.shape_cast %23 : vector<1x49xi1> to vector<1x49xi1>
      %85 = vector.broadcast %84 : vector<1x49xi1> to vector<184x49xi1>
      %86 = vector.broadcast %cst_19 : f32 to vector<184x49xf32>
      %87 = arith.select %85, %83, %86 : vector<184x49xi1>, vector<184x49xf32>
      %88 = vector.extract_strided_slice %30 {offsets = [0, 6], sizes = [184, 1], strides = [1, 1]} : vector<184x9xf32> to vector<184x1xf32>
      %89 = vector.broadcast %88 : vector<184x1xf32> to vector<184x49xf32>
      %90 = arith.mulf %87, %89 : vector<184x49xf32>
      %91 = arith.addf %81, %90 : vector<184x49xf32>
      %92 = arith.index_cast %28 : i32 to index
      %c15 = arith.constant 15 : index
      %93 = vector.load %arg5[%92, %c15] : memref<552x65xf32, #tpu.memory_space<vmem>>, vector<184x49xf32>
      %94 = vector.extract_strided_slice %30 {offsets = [0, 7], sizes = [184, 1], strides = [1, 1]} : vector<184x9xf32> to vector<184x1xf32>
      %95 = vector.broadcast %94 : vector<184x1xf32> to vector<184x49xf32>
      %96 = arith.mulf %93, %95 : vector<184x49xf32>
      %97 = arith.addf %91, %96 : vector<184x49xf32>
      %98 = arith.index_cast %28 : i32 to index
      %c16 = arith.constant 16 : index
      %99 = vector.load %arg5[%98, %c16] : memref<552x65xf32, #tpu.memory_space<vmem>>, vector<184x49xf32>
      %cst_20 = arith.constant 0.000000e+00 : f32
      %100 = vector.shape_cast %25 : vector<1x49xi1> to vector<1x49xi1>
      %101 = vector.broadcast %100 : vector<1x49xi1> to vector<184x49xi1>
      %102 = vector.broadcast %cst_20 : f32 to vector<184x49xf32>
      %103 = arith.select %101, %99, %102 : vector<184x49xi1>, vector<184x49xf32>
      %104 = vector.extract_strided_slice %30 {offsets = [0, 8], sizes = [184, 1], strides = [1, 1]} : vector<184x9xf32> to vector<184x1xf32>
      %105 = vector.broadcast %104 : vector<184x1xf32> to vector<184x49xf32>
      %106 = arith.mulf %103, %105 : vector<184x49xf32>
      %107 = arith.addf %97, %106 : vector<184x49xf32>
      %c0_21 = arith.constant 0 : index
      %108 = arith.index_cast %28 : i32 to index
      %c0_22 = arith.constant 0 : index
      %109 = vector.load %arg4[%c0_21, %108, %c0_22] : memref<1x552x49xf32, #tpu.memory_space<vmem>>, vector<1x184x49xf32>
      %110 = vector.shape_cast %109 : vector<1x184x49xf32> to vector<184x49xf32>
      %111 = vector.shape_cast %107 : vector<184x49xf32> to vector<1x184x49xf32>
      tpu.vector_store %arg4[%c0_21, %108, %c0_22], %111 {strides = array<i32>} : memref<1x552x49xf32, #tpu.memory_space<vmem>>, vector<1x184x49xf32>,
    }
    %c3_i32_11 = arith.constant 3 : i32
    return
  }
  func.func @transform_0(%arg0: i32, %arg1: i32) -> (i32, i32, i32) {
    %c0_i32 = arith.constant 0 : i32
    %c0_i32_0 = arith.constant 0 : i32
    return %arg0, %arg1, %c0_i32 : i32, i32, i32
  }
  func.func @transform_1(%arg0: i32, %arg1: i32) -> (i32, i32) {
    %c0_i32 = arith.constant 0 : i32
    %c0_i32_0 = arith.constant 0 : i32
    return %arg1, %c0_i32 : i32, i32
  }
  func.func @transform_2(%arg0: i32, %arg1: i32) -> (i32, i32, i32) {
    %c0_i32 = arith.constant 0 : i32
    %c0_i32_0 = arith.constant 0 : i32
    return %arg0, %arg1, %c0_i32 : i32, i32, i32
  }
}

</mosaic_0001>

<bundles_post_ra>
// kernel: depthwise_conv3x3.1
= control target key start
LH: loop header
LB: loop body
LE: loop exit
PB: predicated region body
PF: predicated region fallthrough
CT: control target
= control target key end

     0   :  { %s3747_s9 = smov 0   ;;  %s3749_s10 = smov 0   ;;  %s6274_s0 = inlined_call_operand.vmem [shape: f32[1,1104,49], index: 0, kind: input, shape index: {}]   ;;  %s6275_s1 = inlined_call_operand.vmem [shape: f32[1104,9], index: 1, kind: input, shape index: {}]   ;;  %s6276_s2 = inlined_call_operand.vmem [shape: f32[1,1104,49], index: 2, kind: output, shape index: {}]  }
   0x1   :  { %s3751_s11 = smov 0  }
   0x2 LB: > { %s21_s12 = sadd.s32 1, %s3702_s10  ;;  %p3505_p0 = scmp.ge.s32.totalorder %s3706_s11, 1  ;;  %s3706_s11 = sphi %s3751_s11, %s12_s11   ;;  %s3702_s10 = sphi %s3749_s10, %s6646_s10   ;;  %s3698_s9 = sphi %s3747_s9, %s6645_s9  }
   0x3   : > { %p22_p1 = scmp.ge.s32.totalorder %s21_s12, 2  ;;  %p144_p2 = scmp.lt.s32.totalorder %s3706_s11, 3 }
   0x5   : > { %s6648_s12 = smov (%p22_p1, %s21_s12), 0  ;;  %p145_p3 = pnand %p3505_p0, %p144_p2 }
   0x6   : > { %s179_s13 = smul.u32 (!%p145_p3), 69, %s3698_s9  ;;  %s3712_s24 = smov (!%p145_p3), 8  }
   0x7   : > { %148 = sbr.rel (%p145_p3) target bundleno = 2331 (0x91b), region = 28  ;;  %s4145_s25 = smov (!%p145_p3), 0  }
   0x8   : > { %p182_p4 = scmp.lt.s32.totalorder (!%p145_p3), %s179_s13, 137 }
   0xc   : > { %s6650_s13 = smov (!%p182_p4, %s179_s13), 137  ;;  %vm205_vm0 = vcmask 531456   ;;  %v3713_v33 = vmov 0.0   ;;  %vm620_vm1 = vcmask 465984  }
   0xd   : > { %s3765_s14 = sshll.u32 %s6650_s13, 3  ;;  %210 = vst.msk [vmem:[#allocation2 + $0x20] sm:$0xff] %vm205_vm0, %v3713_v33 }
   0xe   : > { %s3771_s17 = scalar_lea.vmem %s6274_s0, %s3765_s14  ;;  %s193_s20 = scalar_lea.vmem %s6275_s1, %s3765_s14  ;;  %206 = vst.msk [vmem:[#allocation2] sm:$0xff] %vm205_vm0, %v3713_v33 }
   0xf   : > { %s203_s23 = scalar_lea.vmem %s6276_s2, %s3765_s14  ;;  %v277_v0 = vld [vmem:[%s3771_s17 + $0x10] sm:$0xff]  ;;  %v275_v1 = vld [vmem:[%s3771_s17] sm:$0xff]  ;;  %v278_v3 = vld [vmem:[%s3771_s17 + $0x18] sm:$0xff]  ;;  %207 = vst.msk [vmem:[#allocation2 + $0x8] sm:$0xff] %vm205_vm0, %v3713_v33 }
  0x10   : > { %417 = vrot.lane.b32.xlu1 %v277_v0, %s3712_s24  ;;  %413 = vrot.lane.b32.xlu0 %v275_v1, %s3712_s24  ;;  %v279_v2 = vld [vmem:[%s3771_s17 + $0x20] sm:$0xff]  ;;  %v276_v4 = vld [vmem:[%s3771_s17 + $0x8] sm:$0xff]  ;;  %208 = vst.msk [vmem:[#allocation2 + $0x10] sm:$0xff] %vm205_vm0, %v3713_v33 }
  0x11   : > { %421 = vrot.lane.b32.xlu2 %v279_v2, %s3712_s24  ;;  %v280_v5 = vld [vmem:[%s3771_s17 + $0x28] sm:$0xff]  ;;  %v282_v6 = vld [vmem:[%s3771_s17 + $0x38] sm:$0xff]  ;;  %v281_v7 = vld [vmem:[%s3771_s17 + $0x30] sm:$0xff]  ;;  %209 = vst.msk [vmem:[#allocation2 + $0x18] sm:$0xff] %vm205_vm0, %v3713_v33 }
  0x12   : > { %v283_v8 = vld [vmem:[%s3771_s17 + $0x40] sm:$0xff]  ;;  %v285_v9 = vld [vmem:[%s3771_s17 + $0x50] sm:$0xff]  ;;  %v284_v10 = vld [vmem:[%s3771_s17 + $0x48] sm:$0xff]  ;;  %211 = vst.msk [vmem:[#allocation2 + $0x28] sm:$0xff] %vm205_vm0, %v3713_v33 }
  0x13   : > { %v286_v11 = vld [vmem:[%s3771_s17 + $0x58] sm:$0xff]  ;;  %v288_v12 = vld [vmem:[%s3771_s17 + $0x68] sm:$0xff]  ;;  %v287_v13 = vld [vmem:[%s3771_s17 + $0x60] sm:$0xff]  ;;  %212 = vst.msk [vmem:[#allocation2 + $0x30] sm:$0xff] %vm205_vm0, %v3713_v33 }
  0x14   : > { %v289_v14 = vld [vmem:[%s3771_s17 + $0x70] sm:$0xff]  ;;  %v291_v15 = vld [vmem:[%s3771_s17 + $0x80] sm:$0xff]  ;;  %v290_v16 = vld [vmem:[%s3771_s17 + $0x78] sm:$0xff]  ;;  %213 = vst.msk [vmem:[#allocation2 + $0x38] sm:$0xff] %vm205_vm0, %v3713_v33 }
  0x15   : > { %v292_v17 = vld [vmem:[%s3771_s17 + $0x88] sm:$0xff]  ;;  %v294_v18 = vld [vmem:[%s3771_s17 + $0x98] sm:$0xff]  ;;  %v293_v19 = vld [vmem:[%s3771_s17 + $0x90] sm:$0xff]  ;;  %214 = vst.msk [vmem:[#allocation2 + $0x40] sm:$0xff] %vm205_vm0, %v3713_v33 }
  0x16   : > { %v295_v20 = vld [vmem:[%s3771_s17 + $0xa0] sm:$0xff]  ;;  %v297_v21 = vld [vmem:[%s3771_s17 + $0xb0] sm:$0xff]  ;;  %v296_v22 = vld [vmem:[%s3771_s17 + $0xa8] sm:$0xff]  ;;  %215 = vst.msk [vmem:[#allocation2 + $0x48] sm:$0xff] %vm205_vm0, %v3713_v33 }
  0x17   : > { %v298_v23 = vld [vmem:[%s3771_s17 + $0xb8] sm:$0xff]  ;;  %v300_v24 = vld [vmem:[%s3771_s17 + $0xc8] sm:$0xff]  ;;  %v299_v25 = vld [vmem:[%s3771_s17 + $0xc0] sm:$0xff]  ;;  %216 = vst.msk [vmem:[#allocation2 + $0x50] sm:$0xff] %vm205_vm0, %v3713_v33 }
  0x18   : > { %419 = vrot.lane.b32.xlu1 %v278_v3, %s3712_s24  ;;  %415 = vrot.lane.b32.xlu0 %v276_v4, %s3712_s24  ;;  %v301_v26 = vld [vmem:[%s3771_s17 + $0xd0] sm:$0xff]  ;;  %v303_v27 = vld [vmem:[%s3771_s17 + $0xe0] sm:$0xff]  ;;  %217 = vst.msk [vmem:[#allocation2 + $0x58] sm:$0xff] %vm205_vm0, %v3713_v33 }
  0x19   : > { %423 = vrot.lane.b32.xlu2 %v280_v5, %s3712_s24  ;;  %v302_v28 = vld [vmem:[%s3771_s17 + $0xd8] sm:$0xff]  ;;  %v304_v29 = vld [vmem:[%s3771_s17 + $0xe8] sm:$0xff]  ;;  %v305_v31 = vld [vmem:[%s3771_s17 + $0xf0] sm:$0xff]  ;;  %218 = vst.msk [vmem:[#allocation2 + $0x60] sm:$0xff] %vm205_vm0, %v3713_v33 }
  0x1a   : > { %v306_v30 = vld [vmem:[%s3771_s17 + $0xf8] sm:$0xff]  ;;  %v307_v32 = vld [vmem:[%s3771_s17 + $0x100] sm:$0xff]  ;;  %v309_v34 = vld [vmem:[%s3771_s17 + $0x110] sm:$0xff]  ;;  %219 = vst.msk [vmem:[#allocation2 + $0x68] sm:$0xff] %vm205_vm0, %v3713_v33 }
  0x1b   : > { %v308_v35 = vld [vmem:[%s3771_s17 + $0x108] sm:$0xff]  ;;  %v310_v36 = vld [vmem:[%s3771_s17 + $0x118] sm:$0xff]  ;;  %v311_v39 = vld [vmem:[%s3771_s17 + $0x120] sm:$0xff]  ;;  %220 = vst.msk [vmem:[#allocation2 + $0x70] sm:$0xff] %vm205_vm0, %v3713_v33 }
  0x1c   : > { %v312_v38 = vld [vmem:[%s3771_s17 + $0x128] sm:$0xff]  ;;  %221 = vst.msk [vmem:[#allocation2 + $0x78] sm:$0xff] %vm205_vm0, %v3713_v33  ;;  %v315_v40 = vld [vmem:[%s3771_s17 + $0x140] sm:$0xff]  ;;  %v314_v41 = vld [vmem:[%s3771_s17 + $0x138] sm:$0xff] }
  0x1d   : > { %222 = vst.msk [vmem:[#allocation2 + $0x80] sm:$0xff] %vm205_vm0, %v3713_v33  ;;  %v318_v42 = vld [vmem:[%s3771_s17 + $0x158] sm:$0xff]  ;;  %v317_v43 = vld [vmem:[%s3771_s17 + $0x150] sm:$0xff]  ;;  %v320_v48 = vld [vmem:[%s3771_s17 + $0x168] sm:$0xff] }
  0x1e   : > { %223 = vst.msk [vmem:[#allocation2 + $0x88] sm:$0xff] %vm205_vm0, %v3713_v33  ;;  %v313_v46 = vld [vmem:[%s3771_s17 + $0x130] sm:$0xff]  ;;  %v316_v52 = vld [vmem:[%s3771_s17 + $0x148] sm:$0xff]  ;;  %v323_v54 = vld [vmem:[%s3771_s17 + $0x180] sm:$0xff] }
  0x1f   : > { %224 = vst.msk [vmem:[#allocation2 + $0x90] sm:$0xff] %vm205_vm0, %v3713_v33  ;;  %v321_v47 = vld [vmem:[%s3771_s17 + $0x170] sm:$0xff]  ;;  %v324_v53 = vld [vmem:[%s3771_s17 + $0x188] sm:$0xff]  ;;  %v319_v58 = vld [vmem:[%s3771_s17 + $0x160] sm:$0xff] }
  0x20   : > { %427 = vrot.lane.b32.xlu1 %v282_v6, %s3712_s24  ;;  %425 = vrot.lane.b32.xlu0 %v281_v7, %s3712_s24  ;;  %225 = vst.msk [vmem:[#allocation2 + $0x98] sm:$0xff] %vm205_vm0, %v3713_v33  ;;  %v327_v59 = vld [vmem:[%s3771_s17 + $0x1a0] sm:$0xff]  ;;  %v326_v60 = vld [vmem:[%s3771_s17 + $0x198] sm:$0xff] }
  0x21   : > { %429 = vrot.lane.b32.xlu2 %v283_v8, %s3712_s24  ;;  %226 = vst.msk [vmem:[#allocation2 + $0xa0] sm:$0xff] %vm205_vm0, %v3713_v33  ;;  %v322_v0 = vld [vmem:[%s3771_s17 + $0x178] sm:$0xff]  ;;  %v329_v2 = vld [vmem:[%s3771_s17 + $0x1b0] sm:$0xff]  ;;  %v332_v8 = vld [vmem:[%s3771_s17 + $0x1c8] sm:$0xff] }
  0x22   : > { %227 = vst.msk [vmem:[#allocation2 + $0xa8] sm:$0xff] %vm205_vm0, %v3713_v33  ;;  %v330_v1 = vld [vmem:[%s3771_s17 + $0x1b8] sm:$0xff]  ;;  %v325_v6 = vld [vmem:[%s3771_s17 + $0x190] sm:$0xff] }
  0x23   : > { %228 = vst.msk [vmem:[#allocation2 + $0xb0] sm:$0xff] %vm205_vm0, %v3713_v33  ;;  %v333_v7 = vld [vmem:[%s3771_s17 + $0x1d0] sm:$0xff] }
  0x24   : > { %229 = vst.msk [vmem:[#allocation2 + $0xb8] sm:$0xff] %vm205_vm0, %v3713_v33 }
  0x25   : > { %230 = vst.msk [vmem:[#allocation2 + $0xc0] sm:$0xff] %vm205_vm0, %v3713_v33 }
  0x26   : > { %231 = vst.msk [vmem:[#allocation2 + $0xc8] sm:$0xff] %vm205_vm0, %v3713_v33 }
  0x27   : > { %232 = vst.msk [vmem:[#allocation2 + $0xd0] sm:$0xff] %vm205_vm0, %v3713_v33 }
  0x28   : > { %433 = vrot.lane.b32.xlu1 %v285_v9, %s3712_s24  ;;  %431 = vrot.lane.b32.xlu0 %v284_v10, %s3712_s24  ;;  %233 = vst.msk [vmem:[#allocation2 + $0xd8] sm:$0xff] %vm205_vm0, %v3713_v33 }
  0x29   : > { %435 = vrot.lane.b32.xlu2 %v286_v11, %s3712_s24  ;;  %234 = vst.msk [vmem:[#allocation2 + $0xe0] sm:$0xff] %vm205_vm0, %v3713_v33 }
  0x2a   : > { %235 = vst.msk [vmem:[#allocation2 + $0xe8] sm:$0xff] %vm205_vm0, %v3713_v33 }
  0x2b   : > { %236 = vst.msk [vmem:[#allocation2 + $0xf0] sm:$0xff] %vm205_vm0, %v3713_v33 }
  0x2c   : > { %237 = vst.msk [vmem:[#allocation2 + $0xf8] sm:$0xff] %vm205_vm0, %v3713_v33 }
  0x2d   : > { %238 = vst.msk [vmem:[#allocation2 + $0x100] sm:$0xff] %vm205_vm0, %v3713_v33 }
  0x2e   : > { %239 = vst.msk [vmem:[#allocation2 + $0x108] sm:$0xff] %vm205_vm0, %v3713_v33 }
  0x2f   : > { %240 = vst.msk [vmem:[#allocation2 + $0x110] sm:$0xff] %vm205_vm0, %v3713_v33 }
  0x30   : > { %439 = vrot.lane.b32.xlu1 %v288_v12, %s3712_s24  ;;  %437 = vrot.lane.b32.xlu0 %v287_v13, %s3712_s24  ;;  %241 = vst.msk [vmem:[#allocation2 + $0x118] sm:$0xff] %vm205_vm0, %v3713_v33  ;;  %v328_v12 = vld [vmem:[%s3771_s17 + $0x1a8] sm:$0xff] }
  0x31   : > { %441 = vrot.lane.b32.xlu2 %v289_v14, %s3712_s24  ;;  %242 = vst.msk [vmem:[#allocation2 + $0x120] sm:$0xff] %vm205_vm0, %v3713_v33  ;;  %v336_v13 = vld [vmem:[%s3771_s17 + $0x1e8] sm:$0xff]  ;;  %v335_v14 = vld [vmem:[%s3771_s17 + $0x1e0] sm:$0xff] }
  0x32   : > { %243 = vst.msk [vmem:[#allocation2 + $0x128] sm:$0xff] %vm205_vm0, %v3713_v33 }
  0x33   : > { %244 = vst.msk [vmem:[#allocation2 + $0x130] sm:$0xff] %vm205_vm0, %v3713_v33 }
  0x34   : > { %245 = vst.msk [vmem:[#allocation2 + $0x138] sm:$0xff] %vm205_vm0, %v3713_v33 }
  0x35   : > { %246 = vst.msk [vmem:[#allocation2 + $0x140] sm:$0xff] %vm205_vm0, %v3713_v33 }
  0x36   : > { %247 = vst.msk [vmem:[#allocation2 + $0x148] sm:$0xff] %vm205_vm0, %v3713_v33 }
  0x37   : > { %248 = vst.msk [vmem:[#allocation2 + $0x150] sm:$0xff] %vm205_vm0, %v3713_v33 }
  0x38   : > { %445 = vrot.lane.b32.xlu1 %v291_v15, %s3712_s24  ;;  %443 = vrot.lane.b32.xlu0 %v290_v16, %s3712_s24  ;;  %249 = vst.msk [vmem:[#allocation2 + $0x158] sm:$0xff] %vm205_vm0, %v3713_v33 }
  0x39   : > { %447 = vrot.lane.b32.xlu2 %v292_v17, %s3712_s24  ;;  %250 = vst.msk [vmem:[#allocation2 + $0x160] sm:$0xff] %vm205_vm0, %v3713_v33 }
  0x3a   : > { %251 = vst.msk [vmem:[#allocation2 + $0x168] sm:$0xff] %vm205_vm0, %v3713_v33 }
  0x3b   : > { %252 = vst.msk [vmem:[#allocation2 + $0x170] sm:$0xff] %vm205_vm0, %v3713_v33 }
  0x3c   : > { %253 = vst.msk [vmem:[#allocation2 + $0x178] sm:$0xff] %vm205_vm0, %v3713_v33 }
  0x3d   : > { %254 = vst.msk [vmem:[#allocation2 + $0x180] sm:$0xff] %vm205_vm0, %v3713_v33 }
  0x3e   : > { %255 = vst.msk [vmem:[#allocation2 + $0x188] sm:$0xff] %vm205_vm0, %v3713_v33 }
  0x3f   : > { %256 = vst.msk [vmem:[#allocation2 + $0x190] sm:$0xff] %vm205_vm0, %v3713_v33 }
  0x40   : > { %451 = vrot.lane.b32.xlu1 %v294_v18, %s3712_s24  ;;  %449 = vrot.lane.b32.xlu0 %v293_v19, %s3712_s24  ;;  %257 = vst.msk [vmem:[#allocation2 + $0x198] sm:$0xff] %vm205_vm0, %v3713_v33  ;;  %v331_v18 = vld [vmem:[%s3771_s17 + $0x1c0] sm:$0xff] }
  0x41   : > { %453 = vrot.lane.b32.xlu2 %v295_v20, %s3712_s24  ;;  %258 = vst.msk [vmem:[#allocation2 + $0x1a0] sm:$0xff] %vm205_vm0, %v3713_v33  ;;  %v339_v19 = vld [vmem:[%s3771_s17 + $0x200] sm:$0xff]  ;;  %v338_v20 = vld [vmem:[%s3771_s17 + $0x1f8] sm:$0xff] }
  0x42   : > { %259 = vst.msk [vmem:[#allocation2 + $0x1a8] sm:$0xff] %vm205_vm0, %v3713_v33 }
  0x43   : > { %260 = vst.msk [vmem:[#allocation2 + $0x1b0] sm:$0xff] %vm205_vm0, %v3713_v33 }
  0x44   : > { %261 = vst.msk [vmem:[#allocation2 + $0x1b8] sm:$0xff] %vm205_vm0, %v3713_v33 }
  0x45   : > { %262 = vst.msk [vmem:[#allocation2 + $0x1c0] sm:$0xff] %vm205_vm0, %v3713_v33 }
  0x46   : > { %263 = vst.msk [vmem:[#allocation2 + $0x1c8] sm:$0xff] %vm205_vm0, %v3713_v33 }
  0x47   : > { %264 = vst.msk [vmem:[#allocation2 + $0x1d0] sm:$0xff] %vm205_vm0, %v3713_v33 }
  0x48   : > { %457 = vrot.lane.b32.xlu1 %v297_v21, %s3712_s24  ;;  %455 = vrot.lane.b32.xlu0 %v296_v22, %s3712_s24  ;;  %265 = vst.msk [vmem:[#allocation2 + $0x1d8] sm:$0xff] %vm205_vm0, %v3713_v33 }
  0x49   : > { %459 = vrot.lane.b32.xlu2 %v298_v23, %s3712_s24  ;;  %266 = vst.msk [vmem:[#allocation2 + $0x1e0] sm:$0xff] %vm205_vm0, %v3713_v33 }
  0x4a   : > { %267 = vst.msk [vmem:[#allocation2 + $0x1e8] sm:$0xff] %vm205_vm0, %v3713_v33 }
  0x4b   : > { %268 = vst.msk [vmem:[#allocation2 + $0x1f0] sm:$0xff] %vm205_vm0, %v3713_v33 }
  0x4c   : > { %269 = vst.msk [vmem:[#allocation2 + $0x1f8] sm:$0xff] %vm205_vm0, %v3713_v33 }
  0x4d   : > { %270 = vst.msk [vmem:[#allocation2 + $0x200] sm:$0xff] %vm205_vm0, %v3713_v33 }
  0x4e   : > { %271 = vst.msk [vmem:[#allocation2 + $0x208] sm:$0xff] %vm205_vm0, %v3713_v33 }
  0x4f   : > { %272 = vst.msk [vmem:[#allocation2 + $0x210] sm:$0xff] %vm205_vm0, %v3713_v33 }
  0x50   : > { %463 = vrot.lane.b32.xlu1 %v300_v24, %s3712_s24  ;;  %461 = vrot.lane.b32.xlu0 %v299_v25, %s3712_s24  ;;  %273 = vst.msk [vmem:[#allocation2 + $0x218] sm:$0xff] %vm205_vm0, %v3713_v33  ;;  %v334_v24 = vld [vmem:[%s3771_s17 + $0x1d8] sm:$0xff] }
  0x51   : > { %465 = vrot.lane.b32.xlu2 %v301_v26, %s3712_s24  ;;  %274 = vst.msk [vmem:[#allocation2 + $0x220] sm:$0xff] %vm205_vm0, %v3713_v33  ;;  %v342_v25 = vld [vmem:[%s3771_s17 + $0x218] sm:$0xff]  ;;  %v341_v26 = vld [vmem:[%s3771_s17 + $0x210] sm:$0xff] }
  0x58   : > { %469 = vrot.lane.b32.xlu1 %v303_v27, %s3712_s24  ;;  %467 = vrot.lane.b32.xlu0 %v302_v28, %s3712_s24 }
  0x59   : > { %471 = vrot.lane.b32.xlu2 %v304_v29, %s3712_s24 }
  0x60   : > { %475 = vrot.lane.b32.xlu1 %v306_v30, %s3712_s24  ;;  %473 = vrot.lane.b32.xlu0 %v305_v31, %s3712_s24  ;;  %v337_v30 = vld [vmem:[%s3771_s17 + $0x1f0] sm:$0xff] }
  0x61   : > { %477 = vrot.lane.b32.xlu2 %v307_v32, %s3712_s24 }
  0x68   : > { %481 = vrot.lane.b32.xlu1 %v309_v34, %s3712_s24  ;;  %479 = vrot.lane.b32.xlu0 %v308_v35, %s3712_s24  ;;  %v340_v34 = vld [vmem:[%s3771_s17 + $0x208] sm:$0xff] }
  0x69   : > { %483 = vrot.lane.b32.xlu2 %v310_v36, %s3712_s24 }
  0x6b   : > { %v422_v37 = vpop.permute.xlu2 %421 }
  0x6c   : > { %625 = vst.msk [vmem:[#allocation2 + $0x20] sm:$0xff] %vm620_vm1, %v422_v37 }
  0x70   : > { %487 = vrot.lane.b32.xlu1 %v312_v38, %s3712_s24  ;;  %485 = vrot.lane.b32.xlu0 %v311_v39, %s3712_s24  ;;  %v343_v38 = vld [vmem:[%s3771_s17 + $0x220] sm:$0xff] }
  0x71   : > { %489 = vrot.lane.b32.xlu2 %v313_v46, %s3712_s24 }
  0x73   : > { %v3951_v49 = vpop.permute.xlu2 %423 }
  0x74   : > { %626 = vst.msk [vmem:[#allocation2 + $0x28] sm:$0xff] %vm620_vm1, %v3951_v49 }
  0x78   : > { %493 = vrot.lane.b32.xlu1 %v315_v40, %s3712_s24  ;;  %491 = vrot.lane.b32.xlu0 %v314_v41, %s3712_s24 }
  0x79   : > { %495 = vrot.lane.b32.xlu2 %v316_v52, %s3712_s24 }
  0x7b   : > { %v430_v55 = vpop.permute.xlu2 %429 }
  0x7c   : > { %629 = vst.msk [vmem:[#allocation2 + $0x40] sm:$0xff] %vm620_vm1, %v430_v55 }
  0x80   : > { %499 = vrot.lane.b32.xlu1 %v318_v42, %s3712_s24  ;;  %497 = vrot.lane.b32.xlu0 %v317_v43, %s3712_s24 }
  0x81   : > { %501 = vrot.lane.b32.xlu2 %v319_v58, %s3712_s24 }
  0x82   : > { %v3932_v44 = vpop.permute.xlu1 %417  ;;  %v3942_v45 = vpop.permute.xlu0 %413 }
  0x83   : > { %v436_v61 = vpop.permute.xlu2 %435  ;;  %623 = vst.msk [vmem:[#allocation2 + $0x10] sm:$0xff] %vm620_vm1, %v3932_v44 }
  0x84   : > { %621 = vst.msk [vmem:[#allocation2] sm:$0xff] %vm620_vm1, %v3942_v45 }
  0x85   : > { %632 = vst.msk [vmem:[#allocation2 + $0x58] sm:$0xff] %vm620_vm1, %v436_v61 }
  0x88   : > { %505 = vrot.lane.b32.xlu1 %v321_v47, %s3712_s24  ;;  %503 = vrot.lane.b32.xlu0 %v320_v48, %s3712_s24 }
  0x89   : > { %507 = vrot.lane.b32.xlu2 %v322_v0, %s3712_s24 }
  0x8a   : > { %v3960_v50 = vpop.permute.xlu1 %419  ;;  %v3970_v51 = vpop.permute.xlu0 %415 }
  0x8b   : > { %v442_v3 = vpop.permute.xlu2 %441  ;;  %624 = vst.msk [vmem:[#allocation2 + $0x18] sm:$0xff] %vm620_vm1, %v3960_v50 }
  0x8c   : > { %622 = vst.msk [vmem:[#allocation2 + $0x8] sm:$0xff] %vm620_vm1, %v3970_v51 }
  0x8d   : > { %635 = vst.msk [vmem:[#allocation2 + $0x70] sm:$0xff] %vm620_vm1, %v442_v3 }
  0x90   : > { %511 = vrot.lane.b32.xlu1 %v324_v53, %s3712_s24  ;;  %509 = vrot.lane.b32.xlu0 %v323_v54, %s3712_s24 }
  0x91   : > { %513 = vrot.lane.b32.xlu2 %v325_v6, %s3712_s24 }
  0x92   : > { %v428_v56 = vpop.permute.xlu1 %427  ;;  %v426_v57 = vpop.permute.xlu0 %425 }
  0x93   : > { %v448_v9 = vpop.permute.xlu2 %447  ;;  %628 = vst.msk [vmem:[#allocation2 + $0x38] sm:$0xff] %vm620_vm1, %v428_v56 }
  0x94   : > { %627 = vst.msk [vmem:[#allocation2 + $0x30] sm:$0xff] %vm620_vm1, %v426_v57 }
  0x95   : > { %638 = vst.msk [vmem:[#allocation2 + $0x88] sm:$0xff] %vm620_vm1, %v448_v9 }
  0x98   : > { %517 = vrot.lane.b32.xlu1 %v327_v59, %s3712_s24  ;;  %515 = vrot.lane.b32.xlu0 %v326_v60, %s3712_s24 }
  0x99   : > { %519 = vrot.lane.b32.xlu2 %v328_v12, %s3712_s24 }
  0x9a   : > { %v434_v62 = vpop.permute.xlu1 %433  ;;  %v432_v63 = vpop.permute.xlu0 %431 }
  0x9b   : > { %631 = vst.msk [vmem:[#allocation2 + $0x50] sm:$0xff] %vm620_vm1, %v434_v62  ;;  %v454_v15 = vpop.permute.xlu2 %453 }
  0x9c   : > { %630 = vst.msk [vmem:[#allocation2 + $0x48] sm:$0xff] %vm620_vm1, %v432_v63  ;;  %v690_v63 = vlaneseq }
  0x9d   : > { %641 = vst.msk [vmem:[#allocation2 + $0xa0] sm:$0xff] %vm620_vm1, %v454_v15 }
  0x9e   : > { %v691_v0 = vand.u32 127, %v690_v63 }
  0xa0   : > { %523 = vrot.lane.b32.xlu1 %v330_v1, %s3712_s24  ;;  %521 = vrot.lane.b32.xlu0 %v329_v2, %s3712_s24  ;;  %v695_v3 = vand.u32 65535, %v691_v0 }
  0xa1   : > { %525 = vrot.lane.b32.xlu2 %v331_v18, %s3712_s24 }
  0xa2   : > { %v440_v4 = vpop.permute.xlu1 %439  ;;  %v438_v5 = vpop.permute.xlu0 %437  ;;  %v699_v6 = vmul.u32 37449, %v695_v3 }
  0xa3   : > { %634 = vst.msk [vmem:[#allocation2 + $0x68] sm:$0xff] %vm620_vm1, %v440_v4  ;;  %v460_v21 = vpop.permute.xlu2 %459  ;;  %v696_v4 = vshrl.u32 %v691_v0, 16 }
  0xa4   : > { %633 = vst.msk [vmem:[#allocation2 + $0x60] sm:$0xff] %vm620_vm1, %v438_v5  ;;  %v698_v5 = vmul.u32 9362, %v695_v3 }
  0xa5   : > { %644 = vst.msk [vmem:[#allocation2 + $0xb8] sm:$0xff] %vm620_vm1, %v460_v21  ;;  %v701_v9 = vmul.u32 37449, %v696_v4 }
  0xa8   : > { %529 = vrot.lane.b32.xlu1 %v333_v7, %s3712_s24  ;;  %527 = vrot.lane.b32.xlu0 %v332_v8, %s3712_s24  ;;  %v700_v7 = vmul.u32 9362, %v696_v4 }
  0xa9   : > { %531 = vrot.lane.b32.xlu2 %v334_v24, %s3712_s24 }
  0xaa   : > { %v446_v10 = vpop.permute.xlu1 %445  ;;  %v444_v11 = vpop.permute.xlu0 %443  ;;  %v705_v21 = vshrl.u32 %v700_v7, 16 }
  0xab   : > { %637 = vst.msk [vmem:[#allocation2 + $0x80] sm:$0xff] %vm620_vm1, %v446_v10  ;;  %v466_v27 = vpop.permute.xlu2 %465  ;;  %v702_v10 = vshll.u32 %v699_v6, 16 }
  0xac   : > { %636 = vst.msk [vmem:[#allocation2 + $0x78] sm:$0xff] %vm620_vm1, %v444_v11  ;;  %v704_v11 = vshll.u32 %v700_v7, 16 }
  0xad   : > { %647 = vst.msk [vmem:[#allocation2 + $0xd0] sm:$0xff] %vm620_vm1, %v466_v27  ;;  %vm706_vm2 = vc.u32 %v698_v5, %v702_v10  ;;  %v708_v12 = vadd.s32 %v702_v10, %v698_v5 }
  0xaf   : > { %vm710_vm3 = vc.u32 %v708_v12, %v704_v11 }
  0xb0   : > { %535 = vrot.lane.b32.xlu1 %v336_v13, %s3712_s24  ;;  %533 = vrot.lane.b32.xlu0 %v335_v14, %s3712_s24  ;;  %v3714_v13 = vmov 0  }
  0xb1   : > { %537 = vrot.lane.b32.xlu2 %v337_v30, %s3712_s24  ;;  %v707_v14 = vsel %vm706_vm2, 1, %v3714_v13 }
  0xb2   : > { %v452_v16 = vpop.permute.xlu1 %451  ;;  %v450_v17 = vpop.permute.xlu0 %449  ;;  %v709_v18 = vadd.s32 %v707_v14, %v701_v9 }
  0xb3   : > { %640 = vst.msk [vmem:[#allocation2 + $0x98] sm:$0xff] %vm620_vm1, %v452_v16  ;;  %v472_v31 = vpop.permute.xlu2 %471 }
  0xb4   : > { %639 = vst.msk [vmem:[#allocation2 + $0x90] sm:$0xff] %vm620_vm1, %v450_v17  ;;  %v703_v17 = vshrl.u32 %v699_v6, 16 }
  0xb5   : > { %650 = vst.msk [vmem:[#allocation2 + $0xe8] sm:$0xff] %vm620_vm1, %v472_v31 }
  0xb8   : > { %541 = vrot.lane.b32.xlu1 %v339_v19, %s3712_s24  ;;  %539 = vrot.lane.b32.xlu0 %v338_v20, %s3712_s24  ;;  %v712_v19 = vadd.s32 %v708_v12, %v704_v11  ;;  %v711_v20 = vsel %vm710_vm3, 1, %v3714_v13 }
  0xb9   : > { %543 = vrot.lane.b32.xlu2 %v340_v34, %s3712_s24 }
  0xba   : > { %v458_v22 = vpop.permute.xlu1 %457  ;;  %v456_v23 = vpop.permute.xlu0 %455  ;;  %vm716_vm4 = vc.u32 %v712_v19, 2454267026 }
  0xbb   : > { %643 = vst.msk [vmem:[#allocation2 + $0xb0] sm:$0xff] %vm620_vm1, %v458_v22  ;;  %v478_v35 = vpop.permute.xlu2 %477  ;;  %v713_v22 = vadd.s32 %v711_v20, %v709_v18 }
  0xbc   : > { %642 = vst.msk [vmem:[#allocation2 + $0xa8] sm:$0xff] %vm620_vm1, %v456_v23 }
  0xbd   : > { %653 = vst.msk [vmem:[#allocation2 + $0x100] sm:$0xff] %vm620_vm1, %v478_v35  ;;  %v714_v24 = vadd.s32 %v713_v22, %v703_v17 }
  0xc0   : > { %547 = vrot.lane.b32.xlu1 %v342_v25, %s3712_s24  ;;  %545 = vrot.lane.b32.xlu0 %v341_v26, %s3712_s24  ;;  %v717_v25 = vsel %vm716_vm4, 1, %v3714_v13  ;;  %v715_v26 = vadd.s32 %v714_v24, %v705_v21 }
  0xc1   : > { %549 = vrot.lane.b32.xlu2 %v343_v38, %s3712_s24 }
  0xc2   : > { %v464_v28 = vpop.permute.xlu1 %463  ;;  %v462_v29 = vpop.permute.xlu0 %461 }
  0xc3   : > { %646 = vst.msk [vmem:[#allocation2 + $0xc8] sm:$0xff] %vm620_vm1, %v464_v28  ;;  %v484_v39 = vpop.permute.xlu2 %483 }
  0xc4   : > { %645 = vst.msk [vmem:[#allocation2 + $0xc0] sm:$0xff] %vm620_vm1, %v462_v29  ;;  %v718_v29 = vadd.s32 %v717_v25, %v715_v26 }
  0xc5   : > { %656 = vst.msk [vmem:[#allocation2 + $0x118] sm:$0xff] %vm620_vm1, %v484_v39 }
  0xc6   : > { %v719_v30 = vshrl.u32 %v718_v29, 2 }
  0xca   : > { %v470_v32 = vpop.permute.xlu1 %469  ;;  %v468_v33 = vpop.permute.xlu0 %467 }
  0xcb   : > { %649 = vst.msk [vmem:[#allocation2 + $0xe0] sm:$0xff] %vm620_vm1, %v470_v32  ;;  %v490_v43 = vpop.permute.xlu2 %489  ;;  %v720_v32 = vmul.u32 7, %v719_v30 }
  0xcc   : > { %648 = vst.msk [vmem:[#allocation2 + $0xd8] sm:$0xff] %vm620_vm1, %v468_v33 }
  0xcd   : > { %659 = vst.msk [vmem:[#allocation2 + $0x130] sm:$0xff] %vm620_vm1, %v490_v43  ;;  %v721_v33 = vsub.s32 %v691_v0, %v720_v32 }
  0xcf   : > { %vm724_vm5 = vcmp.ne.s32.totalorder %v721_v33, 0  ;;  %vm725_vm6 = vcmp.lt.s32.totalorder %v721_v33, 0 }
  0xd0   : > { %vm726_vm7 = vmand %vm725_vm6, %vm724_vm5 }
  0xd2   : > { %v476_v36 = vpop.permute.xlu1 %475  ;;  %v474_v37 = vpop.permute.xlu0 %473 }
  0xd3   : > { %652 = vst.msk [vmem:[#allocation2 + $0xf8] sm:$0xff] %vm620_vm1, %v476_v36  ;;  %v496_v46 = vpop.permute.xlu2 %495  ;;  %v727_v36 = vadd.s32 7, %v721_v33 }
  0xd4   : > { %651 = vst.msk [vmem:[#allocation2 + $0xf0] sm:$0xff] %vm620_vm1, %v474_v37 }
  0xd5   : > { %662 = vst.msk [vmem:[#allocation2 + $0x148] sm:$0xff] %vm620_vm1, %v496_v46  ;;  %v4140_v37 = vsel %vm726_vm7, %v727_v36, %v721_v33 }
  0xd6   : > { %6302 = vst [vmem:[#allocation3_spill] sm:$0xff] %v4140_v37  ;;  %vm729_vm8 = vcmp.ne.s32.totalorder %v4140_v37, 0  ;;  %vm730_vm9 = vcmp.ne.s32.totalorder %v4140_v37, 6 }
  0xda   : > { %v482_v40 = vpop.permute.xlu1 %481  ;;  %v480_v41 = vpop.permute.xlu0 %479 }
  0xdb   : > { %655 = vst.msk [vmem:[#allocation2 + $0x110] sm:$0xff] %vm620_vm1, %v482_v40  ;;  %v502_v49 = vpop.permute.xlu2 %501 }
  0xdc   : > { %654 = vst.msk [vmem:[#allocation2 + $0x108] sm:$0xff] %vm620_vm1, %v480_v41 }
  0xdd   : > { %665 = vst.msk [vmem:[#allocation2 + $0x160] sm:$0xff] %vm620_vm1, %v502_v49 }
  0xe2   : > { %v488_v42 = vpop.permute.xlu1 %487  ;;  %v486_v44 = vpop.permute.xlu0 %485 }
  0xe3   : > { %658 = vst.msk [vmem:[#allocation2 + $0x128] sm:$0xff] %vm620_vm1, %v488_v42  ;;  %v508_v51 = vpop.permute.xlu2 %507 }
  0xe4   : > { %657 = vst.msk [vmem:[#allocation2 + $0x120] sm:$0xff] %vm620_vm1, %v486_v44 }
  0xe5   : > { %668 = vst.msk [vmem:[#allocation2 + $0x178] sm:$0xff] %vm620_vm1, %v508_v51 }
  0xea   : > { %v494_v45 = vpop.permute.xlu1 %493  ;;  %v492_v47 = vpop.permute.xlu0 %491 }
  0xeb   : > { %661 = vst.msk [vmem:[#allocation2 + $0x140] sm:$0xff] %vm620_vm1, %v494_v45  ;;  %v514_v54 = vpop.permute.xlu2 %513 }
  0xec   : > { %660 = vst.msk [vmem:[#allocation2 + $0x138] sm:$0xff] %vm620_vm1, %v492_v47 }
  0xed   : > { %671 = vst.msk [vmem:[#allocation2 + $0x190] sm:$0xff] %vm620_vm1, %v514_v54 }
  0xf2   : > { %v500_v48 = vpop.permute.xlu1 %499  ;;  %v498_v50 = vpop.permute.xlu0 %497 }
  0xf3   : > { %664 = vst.msk [vmem:[#allocation2 + $0x158] sm:$0xff] %vm620_vm1, %v500_v48  ;;  %v520_v57 = vpop.permute.xlu2 %519 }
  0xf4   : > { %663 = vst.msk [vmem:[#allocation2 + $0x150] sm:$0xff] %vm620_vm1, %v498_v50 }
  0xf5   : > { %674 = vst.msk [vmem:[#allocation2 + $0x1a8] sm:$0xff] %vm620_vm1, %v520_v57 }
  0xfa   : > { %v506_v52 = vpop.permute.xlu1 %505  ;;  %v504_v53 = vpop.permute.xlu0 %503 }
  0xfb   : > { %667 = vst.msk [vmem:[#allocation2 + $0x170] sm:$0xff] %vm620_vm1, %v506_v52  ;;  %v526_v60 = vpop.permute.xlu2 %525 }
  0xfc   : > { %666 = vst.msk [vmem:[#allocation2 + $0x168] sm:$0xff] %vm620_vm1, %v504_v53 }
  0xfd   : > { %677 = vst.msk [vmem:[#allocation2 + $0x1c0] sm:$0xff] %vm620_vm1, %v526_v60 }
 0x102   : > { %v512_v55 = vpop.permute.xlu1 %511  ;;  %v510_v56 = vpop.permute.xlu0 %509 }
 0x103   : > { %670 = vst.msk [vmem:[#allocation2 + $0x188] sm:$0xff] %vm620_vm1, %v512_v55  ;;  %v532_v1 = vpop.permute.xlu2 %531 }
 0x104   : > { %669 = vst.msk [vmem:[#allocation2 + $0x180] sm:$0xff] %vm620_vm1, %v510_v56 }
 0x105   : > { %680 = vst.msk [vmem:[#allocation2 + $0x1d8] sm:$0xff] %vm620_vm1, %v532_v1 }
 0x10a   : > { %v518_v58 = vpop.permute.xlu1 %517  ;;  %v516_v59 = vpop.permute.xlu0 %515 }
 0x10b   : > { %673 = vst.msk [vmem:[#allocation2 + $0x1a0] sm:$0xff] %vm620_vm1, %v518_v58  ;;  %v538_v15 = vpop.permute.xlu2 %537 }
 0x10c   : > { %672 = vst.msk [vmem:[#allocation2 + $0x198] sm:$0xff] %vm620_vm1, %v516_v59 }
 0x10d   : > { %683 = vst.msk [vmem:[#allocation2 + $0x1f0] sm:$0xff] %vm620_vm1, %v538_v15 }
 0x112   : > { %v524_v61 = vpop.permute.xlu1 %523  ;;  %v522_v62 = vpop.permute.xlu0 %521 }
 0x113   : > { %676 = vst.msk [vmem:[#allocation2 + $0x1b8] sm:$0xff] %vm620_vm1, %v524_v61  ;;  %v544_v27 = vpop.permute.xlu2 %543 }
 0x114   : > { %675 = vst.msk [vmem:[#allocation2 + $0x1b0] sm:$0xff] %vm620_vm1, %v522_v62 }
 0x115   : > { %686 = vst.msk [vmem:[#allocation2 + $0x208] sm:$0xff] %vm620_vm1, %v544_v27 }
 0x11a   : > { %v530_v2 = vpop.permute.xlu1 %529  ;;  %v528_v8 = vpop.permute.xlu0 %527 }
 0x11b   : > { %679 = vst.msk [vmem:[#allocation2 + $0x1d0] sm:$0xff] %vm620_vm1, %v530_v2  ;;  %v550_v34 = vpop.permute.xlu2 %549 }
 0x11c   : > { %678 = vst.msk [vmem:[#allocation2 + $0x1c8] sm:$0xff] %vm620_vm1, %v528_v8 }
 0x11d   : > { %689 = vst.msk [vmem:[#allocation2 + $0x220] sm:$0xff] %vm620_vm1, %v550_v34 }
 0x122   : > { %v536_v16 = vpop.permute.xlu1 %535  ;;  %v534_v23 = vpop.permute.xlu0 %533 }
 0x123   : > { %682 = vst.msk [vmem:[#allocation2 + $0x1e8] sm:$0xff] %vm620_vm1, %v536_v16 }
 0x124   : > { %681 = vst.msk [vmem:[#allocation2 + $0x1e0] sm:$0xff] %vm620_vm1, %v534_v23 }
 0x12a   : > { %v542_v28 = vpop.permute.xlu1 %541  ;;  %v540_v31 = vpop.permute.xlu0 %539 }
 0x12b   : > { %685 = vst.msk [vmem:[#allocation2 + $0x200] sm:$0xff] %vm620_vm1, %v542_v28 }
 0x12c   : > { %684 = vst.msk [vmem:[#allocation2 + $0x1f8] sm:$0xff] %vm620_vm1, %v540_v31 }
 0x132   : > { %v548_v35 = vpop.permute.xlu1 %547  ;;  %v546_v38 = vpop.permute.xlu0 %545 }
 0x133   : > { %688 = vst.msk [vmem:[#allocation2 + $0x218] sm:$0xff] %vm620_vm1, %v548_v35 }
 0x134   : > { %687 = vst.msk [vmem:[#allocation2 + $0x210] sm:$0xff] %vm620_vm1, %v546_v38 }
 0x135 LB: >> { %v3715_v39 = vmov 4   ;;  %s4151_s26 = smul.u32 184, %s3710_s25  ;;  %v3716_v63 = vmov 0   ;;  %s3717_s3 = smov 8   ;;  %vm3367_vm10 = vcmask 400384   ;;  %s3710_s25 = sphi %s4145_s25, %s736_s25  }
 0x136   : >> { %3565 = vset.pattern.permute.xlu2 %v3715_v39  ;;  %3564 = vset.pattern.permute.xlu1 %v3715_v39  ;;  %s3719_s4 = smov 7   ;;  %s3720_s5 = smov 126  }
 0x137   : >> { %3563 = vset.pattern.permute.xlu0 %v3715_v39  ;;  %s4159_s29 = scalar_lea.vmem %s193_s20, %s4151_s26  ;;  %s4307_s30 = scalar_lea.vmem [#allocation2], %s4151_s26 }
 0x138   : >> { %v4162_v40 = vld [vmem:[%s4159_s29 + $0x20] sm:$0xff]  ;;  %v4165_v41 = vld [vmem:[%s4159_s29 + $0x10] sm:$0xff]  ;;  %v4174_v43 = vld [vmem:[%s4159_s29 + $0x28] sm:$0xff]  ;;  %s3722_s6 = smov 121   ;;  %s3724_s7 = smov 119  }
 0x139   : >> { %v4168_v42 = vld [vmem:[%s4159_s29] sm:$0xff]  ;;  %808 = vperm.xlu2 %3565, %v4162_v40   ;;  %798 = vperm.xlu1 %3564, %v4165_v41   ;;  %v4177_v44 = vld [vmem:[%s4159_s29 + $0x18] sm:$0xff]  ;;  %v4180_v45 = vld [vmem:[%s4159_s29 + $0x8] sm:$0xff]  ;;  %s3726_s8 = smov 114   ;;  %s3729_s9 = smov 112  }
 0x13a   : >> { %788 = vperm.xlu0 %3563, %v4168_v42   ;;  %v4186_v46 = vld [vmem:[%s4159_s29 + $0x40] sm:$0xff]  ;;  %v4189_v47 = vld [vmem:[%s4159_s29 + $0x38] sm:$0xff]  ;;  %v4192_v48 = vld [vmem:[%s4159_s29 + $0x30] sm:$0xff]  ;;  %s3731_s13 = smov 120   ;;  %s6214_s17 = scalar_lea.vmem %s203_s23, %s4151_s26 }
 0x13b   : >> { %v4198_v49 = vld [vmem:[%s4159_s29 + $0x58] sm:$0xff]  ;;  %v4201_v50 = vld [vmem:[%s4159_s29 + $0x50] sm:$0xff]  ;;  %v4204_v51 = vld [vmem:[%s4159_s29 + $0x48] sm:$0xff]  ;;  %s736_s25 = sadd.s32 1, %s3710_s25  }
 0x13c   : >> { %v4210_v52 = vld [vmem:[%s4159_s29 + $0x70] sm:$0xff]  ;;  %v4213_v53 = vld [vmem:[%s4159_s29 + $0x68] sm:$0xff]  ;;  %v4216_v54 = vld [vmem:[%s4159_s29 + $0x60] sm:$0xff]  ;;  %p733_p5 = scmp.ge.s32.totalorder %s736_s25, 3  }
 0x13d   : >> { %v4222_v55 = vld [vmem:[%s4159_s29 + $0x88] sm:$0xff]  ;;  %v4225_v56 = vld [vmem:[%s4159_s29 + $0x80] sm:$0xff]  ;;  %v4228_v57 = vld [vmem:[%s4159_s29 + $0x78] sm:$0xff] }
 0x13e   : >> { %v4234_v58 = vld [vmem:[%s4159_s29 + $0xa0] sm:$0xff]  ;;  %v4237_v59 = vld [vmem:[%s4159_s29 + $0x98] sm:$0xff]  ;;  %v4240_v60 = vld [vmem:[%s4159_s29 + $0x90] sm:$0xff] }
 0x13f   : >> { %v4246_v61 = vld [vmem:[%s4159_s29 + $0xb0] sm:$0xff]  ;;  %v4249_v62 = vld [vmem:[%s4159_s29 + $0xa8] sm:$0xff]  ;;  %v4310_v15 = vld [vmem:[%s4307_s30] sm:$0xff] }
 0x140   : >> { %v926_v16 = vsel %vm729_vm8, %v4310_v15, 0.0  ;;  %v4321_v21 = vld [vmem:[%s4307_s30 + $0x18] sm:$0xff]  ;;  %v4340_v32 = vld [vmem:[%s4307_s30 + $0x10] sm:$0xff]  ;;  %v4343_v33 = vld [vmem:[%s4307_s30 + $0x8] sm:$0xff] }
 0x141   : >> { %813 = vperm.xlu2 %3565, %v4174_v43   ;;  %803 = vperm.xlu1 %3564, %v4177_v44   ;;  %v929_v23 = vsel %vm729_vm8, %v4321_v21, 0.0  ;;  %v928_v34 = vsel %vm729_vm8, %v4340_v32, 0.0  ;;  %v927_v35 = vsel %vm729_vm8, %v4343_v33, 0.0 }
 0x142   : >> { %793 = vperm.xlu0 %3563, %v4180_v45  }
 0x149   : >> { %828 = vperm.xlu2 %3565, %v4186_v46   ;;  %823 = vperm.xlu1 %3564, %v4189_v47  }
 0x14a   : >> { %818 = vperm.xlu0 %3563, %v4192_v48  }
 0x151   : >> { %843 = vperm.xlu2 %3565, %v4198_v49   ;;  %838 = vperm.xlu1 %3564, %v4201_v50  }
 0x152   : >> { %833 = vperm.xlu0 %3563, %v4204_v51  }
 0x159   : >> { %858 = vperm.xlu2 %3565, %v4210_v52   ;;  %853 = vperm.xlu1 %3564, %v4213_v53  }
 0x15a   : >> { %848 = vperm.xlu0 %3563, %v4216_v54  }
 0x161   : >> { %873 = vperm.xlu2 %3565, %v4222_v55   ;;  %868 = vperm.xlu1 %3564, %v4225_v56  }
 0x162   : >> { %863 = vperm.xlu0 %3563, %v4228_v57  }
 0x169   : >> { %888 = vperm.xlu2 %3565, %v4234_v58   ;;  %883 = vperm.xlu1 %3564, %v4237_v59  }
 0x16a   : >> { %878 = vperm.xlu0 %3563, %v4240_v60  }
 0x171   : >> { %3566 = vset.pattern.permute.xlu2 %v3716_v63  ;;  %898 = vperm.xlu1 %3564, %v4246_v61  }
 0x172   : >> { %893 = vperm.xlu0 %3563, %v4249_v62   ;;  %950 = vperm.xlu2 %3566, %v4168_v42  }
 0x179   : >> { %3568 = vset.pattern.permute.xlu1 %v3716_v63 }
 0x17a   : >> { %3567 = vset.pattern.permute.xlu0 %v3716_v63  ;;  %958 = vperm.xlu1 %3568, %v4165_v41  }
 0x17b   : >> { %962 = vperm.xlu2 %3566, %v4177_v44   ;;  %954 = vperm.xlu0 %3567, %v4180_v45  }
 0x182   : >> { %966 = vperm.xlu1 %3568, %v4162_v40  }
 0x183   : >> { %970 = vperm.xlu2 %3566, %v4174_v43   ;;  %974 = vperm.xlu0 %3567, %v4192_v48  }
 0x18a   : >> { %978 = vperm.xlu1 %3568, %v4189_v47  }
 0x18b   : >> { %982 = vperm.xlu2 %3566, %v4186_v46   ;;  %986 = vperm.xlu0 %3567, %v4204_v51  }
 0x192   : >> { %990 = vperm.xlu1 %3568, %v4201_v50  }
 0x193   : >> { %994 = vperm.xlu2 %3566, %v4198_v49   ;;  %998 = vperm.xlu0 %3567, %v4216_v54   ;;  %v4266_v0 = vpop.permute.xlu2 %808 }
 0x194   : >> { %6304 = vst [vmem:[#allocation4_spill] sm:$0xff] %v4266_v0 }
 0x19a   : >> { %1002 = vperm.xlu1 %3568, %v4213_v53  }
 0x19b   : >> { %1006 = vperm.xlu2 %3566, %v4210_v52   ;;  %1010 = vperm.xlu0 %3567, %v4228_v57   ;;  %v4271_v1 = vpop.permute.xlu2 %813 }
 0x19c   : >> { %6305 = vst [vmem:[#allocation5_spill] sm:$0xff] %v4271_v1  ;;  %v4402_v1 = vld [vmem:[%s4307_s30 + $0x60] sm:$0xff] }
 0x1a2   : >> { %1014 = vperm.xlu1 %3568, %v4225_v56  }
 0x1a3   : >> { %1018 = vperm.xlu2 %3566, %v4222_v55   ;;  %1022 = vperm.xlu0 %3567, %v4240_v60   ;;  %v4276_v2 = vpop.permute.xlu2 %828 }
 0x1a4   : >> { %6306 = vst [vmem:[#allocation6_spill] sm:$0xff] %v4276_v2  ;;  %v4396_v2 = vld [vmem:[%s4307_s30 + $0x58] sm:$0xff] }
 0x1a5   : >> { %v937_v0 = vsel %vm729_vm8, %v4396_v2, 0.0 }
 0x1aa   : >> { %1026 = vperm.xlu1 %3568, %v4237_v59  }
 0x1ab   : >> { %1030 = vperm.xlu2 %3566, %v4234_v58   ;;  %1034 = vperm.xlu0 %3567, %v4249_v62   ;;  %v4281_v3 = vpop.permute.xlu2 %843  ;;  %v4283_v4 = vpop.permute.xlu1 %798 }
 0x1ac   : >> { %6307 = vst [vmem:[#allocation7_spill] sm:$0xff] %v4281_v3  ;;  %v4285_v5 = vpop.permute.xlu0 %788  ;;  %v4378_v3 = vld [vmem:[%s4307_s30 + $0x38] sm:$0xff] }
 0x1ad   : >> { %6308 = vst [vmem:[#allocation8_spill] sm:$0xff] %v4283_v4  ;;  %v4438_v4 = vld [vmem:[%s4307_s30 + $0x88] sm:$0xff] }
 0x1ae   : >> { %6309 = vst [vmem:[#allocation9_spill] sm:$0xff] %v4285_v5  ;;  %v4465_v5 = vld [vmem:[%s4307_s30 + $0xa8] sm:$0xff] }
 0x1b2   : >> { %1038 = vperm.xlu1 %3568, %v4246_v61  }
 0x1b3   : >> { %v4288_v6 = vpop.permute.xlu2 %858  ;;  %v4290_v7 = vpop.permute.xlu1 %803 }
 0x1b4   : >> { %6310 = vst [vmem:[#allocation10_spill] sm:$0xff] %v4288_v6  ;;  %v4292_v8 = vpop.permute.xlu0 %793  ;;  %v4375_v6 = vld [vmem:[%s4307_s30 + $0x40] sm:$0xff] }
 0x1b5   : >> { %6311 = vst [vmem:[#allocation11_spill] sm:$0xff] %v4290_v7  ;;  %v4462_v7 = vld [vmem:[%s4307_s30 + $0x98] sm:$0xff] }
 0x1b6   : >> { %6312 = vst [vmem:[#allocation12_spill] sm:$0xff] %v4292_v8  ;;  %v4420_v8 = vld [vmem:[%s4307_s30 + $0x68] sm:$0xff] }
 0x1bb   : >> { %v4294_v9 = vpop.permute.xlu2 %873  ;;  %v4296_v10 = vpop.permute.xlu1 %823 }
 0x1bc   : >> { %6313 = vst [vmem:[#allocation13_spill] sm:$0xff] %v4294_v9  ;;  %v4298_v11 = vpop.permute.xlu0 %818 }
 0x1bd   : >> { %6314 = vst [vmem:[#allocation14_spill] sm:$0xff] %v4296_v10  ;;  %v4381_v10 = vld [vmem:[%s4307_s30 + $0x48] sm:$0xff] }
 0x1be   : >> { %6315 = vst [vmem:[#allocation15_spill] sm:$0xff] %v4298_v11  ;;  %v4444_v11 = vld [vmem:[%s4307_s30 + $0x90] sm:$0xff] }
 0x1c3   : >> { %v4300_v12 = vpop.permute.xlu2 %888  ;;  %v4302_v13 = vpop.permute.xlu1 %838 }
 0x1c4   : >> { %6316 = vst [vmem:[#allocation16_spill] sm:$0xff] %v4300_v12  ;;  %v4304_v14 = vpop.permute.xlu0 %833  ;;  %v4480_v12 = vld [vmem:[%s4307_s30 + $0xb0] sm:$0xff] }
 0x1c5   : >> { %6317 = vst [vmem:[#allocation17_spill] sm:$0xff] %v4302_v13 }
 0x1c6   : >> { %6318 = vst [vmem:[#allocation18_spill] sm:$0xff] %v4304_v14  ;;  %v4441_v14 = vld [vmem:[%s4307_s30 + $0x80] sm:$0xff] }
 0x1cb   : >> { %v4315_v17 = vpop.permute.xlu1 %853 }
 0x1cc   : >> { %6319 = vst [vmem:[#allocation19_spill] sm:$0xff] %v4315_v17  ;;  %v4317_v18 = vpop.permute.xlu0 %848  ;;  %v951_v19 = vpop.permute.xlu2 %950 }
 0x1cd   : >> { %6320 = vst [vmem:[#allocation20_spill] sm:$0xff] %v4317_v18  ;;  %v1041_v20 = vmul.f32 %v951_v19, %v926_v16  ;;  %v4354_v16 = vld [vmem:[%s4307_s30 + $0x20] sm:$0xff]  ;;  %v4357_v19 = vld [vmem:[%s4307_s30 + $0x28] sm:$0xff]  ;;  %v4417_v18 = vld [vmem:[%s4307_s30 + $0x70] sm:$0xff] }
 0x1cf   : >> { %1087 = vrot.lane.b32.xlu2 %v1041_v20, %s3717_s3  ;;  %v4360_v20 = vld [vmem:[%s4307_s30 + $0x30] sm:$0xff] }
 0x1d3   : >> { %v4323_v22 = vpop.permute.xlu1 %868 }
 0x1d4   : >> { %6321 = vst [vmem:[#allocation21_spill] sm:$0xff] %v4323_v22  ;;  %v4328_v24 = vpop.permute.xlu0 %863 }
 0x1d5   : >> { %6322 = vst [vmem:[#allocation22_spill] sm:$0xff] %v4328_v24  ;;  %v963_v25 = vpop.permute.xlu2 %962  ;;  %v4399_v24 = vld [vmem:[%s4307_s30 + $0x50] sm:$0xff] }
 0x1d6   : >> { %v1044_v26 = vmul.f32 %v963_v25, %v929_v23  ;;  %v931_v23 = vsel %vm729_vm8, %v4357_v19, 0.0 }
 0x1d8   : >> { %1093 = vrot.lane.b32.xlu2 %v1044_v26, %s3717_s3  ;;  %v930_v26 = vsel %vm729_vm8, %v4354_v16, 0.0 }
 0x1db   : >> { %v4331_v27 = vpop.permute.xlu1 %883 }
 0x1dc   : >> { %6323 = vst [vmem:[#allocation23_spill] sm:$0xff] %v4331_v27  ;;  %v4333_v28 = vpop.permute.xlu0 %878 }
 0x1dd   : >> { %6324 = vst [vmem:[#allocation24_spill] sm:$0xff] %v4333_v28  ;;  %v971_v31 = vpop.permute.xlu2 %970 }
 0x1e3   : >> { %v4335_v29 = vpop.permute.xlu1 %898 }
 0x1e4   : >> { %6325 = vst [vmem:[#allocation25_spill] sm:$0xff] %v4335_v29  ;;  %v4337_v30 = vpop.permute.xlu0 %893 }
 0x1e5   : >> { %6326 = vst [vmem:[#allocation26_spill] sm:$0xff] %v4337_v30  ;;  %v983_v25 = vpop.permute.xlu2 %982  ;;  %v948_v30 = vsel %vm729_vm8, %v4480_v12, 0.0 }
 0x1ec   : >> { %v959_v36 = vpop.permute.xlu1 %958 }
 0x1ed   : >> { %v1043_v38 = vmul.f32 %v959_v36, %v928_v34  ;;  %v955_v39 = vpop.permute.xlu0 %954  ;;  %v932_v34 = vsel %vm729_vm8, %v4360_v20, 0.0  ;;  %v1046_v36 = vmul.f32 %v971_v31, %v931_v23  ;;  %v934_v31 = vsel %vm729_vm8, %v4375_v6, 0.0 }
 0x1ee   : >> { %v1042_v63 = vmul.f32 %v955_v39, %v927_v35  ;;  %v933_v23 = vsel %vm729_vm8, %v4378_v3, 0.0 }
 0x1ef   : >> { %1091 = vrot.lane.b32.xlu1 %v1043_v38, %s3717_s3 }
 0x1f0   : >> { %1089 = vrot.lane.b32.xlu0 %v1042_v63, %s3717_s3 }
 0x1f4   : >> { %v967_v35 = vpop.permute.xlu1 %966 }
 0x1f5   : >> { %v1045_v38 = vmul.f32 %v967_v35, %v930_v26  ;;  %v975_v39 = vpop.permute.xlu0 %974  ;;  %v935_v26 = vsel %vm729_vm8, %v4381_v10, 0.0 }
 0x1f6   : >> { %v1047_v63 = vmul.f32 %v975_v39, %v932_v34  ;;  %v995_v34 = vpop.permute.xlu2 %994 }
 0x1f7   : >> { %1097 = vrot.lane.b32.xlu1 %v1046_v36, %s3717_s3  ;;  %v1049_v36 = vmul.f32 %v983_v25, %v934_v31  ;;  %v936_v25 = vsel %vm729_vm8, %v4399_v24, 0.0  ;;  %v938_v31 = vsel %vm729_vm8, %v4402_v1, 0.0 }
 0x1f8   : >> { %1095 = vrot.lane.b32.xlu0 %v1045_v38, %s3717_s3  ;;  %1099 = vrot.lane.b32.xlu2 %v1047_v63, %s3717_s3 }
 0x1fc   : >> { %v979_v35 = vpop.permute.xlu1 %978 }
 0x1fd   : >> { %v1048_v38 = vmul.f32 %v979_v35, %v933_v23  ;;  %v987_v39 = vpop.permute.xlu0 %986 }
 0x1fe   : >> { %v1050_v63 = vmul.f32 %v987_v39, %v935_v26  ;;  %v1052_v26 = vmul.f32 %v995_v34, %v937_v0  ;;  %v4423_v0 = vld [vmem:[%s4307_s30 + $0x78] sm:$0xff]  ;;  %v940_v34 = vsel %vm729_vm8, %v4417_v18, 0.0 }
 0x1ff   : >> { %1103 = vrot.lane.b32.xlu1 %v1049_v36, %s3717_s3 }
 0x200   : >> { %1101 = vrot.lane.b32.xlu0 %v1048_v38, %s3717_s3  ;;  %1105 = vrot.lane.b32.xlu2 %v1050_v63, %s3717_s3  ;;  %v1007_v38 = vpop.permute.xlu2 %1006  ;;  %v3718_v63 = vmov 1  }
 0x201   : >> { %3569 = vset.pattern.permute.xlu1 %v3718_v63  ;;  %3570 = vset.pattern.permute.xlu2 %v3718_v63 }
 0x202   : >> { %3571 = vset.pattern.permute.xlu0 %v3718_v63 }
 0x204   : >> { %v991_v23 = vpop.permute.xlu1 %990 }
 0x205   : >> { %v1051_v35 = vmul.f32 %v991_v23, %v936_v25  ;;  %v999_v36 = vpop.permute.xlu0 %998  ;;  %v939_v25 = vsel %vm729_vm8, %v4420_v8, 0.0 }
 0x206   : >> { %v1053_v39 = vmul.f32 %v999_v36, %v938_v31  ;;  %v941_v31 = vsel %vm729_vm8, %v4423_v0, 0.0 }
 0x207   : >> { %1109 = vrot.lane.b32.xlu1 %v1052_v26, %s3717_s3  ;;  %v1055_v26 = vmul.f32 %v1007_v38, %v940_v34  ;;  %v943_v38 = vsel %vm729_vm8, %v4438_v4, 0.0  ;;  %v942_v34 = vsel %vm729_vm8, %v4441_v14, 0.0 }
 0x208   : >> { %1107 = vrot.lane.b32.xlu0 %v1051_v35, %s3717_s3  ;;  %1111 = vrot.lane.b32.xlu2 %v1053_v39, %s3717_s3  ;;  %v1019_v63 = vpop.permute.xlu2 %1018 }
 0x20c   : >> { %v1003_v23 = vpop.permute.xlu1 %1002 }
 0x20d   : >> { %v1054_v35 = vmul.f32 %v1003_v23, %v939_v25  ;;  %v1011_v36 = vpop.permute.xlu0 %1010  ;;  %v944_v25 = vsel %vm729_vm8, %v4444_v11, 0.0  ;;  %v1058_v23 = vmul.f32 %v1019_v63, %v943_v38 }
 0x20e   : >> { %v1056_v39 = vmul.f32 %v1011_v36, %v941_v31 }
 0x20f   : >> { %1115 = vrot.lane.b32.xlu1 %v1055_v26, %s3717_s3 }
 0x210   : >> { %1113 = vrot.lane.b32.xlu0 %v1054_v35, %s3717_s3  ;;  %1117 = vrot.lane.b32.xlu2 %v1056_v39, %s3717_s3  ;;  %v4459_v39 = vld [vmem:[%s4307_s30 + $0xa0] sm:$0xff]  ;;  %v1031_v38 = vpop.permute.xlu2 %1030 }
 0x211   : >> { %v946_v63 = vsel %vm729_vm8, %v4459_v39, 0.0 }
 0x214   : >> { %v1015_v31 = vpop.permute.xlu1 %1014 }
 0x215   : >> { %v1057_v26 = vmul.f32 %v1015_v31, %v942_v34  ;;  %v1023_v35 = vpop.permute.xlu0 %1022  ;;  %v945_v34 = vsel %vm729_vm8, %v4462_v7, 0.0 }
 0x216   : >> { %v1059_v36 = vmul.f32 %v1023_v35, %v944_v25  ;;  %v947_v25 = vsel %vm729_vm8, %v4465_v5, 0.0 }
 0x217   : >> { %1121 = vrot.lane.b32.xlu1 %v1058_v23, %s3717_s3  ;;  %v1061_v23 = vmul.f32 %v1031_v38, %v946_v63 }
 0x218   : >> { %1119 = vrot.lane.b32.xlu0 %v1057_v26, %s3717_s3  ;;  %1123 = vrot.lane.b32.xlu2 %v1059_v36, %s3717_s3 }
 0x21c   : >> { %v1027_v31 = vpop.permute.xlu1 %1026 }
 0x21d   : >> { %v1060_v26 = vmul.f32 %v1027_v31, %v945_v34  ;;  %v1035_v35 = vpop.permute.xlu0 %1034 }
 0x21e   : >> { %v1062_v36 = vmul.f32 %v1035_v35, %v947_v25 }
 0x21f   : >> { %1127 = vrot.lane.b32.xlu1 %v1061_v23, %s3717_s3 }
 0x220   : >> { %1125 = vrot.lane.b32.xlu0 %v1060_v26, %s3717_s3  ;;  %1129 = vrot.lane.b32.xlu2 %v1062_v36, %s3717_s3 }
 0x224   : >> { %v1039_v9 = vpop.permute.xlu1 %1038 }
 0x225   : >> { %v1063_v28 = vmul.f32 %v1039_v9, %v948_v30 }
 0x227   : >> { %1180 = vperm.xlu1 %3569, %v4168_v42  }
 0x228   : >> { %1131 = vrot.lane.b32.xlu0 %v1063_v28, %s3717_s3  ;;  %1184 = vperm.xlu2 %3570, %v4180_v45  }
 0x229   : >> { %v4495_v9 = vpop.permute.xlu2 %1087 }
 0x22a   : >> { %6327 = vst [vmem:[#allocation27_spill] sm:$0xff] %v4495_v9 }
 0x22f   : >> { %1192 = vperm.xlu1 %3569, %v4177_v44  }
 0x230   : >> { %1188 = vperm.xlu0 %3571, %v4165_v41   ;;  %1196 = vperm.xlu2 %3570, %v4162_v40  }
 0x232   : >> { %v4502_v28 = vpop.permute.xlu2 %1093 }
 0x233   : >> { %6328 = vst [vmem:[#allocation28_spill] sm:$0xff] %v4502_v28 }
 0x237   : >> { %1200 = vperm.xlu1 %3569, %v4174_v43  }
 0x238   : >> { %1208 = vperm.xlu0 %3571, %v4189_v47   ;;  %1204 = vperm.xlu2 %3570, %v4192_v48  }
 0x23f   : >> { %1212 = vperm.xlu1 %3569, %v4186_v46  }
 0x240   : >> { %1220 = vperm.xlu0 %3571, %v4201_v50   ;;  %1216 = vperm.xlu2 %3570, %v4204_v51  }
 0x247   : >> { %1224 = vperm.xlu1 %3569, %v4198_v49  }
 0x248   : >> { %1232 = vperm.xlu0 %3571, %v4213_v53   ;;  %1228 = vperm.xlu2 %3570, %v4216_v54  }
 0x24f   : >> { %1236 = vperm.xlu1 %3569, %v4210_v52  }
 0x250   : >> { %1244 = vperm.xlu0 %3571, %v4225_v56   ;;  %1240 = vperm.xlu2 %3570, %v4228_v57  }
 0x252   : >> { %v4507_v30 = vpop.permute.xlu2 %1099 }
 0x253   : >> { %6329 = vst [vmem:[#allocation29_spill] sm:$0xff] %v4507_v30 }
 0x257   : >> { %1248 = vperm.xlu1 %3569, %v4222_v55  }
 0x258   : >> { %1256 = vperm.xlu0 %3571, %v4237_v59   ;;  %1252 = vperm.xlu2 %3570, %v4240_v60  }
 0x25a   : >> { %v4512_v63 = vpop.permute.xlu2 %1105 }
 0x25b   : >> { %6330 = vst [vmem:[#allocation30_spill] sm:$0xff] %v4512_v63 }
 0x25f   : >> { %1260 = vperm.xlu1 %3569, %v4234_v58  }
 0x260   : >> { %1268 = vperm.xlu0 %3571, %v4246_v61   ;;  %1264 = vperm.xlu2 %3570, %v4249_v62  }
 0x261   : >> { %v4517_v38 = vpop.permute.xlu1 %1091 }
 0x262   : >> { %6331 = vst [vmem:[#allocation31_spill] sm:$0xff] %v4517_v38  ;;  %v4519_v34 = vpop.permute.xlu2 %1111  ;;  %v4521_v25 = vpop.permute.xlu0 %1089 }
 0x263   : >> { %6332 = vst [vmem:[#allocation32_spill] sm:$0xff] %v4519_v34 }
 0x264   : >> { %6333 = vst [vmem:[#allocation33_spill] sm:$0xff] %v4521_v25 }
 0x269   : >> { %v4523_v31 = vpop.permute.xlu1 %1097 }
 0x26a   : >> { %6334 = vst [vmem:[#allocation34_spill] sm:$0xff] %v4523_v31  ;;  %v4525_v23 = vpop.permute.xlu2 %1117  ;;  %v4527_v26 = vpop.permute.xlu0 %1095 }
 0x26b   : >> { %6335 = vst [vmem:[#allocation35_spill] sm:$0xff] %v4525_v23 }
 0x26c   : >> { %6336 = vst [vmem:[#allocation36_spill] sm:$0xff] %v4527_v26 }
 0x271   : >> { %v4529_v35 = vpop.permute.xlu1 %1103 }
 0x272   : >> { %6337 = vst [vmem:[#allocation37_spill] sm:$0xff] %v4529_v35  ;;  %v4531_v36 = vpop.permute.xlu2 %1123  ;;  %v4533_v63 = vpop.permute.xlu0 %1101 }
 0x273   : >> { %6338 = vst [vmem:[#allocation38_spill] sm:$0xff] %v4531_v36 }
 0x274   : >> { %6339 = vst [vmem:[#allocation39_spill] sm:$0xff] %v4533_v63 }
 0x279   : >> { %v4535_v30 = vpop.permute.xlu1 %1109 }
 0x27a   : >> { %6340 = vst [vmem:[#allocation40_spill] sm:$0xff] %v4535_v30  ;;  %v4537_v28 = vpop.permute.xlu2 %1129  ;;  %v4539_v38 = vpop.permute.xlu0 %1107 }
 0x27b   : >> { %6341 = vst [vmem:[#allocation41_spill] sm:$0xff] %v4537_v28 }
 0x27c   : >> { %6342 = vst [vmem:[#allocation42_spill] sm:$0xff] %v4539_v38 }
 0x281   : >> { %v4541_v34 = vpop.permute.xlu1 %1115 }
 0x282   : >> { %6343 = vst [vmem:[#allocation43_spill] sm:$0xff] %v4541_v34  ;;  %v1185_v25 = vpop.permute.xlu2 %1184  ;;  %v4543_v31 = vpop.permute.xlu0 %1113 }
 0x283   : >> { %6344 = vst [vmem:[#allocation44_spill] sm:$0xff] %v4543_v31  ;;  %v1272_v23 = vmul.f32 %v1185_v25, %v4343_v33 }
 0x285   : >> { %1319 = vrot.lane.b32.xlu2 %v1272_v23, %s3719_s4 }
 0x289   : >> { %v4547_v35 = vpop.permute.xlu1 %1121 }
 0x28a   : >> { %6345 = vst [vmem:[#allocation45_spill] sm:$0xff] %v4547_v35  ;;  %v1197_v26 = vpop.permute.xlu2 %1196  ;;  %v4549_v63 = vpop.permute.xlu0 %1119 }
 0x28b   : >> { %6346 = vst [vmem:[#allocation46_spill] sm:$0xff] %v4549_v63  ;;  %v1275_v30 = vmul.f32 %v1197_v26, %v4354_v16 }
 0x28d   : >> { %1325 = vrot.lane.b32.xlu2 %v1275_v30, %s3719_s4 }
 0x291   : >> { %v4553_v9 = vpop.permute.xlu1 %1127 }
 0x292   : >> { %6347 = vst [vmem:[#allocation47_spill] sm:$0xff] %v4553_v9  ;;  %v4555_v34 = vpop.permute.xlu0 %1125  ;;  %v1205_v23 = vpop.permute.xlu2 %1204 }
 0x293   : >> { %6348 = vst [vmem:[#allocation48_spill] sm:$0xff] %v4555_v34  ;;  %v1277_v34 = vmul.f32 %v1205_v23, %v4360_v20 }
 0x299   : >> { %v1181_v28 = vpop.permute.xlu1 %1180 }
 0x29a   : >> { %v1271_v36 = vmul.f32 %v1181_v28, %v4310_v15  ;;  %v4558_v25 = vpop.permute.xlu0 %1131  ;;  %v1217_v30 = vpop.permute.xlu2 %1216 }
 0x29b   : >> { %6349 = vst [vmem:[#allocation49_spill] sm:$0xff] %v4558_v25 }
 0x29c   : >> { %1317 = vrot.lane.b32.xlu1 %v1271_v36, %s3719_s4 }
 0x2a1   : >> { %v1193_v35 = vpop.permute.xlu1 %1192 }
 0x2a2   : >> { %v1274_v29 = vmul.f32 %v1193_v35, %v4321_v21  ;;  %v1189_v27 = vpop.permute.xlu0 %1188 }
 0x2a3   : >> { %v1273_v26 = vmul.f32 %v1189_v27, %v4340_v32  ;;  %v1229_v27 = vpop.permute.xlu2 %1228 }
 0x2a4   : >> { %1323 = vrot.lane.b32.xlu1 %v1274_v29, %s3719_s4  ;;  %v1280_v29 = vmul.f32 %v1217_v30, %v4381_v10 }
 0x2a5   : >> { %1321 = vrot.lane.b32.xlu0 %v1273_v26, %s3719_s4 }
 0x2a9   : >> { %v1201_v9 = vpop.permute.xlu1 %1200 }
 0x2aa   : >> { %v1276_v28 = vmul.f32 %v1201_v9, %v4357_v19  ;;  %v1209_v25 = vpop.permute.xlu0 %1208 }
 0x2ab   : >> { %v1278_v36 = vmul.f32 %v1209_v25, %v4378_v3 }
 0x2ac   : >> { %1329 = vrot.lane.b32.xlu1 %v1277_v34, %s3719_s4  ;;  %v1283_v34 = vmul.f32 %v1229_v27, %v4402_v1 }
 0x2ad   : >> { %1327 = vrot.lane.b32.xlu0 %v1276_v28, %s3719_s4  ;;  %1331 = vrot.lane.b32.xlu2 %v1278_v36, %s3719_s4  ;;  %v1241_v36 = vpop.permute.xlu2 %1240 }
 0x2b1   : >> { %v1213_v35 = vpop.permute.xlu1 %1212 }
 0x2b2   : >> { %v1279_v26 = vmul.f32 %v1213_v35, %v4375_v6  ;;  %v1221_v63 = vpop.permute.xlu0 %1220  ;;  %v1286_v35 = vmul.f32 %v1241_v36, %v4423_v0 }
 0x2b3   : >> { %v1281_v23 = vmul.f32 %v1221_v63, %v4399_v24 }
 0x2b4   : >> { %1335 = vrot.lane.b32.xlu1 %v1280_v29, %s3719_s4 }
 0x2b5   : >> { %1333 = vrot.lane.b32.xlu0 %v1279_v26, %s3719_s4  ;;  %1337 = vrot.lane.b32.xlu2 %v1281_v23, %s3719_s4  ;;  %v1253_v23 = vpop.permute.xlu2 %1252 }
 0x2b9   : >> { %v1225_v9 = vpop.permute.xlu1 %1224 }
 0x2ba   : >> { %v1282_v25 = vmul.f32 %v1225_v9, %v4396_v2  ;;  %v1233_v28 = vpop.permute.xlu0 %1232 }
 0x2bb   : >> { %v1284_v30 = vmul.f32 %v1233_v28, %v4420_v8 }
 0x2bc   : >> { %1341 = vrot.lane.b32.xlu1 %v1283_v34, %s3719_s4  ;;  %v1289_v34 = vmul.f32 %v1253_v23, %v4444_v11  ;;  %v3721_v23 = vmov 2  }
 0x2bd   : >> { %1339 = vrot.lane.b32.xlu0 %v1282_v25, %s3719_s4  ;;  %1343 = vrot.lane.b32.xlu2 %v1284_v30, %s3719_s4  ;;  %v1265_v30 = vpop.permute.xlu2 %1264 }
 0x2be   : >> { %3572 = vset.pattern.permute.xlu2 %v3721_v23  ;;  %3574 = vset.pattern.permute.xlu1 %v3721_v23 }
 0x2bf   : >> { %3573 = vset.pattern.permute.xlu0 %v3721_v23 }
 0x2c1   : >> { %v1237_v63 = vpop.permute.xlu1 %1236 }
 0x2c2   : >> { %v1285_v29 = vmul.f32 %v1237_v63, %v4417_v18  ;;  %v1245_v26 = vpop.permute.xlu0 %1244 }
 0x2c3   : >> { %v1287_v27 = vmul.f32 %v1245_v26, %v4441_v14 }
 0x2c4   : >> { %1347 = vrot.lane.b32.xlu1 %v1286_v35, %s3719_s4  ;;  %v1292_v35 = vmul.f32 %v1265_v30, %v4465_v5 }
 0x2c5   : >> { %1345 = vrot.lane.b32.xlu0 %v1285_v29, %s3719_s4  ;;  %1349 = vrot.lane.b32.xlu2 %v1287_v27, %s3719_s4 }
 0x2c9   : >> { %v1249_v9 = vpop.permute.xlu1 %1248 }
 0x2ca   : >> { %v1288_v25 = vmul.f32 %v1249_v9, %v4438_v4  ;;  %v1257_v28 = vpop.permute.xlu0 %1256 }
 0x2cb   : >> { %v1290_v36 = vmul.f32 %v1257_v28, %v4462_v7 }
 0x2cc   : >> { %1353 = vrot.lane.b32.xlu1 %v1289_v34, %s3719_s4 }
 0x2cd   : >> { %1351 = vrot.lane.b32.xlu0 %v1288_v25, %s3719_s4  ;;  %1355 = vrot.lane.b32.xlu2 %v1290_v36, %s3719_s4 }
 0x2d1   : >> { %v1261_v63 = vpop.permute.xlu1 %1260 }
 0x2d2   : >> { %v1291_v29 = vmul.f32 %v1261_v63, %v4459_v39  ;;  %v1269_v26 = vpop.permute.xlu0 %1268 }
 0x2d3   : >> { %v1293_v27 = vmul.f32 %v1269_v26, %v4480_v12 }
 0x2d4   : >> { %1359 = vrot.lane.b32.xlu1 %v1292_v35, %s3719_s4 }
 0x2d5   : >> { %1357 = vrot.lane.b32.xlu0 %v1291_v29, %s3719_s4  ;;  %1361 = vrot.lane.b32.xlu2 %v1293_v27, %s3719_s4 }
 0x2dc   : >> { %1436 = vrot.lane.b32.xlu1 %v4343_v33, %s3720_s5 }
 0x2dd   : >> { %1434 = vrot.lane.b32.xlu0 %v4310_v15, %s3720_s5  ;;  %1438 = vrot.lane.b32.xlu2 %v4340_v32, %s3720_s5 }
 0x2df   : >> { %v4621_v9 = vpop.permute.xlu2 %1319 }
 0x2e0   : >> { %6350 = vst [vmem:[#allocation50_spill] sm:$0xff] %v4621_v9 }
 0x2e4   : >> { %1442 = vrot.lane.b32.xlu1 %v4354_v16, %s3720_s5 }
 0x2e5   : >> { %1440 = vrot.lane.b32.xlu0 %v4321_v21, %s3720_s5  ;;  %1444 = vrot.lane.b32.xlu2 %v4357_v19, %s3720_s5 }
 0x2e7   : >> { %v4633_v34 = vpop.permute.xlu2 %1325 }
 0x2e8   : >> { %6351 = vst [vmem:[#allocation51_spill] sm:$0xff] %v4633_v34 }
 0x2ec   : >> { %1448 = vrot.lane.b32.xlu1 %v4378_v3, %s3720_s5 }
 0x2ed   : >> { %1446 = vrot.lane.b32.xlu0 %v4360_v20, %s3720_s5  ;;  %1450 = vrot.lane.b32.xlu2 %v4375_v6, %s3720_s5 }
 0x2f4   : >> { %1454 = vrot.lane.b32.xlu1 %v4399_v24, %s3720_s5 }
 0x2f5   : >> { %1452 = vrot.lane.b32.xlu0 %v4381_v10, %s3720_s5  ;;  %1456 = vrot.lane.b32.xlu2 %v4396_v2, %s3720_s5 }
 0x2fc   : >> { %1460 = vrot.lane.b32.xlu1 %v4420_v8, %s3720_s5 }
 0x2fd   : >> { %1458 = vrot.lane.b32.xlu0 %v4402_v1, %s3720_s5  ;;  %1462 = vrot.lane.b32.xlu2 %v4417_v18, %s3720_s5 }
 0x304   : >> { %1466 = vrot.lane.b32.xlu1 %v4441_v14, %s3720_s5 }
 0x305   : >> { %1464 = vrot.lane.b32.xlu0 %v4423_v0, %s3720_s5  ;;  %1468 = vrot.lane.b32.xlu2 %v4438_v4, %s3720_s5 }
 0x307   : >> { %v4641_v25 = vpop.permute.xlu2 %1331 }
 0x308   : >> { %6352 = vst [vmem:[#allocation52_spill] sm:$0xff] %v4641_v25 }
 0x30c   : >> { %1472 = vrot.lane.b32.xlu1 %v4462_v7, %s3720_s5 }
 0x30d   : >> { %1470 = vrot.lane.b32.xlu0 %v4444_v11, %s3720_s5  ;;  %1474 = vrot.lane.b32.xlu2 %v4459_v39, %s3720_s5 }
 0x30e   : >> { %v4649_v28 = vpop.permute.xlu1 %1317 }
 0x30f   : >> { %6353 = vst [vmem:[#allocation53_spill] sm:$0xff] %v4649_v28  ;;  %v4651_v36 = vpop.permute.xlu2 %1337 }
 0x310   : >> { %6354 = vst [vmem:[#allocation54_spill] sm:$0xff] %v4651_v36 }
 0x314   : >> { %1478 = vrot.lane.b32.xlu1 %v4480_v12, %s3720_s5 }
 0x315   : >> { %1476 = vrot.lane.b32.xlu0 %v4465_v5, %s3720_s5  ;;  %1527 = vperm.xlu2 %3572, %v4168_v42  }
 0x316   : >> { %v4658_v30 = vpop.permute.xlu1 %1323 }
 0x317   : >> { %6355 = vst [vmem:[#allocation55_spill] sm:$0xff] %v4658_v30  ;;  %v4660_v63 = vpop.permute.xlu2 %1343  ;;  %v4662_v35 = vpop.permute.xlu0 %1321 }
 0x318   : >> { %6356 = vst [vmem:[#allocation56_spill] sm:$0xff] %v4660_v63 }
 0x319   : >> { %6357 = vst [vmem:[#allocation57_spill] sm:$0xff] %v4662_v35 }
 0x31c   : >> { %1535 = vperm.xlu1 %3574, %v4165_v41  }
 0x31d   : >> { %1531 = vperm.xlu0 %3573, %v4180_v45   ;;  %1539 = vperm.xlu2 %3572, %v4177_v44  }
 0x31e   : >> { %v4667_v29 = vpop.permute.xlu1 %1329 }
 0x31f   : >> { %6358 = vst [vmem:[#allocation58_spill] sm:$0xff] %v4667_v29  ;;  %v4669_v26 = vpop.permute.xlu2 %1349  ;;  %v4671_v27 = vpop.permute.xlu0 %1327 }
 0x320   : >> { %6359 = vst [vmem:[#allocation59_spill] sm:$0xff] %v4669_v26 }
 0x321   : >> { %6360 = vst [vmem:[#allocation60_spill] sm:$0xff] %v4671_v27 }
 0x324   : >> { %1543 = vperm.xlu1 %3574, %v4162_v40  }
 0x325   : >> { %1551 = vperm.xlu0 %3573, %v4192_v48   ;;  %1547 = vperm.xlu2 %3572, %v4174_v43  }
 0x326   : >> { %v4676_v42 = vpop.permute.xlu1 %1335 }
 0x327   : >> { %6361 = vst [vmem:[#allocation61_spill] sm:$0xff] %v4676_v42  ;;  %v4678_v23 = vpop.permute.xlu2 %1355  ;;  %v4680_v41 = vpop.permute.xlu0 %1333 }
 0x328   : >> { %6362 = vst [vmem:[#allocation62_spill] sm:$0xff] %v4678_v23 }
 0x329   : >> { %6363 = vst [vmem:[#allocation63_spill] sm:$0xff] %v4680_v41 }
 0x32c   : >> { %1555 = vperm.xlu1 %3574, %v4189_v47  }
 0x32d   : >> { %1563 = vperm.xlu0 %3573, %v4204_v51   ;;  %1559 = vperm.xlu2 %3572, %v4186_v46  }
 0x32e   : >> { %v4685_v44 = vpop.permute.xlu1 %1341 }
 0x32f   : >> { %6364 = vst [vmem:[#allocation64_spill] sm:$0xff] %v4685_v44  ;;  %v4687_v45 = vpop.permute.xlu2 %1361  ;;  %v4689_v40 = vpop.permute.xlu0 %1339 }
 0x330   : >> { %6365 = vst [vmem:[#allocation65_spill] sm:$0xff] %v4687_v45 }
 0x331   : >> { %6366 = vst [vmem:[#allocation66_spill] sm:$0xff] %v4689_v40 }
 0x334   : >> { %1567 = vperm.xlu1 %3574, %v4201_v50  }
 0x335   : >> { %1575 = vperm.xlu0 %3573, %v4216_v54   ;;  %1571 = vperm.xlu2 %3572, %v4198_v49  }
 0x336   : >> { %v4694_v43 = vpop.permute.xlu1 %1347 }
 0x337   : >> { %6367 = vst [vmem:[#allocation67_spill] sm:$0xff] %v4694_v43  ;;  %v1439_v48 = vpop.permute.xlu2 %1438  ;;  %v4696_v47 = vpop.permute.xlu0 %1345 }
 0x338   : >> { %6368 = vst [vmem:[#allocation68_spill] sm:$0xff] %v4696_v47 }
 0x33c   : >> { %1579 = vperm.xlu1 %3574, %v4213_v53  }
 0x33d   : >> { %1587 = vperm.xlu0 %3573, %v4228_v57   ;;  %1583 = vperm.xlu2 %3572, %v4210_v52  }
 0x33e   : >> { %v4701_v46 = vpop.permute.xlu1 %1353 }
 0x33f   : >> { %6369 = vst [vmem:[#allocation69_spill] sm:$0xff] %v4701_v46  ;;  %v1445_v51 = vpop.permute.xlu2 %1444  ;;  %v4703_v40 = vpop.permute.xlu0 %1351 }
 0x340   : >> { %6370 = vst [vmem:[#allocation70_spill] sm:$0xff] %v4703_v40  ;;  %v1508_v46 = vsel %vm730_vm9, %v1445_v51, 0.0 }
 0x344   : >> { %1591 = vperm.xlu1 %3574, %v4225_v56  }
 0x345   : >> { %1599 = vperm.xlu0 %3573, %v4240_v60   ;;  %1595 = vperm.xlu2 %3572, %v4222_v55  }
 0x346   : >> { %v4708_v49 = vpop.permute.xlu1 %1359 }
 0x347   : >> { %6371 = vst [vmem:[#allocation71_spill] sm:$0xff] %v4708_v49  ;;  %v1451_v50 = vpop.permute.xlu2 %1450  ;;  %v4710_v54 = vpop.permute.xlu0 %1357 }
 0x348   : >> { %6372 = vst [vmem:[#allocation72_spill] sm:$0xff] %v4710_v54 }
 0x34c   : >> { %1603 = vperm.xlu1 %3574, %v4237_v59  }
 0x34d   : >> { %1611 = vperm.xlu0 %3573, %v4249_v62   ;;  %1607 = vperm.xlu2 %3572, %v4234_v58  }
 0x34e   : >> { %v1437_v52 = vpop.permute.xlu1 %1436 }
 0x34f   : >> { %v1457_v53 = vpop.permute.xlu2 %1456  ;;  %v1435_v57 = vpop.permute.xlu0 %1434 }
 0x350   : >> { %v1503_v58 = vsel %vm730_vm9, %v1435_v57, 0.0 }
 0x354   : >> { %1615 = vperm.xlu1 %3574, %v4246_v61  }
 0x356   : >> { %v1443_v56 = vpop.permute.xlu1 %1442 }
 0x357   : >> { %v4716_v60 = vpop.permute.xlu2 %1462  ;;  %v1441_v55 = vpop.permute.xlu0 %1440  ;;  %v1507_v45 = vsel %vm730_vm9, %v1443_v56, 0.0 }
 0x358   : >> { %v1506_v35 = vsel %vm730_vm9, %v1441_v55, 0.0  ;;  %v1504_v55 = vsel %vm730_vm9, %v1437_v52, 0.0 }
 0x35e   : >> { %v1449_v47 = vpop.permute.xlu1 %1448 }
 0x35f   : >> { %v4718_v25 = vpop.permute.xlu2 %1468  ;;  %v1447_v41 = vpop.permute.xlu0 %1446  ;;  %v1510_v51 = vsel %vm730_vm9, %v1449_v47, 0.0 }
 0x366   : >> { %v1455_v43 = vpop.permute.xlu1 %1454 }
 0x367   : >> { %v4720_v34 = vpop.permute.xlu2 %1474  ;;  %v1453_v59 = vpop.permute.xlu0 %1452  ;;  %v1513_v47 = vsel %vm730_vm9, %v1455_v43, 0.0 }
 0x36e   : >> { %v1461_v62 = vpop.permute.xlu1 %1460 }
 0x36f   : >> { %v1528_v27 = vpop.permute.xlu2 %1527  ;;  %v1459_v44 = vpop.permute.xlu0 %1458  ;;  %v1516_v43 = vsel %vm730_vm9, %v1461_v62, 0.0 }
 0x370   : >> { %v1618_v9 = vmul.f32 %v1528_v27, %v1503_v58 }
 0x372   : >> { %1664 = vrot.lane.b32.xlu2 %v1618_v9, %s3717_s3  ;;  %v1505_v9 = vsel %vm730_vm9, %v1439_v48, 0.0  ;;  %v1509_v48 = vsel %vm730_vm9, %v1447_v41, 0.0  ;;  %v1512_v41 = vsel %vm730_vm9, %v1453_v59, 0.0  ;;  %v1515_v59 = vsel %vm730_vm9, %v1459_v44, 0.0 }
 0x376   : >> { %v4725_v61 = vpop.permute.xlu1 %1466 }
 0x377   : >> { %v1540_v42 = vpop.permute.xlu2 %1539  ;;  %v1465_v29 = vpop.permute.xlu0 %1464  ;;  %v1519_v62 = vsel %vm730_vm9, %v4725_v61, 0.0  ;;  %v1523_v61 = vsel %vm730_vm9, %v4720_v34, 0.0 }
 0x378   : >> { %v1621_v30 = vmul.f32 %v1540_v42, %v1506_v35  ;;  %v1518_v44 = vsel %vm730_vm9, %v1465_v29, 0.0 }
 0x37a   : >> { %1670 = vrot.lane.b32.xlu2 %v1621_v30, %s3717_s3 }
 0x37e   : >> { %v4730_v28 = vpop.permute.xlu1 %1472 }
 0x37f   : >> { %v4732_v54 = vpop.permute.xlu0 %1470  ;;  %v1548_v27 = vpop.permute.xlu2 %1547 }
 0x380   : >> { %v1623_v26 = vmul.f32 %v1548_v27, %v1508_v46 }
 0x386   : >> { %v4734_v57 = vpop.permute.xlu1 %1478 }
 0x387   : >> { %v4736_v49 = vpop.permute.xlu0 %1476  ;;  %v1560_v30 = vpop.permute.xlu2 %1559  ;;  %v1525_v34 = vsel %vm730_vm9, %v4734_v57, 0.0 }
 0x38e   : >> { %v1536_v58 = vpop.permute.xlu1 %1535 }
 0x38f   : >> { %v1620_v40 = vmul.f32 %v1536_v58, %v1505_v9  ;;  %v1532_v35 = vpop.permute.xlu0 %1531  ;;  %v1572_v56 = vpop.permute.xlu2 %1571 }
 0x390   : >> { %v1619_v42 = vmul.f32 %v1532_v35, %v1504_v55 }
 0x391   : >> { %1668 = vrot.lane.b32.xlu1 %v1620_v40, %s3717_s3  ;;  %v1511_v40 = vsel %vm730_vm9, %v1451_v50, 0.0 }
 0x392   : >> { %1666 = vrot.lane.b32.xlu0 %v1619_v42, %s3717_s3 }
 0x396   : >> { %v1544_v23 = vpop.permute.xlu1 %1543 }
 0x397   : >> { %v1622_v52 = vmul.f32 %v1544_v23, %v1507_v45  ;;  %v1552_v9 = vpop.permute.xlu0 %1551  ;;  %v1626_v23 = vmul.f32 %v1560_v30, %v1511_v40 }
 0x398   : >> { %v1624_v58 = vmul.f32 %v1552_v9, %v1509_v48  ;;  %v1584_v48 = vpop.permute.xlu2 %1583 }
 0x399   : >> { %1674 = vrot.lane.b32.xlu1 %v1623_v26, %s3717_s3  ;;  %v1514_v26 = vsel %vm730_vm9, %v1457_v53, 0.0  ;;  %v1517_v53 = vsel %vm730_vm9, %v4716_v60, 0.0  ;;  %v1520_v60 = vsel %vm730_vm9, %v4718_v25, 0.0 }
 0x39a   : >> { %1672 = vrot.lane.b32.xlu0 %v1622_v52, %s3717_s3  ;;  %1676 = vrot.lane.b32.xlu2 %v1624_v58, %s3717_s3  ;;  %v1629_v35 = vmul.f32 %v1572_v56, %v1514_v26  ;;  %v1632_v58 = vmul.f32 %v1584_v48, %v1517_v53  ;;  %v1522_v26 = vsel %vm730_vm9, %v4730_v28, 0.0  ;;  %v4928_v53 = vld [vmem:[%s4159_s29 + $0x58] sm:$0xff] }
 0x39b   : >> { %6391 = vst [vmem:[#allocation91_spill] sm:$0xff] %v4928_v53 }
 0x39e   : >> { %v1556_v55 = vpop.permute.xlu1 %1555 }
 0x39f   : >> { %v1625_v45 = vmul.f32 %v1556_v55, %v1510_v51  ;;  %v1564_v46 = vpop.permute.xlu0 %1563 }
 0x3a0   : >> { %v1627_v27 = vmul.f32 %v1564_v46, %v1512_v41  ;;  %v1596_v55 = vpop.permute.xlu2 %1595  ;;  %v1521_v41 = vsel %vm730_vm9, %v4732_v54, 0.0 }
 0x3a1   : >> { %1680 = vrot.lane.b32.xlu1 %v1626_v23, %s3717_s3  ;;  %v1635_v23 = vmul.f32 %v1596_v55, %v1520_v60 }
 0x3a2   : >> { %1678 = vrot.lane.b32.xlu0 %v1625_v45, %s3717_s3  ;;  %1682 = vrot.lane.b32.xlu2 %v1627_v27, %s3717_s3 }
 0x3a6   : >> { %v1568_v50 = vpop.permute.xlu1 %1567 }
 0x3a7   : >> { %v1628_v42 = vmul.f32 %v1568_v50, %v1513_v47  ;;  %v1576_v30 = vpop.permute.xlu0 %1575  ;;  %v1524_v47 = vsel %vm730_vm9, %v4736_v49, 0.0 }
 0x3a8   : >> { %v1630_v52 = vmul.f32 %v1576_v30, %v1515_v59  ;;  %v1608_v25 = vpop.permute.xlu2 %1607 }
 0x3a9   : >> { %1686 = vrot.lane.b32.xlu1 %v1629_v35, %s3717_s3  ;;  %v1638_v50 = vmul.f32 %v1608_v25, %v1523_v61  ;;  %v4972_v25 = vld [vmem:[%s4159_s29 + $0x90] sm:$0xff]  ;;  %v4976_v61 = vld [vmem:[%s4159_s29 + $0xa0] sm:$0xff] }
 0x3aa   : >> { %1684 = vrot.lane.b32.xlu0 %v1628_v42, %s3717_s3  ;;  %1688 = vrot.lane.b32.xlu2 %v1630_v52, %s3717_s3  ;;  %v4924_v52 = vld [vmem:[%s4159_s29 + $0x48] sm:$0xff]  ;;  %6405 = vst [vmem:[#allocation105_spill] sm:$0xff] %v4972_v25 }
 0x3ab   : >> { %6390 = vst [vmem:[#allocation90_spill] sm:$0xff] %v4924_v52 }
 0x3ac   : >> { %6406 = vst [vmem:[#allocation106_spill] sm:$0xff] %v4976_v61 }
 0x3ae   : >> { %v1580_v9 = vpop.permute.xlu1 %1579 }
 0x3af   : >> { %v1631_v40 = vmul.f32 %v1580_v9, %v1516_v43  ;;  %v1588_v51 = vpop.permute.xlu0 %1587  ;;  %v4932_v43 = vld [vmem:[%s4159_s29 + $0x50] sm:$0xff] }
 0x3b0   : >> { %v1633_v56 = vmul.f32 %v1588_v51, %v1518_v44  ;;  %6392 = vst [vmem:[#allocation92_spill] sm:$0xff] %v4932_v43  ;;  %v4944_v51 = vld [vmem:[%s4159_s29 + $0x70] sm:$0xff] }
 0x3b1   : >> { %1692 = vrot.lane.b32.xlu1 %v1632_v58, %s3717_s3  ;;  %6396 = vst [vmem:[#allocation96_spill] sm:$0xff] %v4944_v51 }
 0x3b2   : >> { %1690 = vrot.lane.b32.xlu0 %v1631_v40, %s3717_s3  ;;  %1694 = vrot.lane.b32.xlu2 %v1633_v56, %s3717_s3  ;;  %v4940_v40 = vld [vmem:[%s4159_s29 + $0x60] sm:$0xff]  ;;  %v4948_v56 = vld [vmem:[%s4159_s29 + $0x68] sm:$0xff] }
 0x3b3   : >> { %6395 = vst [vmem:[#allocation95_spill] sm:$0xff] %v4940_v40 }
 0x3b4   : >> { %6397 = vst [vmem:[#allocation97_spill] sm:$0xff] %v4948_v56 }
 0x3b6   : >> { %v1592_v29 = vpop.permute.xlu1 %1591 }
 0x3b7   : >> { %v1634_v45 = vmul.f32 %v1592_v29, %v1519_v62  ;;  %v1600_v46 = vpop.permute.xlu0 %1599  ;;  %v4956_v29 = vld [vmem:[%s4159_s29 + $0x78] sm:$0xff] }
 0x3b8   : >> { %v1636_v27 = vmul.f32 %v1600_v46, %v1521_v41  ;;  %6400 = vst [vmem:[#allocation100_spill] sm:$0xff] %v4956_v29  ;;  %v4960_v41 = vld [vmem:[%s4159_s29 + $0x88] sm:$0xff] }
 0x3b9   : >> { %1698 = vrot.lane.b32.xlu1 %v1635_v23, %s3717_s3  ;;  %6401 = vst [vmem:[#allocation101_spill] sm:$0xff] %v4960_v41  ;;  %v4964_v23 = vld [vmem:[%s4159_s29 + $0x80] sm:$0xff] }
 0x3ba   : >> { %1696 = vrot.lane.b32.xlu0 %v1634_v45, %s3717_s3  ;;  %1700 = vrot.lane.b32.xlu2 %v1636_v27, %s3717_s3  ;;  %6402 = vst [vmem:[#allocation102_spill] sm:$0xff] %v4964_v23 }
 0x3be   : >> { %v1604_v54 = vpop.permute.xlu1 %1603 }
 0x3bf   : >> { %v1637_v59 = vmul.f32 %v1604_v54, %v1522_v26  ;;  %v1612_v35 = vpop.permute.xlu0 %1611  ;;  %v4980_v26 = vld [vmem:[%s4159_s29 + $0x98] sm:$0xff] }
 0x3c0   : >> { %v1639_v42 = vmul.f32 %v1612_v35, %v1524_v47  ;;  %6407 = vst [vmem:[#allocation107_spill] sm:$0xff] %v4980_v26  ;;  %v4990_v35 = vld [vmem:[%s4159_s29 + $0xb0] sm:$0xff] }
 0x3c1   : >> { %1704 = vrot.lane.b32.xlu1 %v1638_v50, %s3717_s3  ;;  %6410 = vst [vmem:[#allocation110_spill] sm:$0xff] %v4990_v35 }
 0x3c2   : >> { %1702 = vrot.lane.b32.xlu0 %v1637_v59, %s3717_s3  ;;  %1706 = vrot.lane.b32.xlu2 %v1639_v42, %s3717_s3  ;;  %v4986_v59 = vld [vmem:[%s4159_s29 + $0xa8] sm:$0xff] }
 0x3c3   : >> { %6409 = vst [vmem:[#allocation109_spill] sm:$0xff] %v4986_v59 }
 0x3c6   : >> { %v1616_v28 = vpop.permute.xlu1 %1615 }
 0x3c7   : >> { %v1640_v30 = vmul.f32 %v1616_v28, %v1525_v34 }
 0x3c9   : >> { %1756 = vrot.lane.b32.xlu1 %v4310_v15, %s3722_s6 }
 0x3ca   : >> { %1708 = vrot.lane.b32.xlu0 %v1640_v30, %s3717_s3  ;;  %1758 = vrot.lane.b32.xlu2 %v4343_v33, %s3722_s6 }
 0x3cc   : >> { %v4827_v15 = vpop.permute.xlu2 %1664 }
 0x3cd   : >> { %6373 = vst [vmem:[#allocation73_spill] sm:$0xff] %v4827_v15 }
 0x3d1   : >> { %1762 = vrot.lane.b32.xlu1 %v4321_v21, %s3722_s6  ;;  %v3723_v21 = vmov 3  }
 0x3d2   : >> { %1760 = vrot.lane.b32.xlu0 %v4340_v32, %s3722_s6  ;;  %1764 = vrot.lane.b32.xlu2 %v4354_v16, %s3722_s6  ;;  %v4896_v32 = vld [vmem:[%s4159_s29 + $0x20] sm:$0xff] }
 0x3d3   : >> { %3576 = vset.pattern.permute.xlu1 %v3723_v21  ;;  %3575 = vset.pattern.permute.xlu0 %v3723_v21 }
 0x3d4   : >> { %3577 = vset.pattern.permute.xlu2 %v3723_v21 }
 0x3d9   : >> { %1768 = vrot.lane.b32.xlu1 %v4360_v20, %s3722_s6  ;;  %v4906_v20 = vld [vmem:[%s4159_s29 + $0x30] sm:$0xff] }
 0x3da   : >> { %1766 = vrot.lane.b32.xlu0 %v4357_v19, %s3722_s6  ;;  %1770 = vrot.lane.b32.xlu2 %v4378_v3, %s3722_s6  ;;  %v4839_v3 = vpop.permute.xlu2 %1670 }
 0x3db   : >> { %6374 = vst [vmem:[#allocation74_spill] sm:$0xff] %v4839_v3 }
 0x3e1   : >> { %1774 = vrot.lane.b32.xlu1 %v4381_v10, %s3722_s6  ;;  %v4874_v10 = vld [vmem:[%s4159_s29] sm:$0xff] }
 0x3e2   : >> { %1772 = vrot.lane.b32.xlu0 %v4375_v6, %s3722_s6  ;;  %1776 = vrot.lane.b32.xlu2 %v4399_v24, %s3722_s6  ;;  %v4892_v24 = vld [vmem:[%s4159_s29 + $0x28] sm:$0xff] }
 0x3e9   : >> { %1780 = vrot.lane.b32.xlu1 %v4402_v1, %s3722_s6 }
 0x3ea   : >> { %1778 = vrot.lane.b32.xlu0 %v4396_v2, %s3722_s6  ;;  %1782 = vrot.lane.b32.xlu2 %v4420_v8, %s3722_s6 }
 0x3f1   : >> { %1786 = vrot.lane.b32.xlu1 %v4423_v0, %s3722_s6  ;;  %v4910_v0 = vld [vmem:[%s4159_s29 + $0x40] sm:$0xff] }
 0x3f2   : >> { %1784 = vrot.lane.b32.xlu0 %v4417_v18, %s3722_s6  ;;  %1788 = vrot.lane.b32.xlu2 %v4441_v14, %s3722_s6  ;;  %v4888_v18 = vld [vmem:[%s4159_s29 + $0x18] sm:$0xff]  ;;  %6386 = vst [vmem:[#allocation86_spill] sm:$0xff] %v4910_v0 }
 0x3f4   : >> { %v4847_v1 = vpop.permute.xlu2 %1676 }
 0x3f5   : >> { %6375 = vst [vmem:[#allocation75_spill] sm:$0xff] %v4847_v1 }
 0x3f9   : >> { %1792 = vrot.lane.b32.xlu1 %v4444_v11, %s3722_s6 }
 0x3fa   : >> { %1790 = vrot.lane.b32.xlu0 %v4438_v4, %s3722_s6  ;;  %1794 = vrot.lane.b32.xlu2 %v4462_v7, %s3722_s6  ;;  %v4870_v7 = vld [vmem:[%s4159_s29 + $0x8] sm:$0xff] }
 0x3fc   : >> { %v4855_v2 = vpop.permute.xlu2 %1682 }
 0x3fd   : >> { %6376 = vst [vmem:[#allocation76_spill] sm:$0xff] %v4855_v2 }
 0x401   : >> { %1798 = vrot.lane.b32.xlu1 %v4465_v5, %s3722_s6  ;;  %v4878_v5 = vld [vmem:[%s4159_s29 + $0x10] sm:$0xff] }
 0x402   : >> { %1796 = vrot.lane.b32.xlu0 %v4459_v39, %s3722_s6  ;;  %1800 = vrot.lane.b32.xlu2 %v4480_v12, %s3722_s6  ;;  %v4914_v39 = vld [vmem:[%s4159_s29 + $0x38] sm:$0xff] }
 0x403   : >> { %v4863_v6 = vpop.permute.xlu1 %1668 }
 0x404   : >> { %6377 = vst [vmem:[#allocation77_spill] sm:$0xff] %v4863_v6  ;;  %v4865_v4 = vpop.permute.xlu2 %1688  ;;  %v4867_v8 = vpop.permute.xlu0 %1666 }
 0x405   : >> { %6378 = vst [vmem:[#allocation78_spill] sm:$0xff] %v4865_v4 }
 0x406   : >> { %6379 = vst [vmem:[#allocation79_spill] sm:$0xff] %v4867_v8 }
 0x409   : >> { %1853 = vperm.xlu1 %3576, %v4870_v7  }
 0x40a   : >> { %1849 = vperm.xlu0 %3575, %v4874_v10   ;;  %1857 = vperm.xlu2 %3577, %v4878_v5  }
 0x40b   : >> { %v4881_v11 = vpop.permute.xlu1 %1674 }
 0x40c   : >> { %6380 = vst [vmem:[#allocation80_spill] sm:$0xff] %v4881_v11  ;;  %v4883_v12 = vpop.permute.xlu2 %1694  ;;  %v4885_v14 = vpop.permute.xlu0 %1672 }
 0x40d   : >> { %6381 = vst [vmem:[#allocation81_spill] sm:$0xff] %v4883_v12 }
 0x40e   : >> { %6382 = vst [vmem:[#allocation82_spill] sm:$0xff] %v4885_v14 }
 0x411   : >> { %1861 = vperm.xlu1 %3576, %v4888_v18  }
 0x412   : >> { %1869 = vperm.xlu0 %3575, %v4892_v24   ;;  %1865 = vperm.xlu2 %3577, %v4896_v32  }
 0x413   : >> { %v4899_v33 = vpop.permute.xlu1 %1680 }
 0x414   : >> { %6383 = vst [vmem:[#allocation83_spill] sm:$0xff] %v4899_v33  ;;  %v4901_v16 = vpop.permute.xlu2 %1700  ;;  %v4903_v19 = vpop.permute.xlu0 %1678 }
 0x415   : >> { %6384 = vst [vmem:[#allocation84_spill] sm:$0xff] %v4901_v16 }
 0x416   : >> { %6385 = vst [vmem:[#allocation85_spill] sm:$0xff] %v4903_v19 }
 0x419   : >> { %1873 = vperm.xlu1 %3576, %v4906_v20  }
 0x41a   : >> { %1881 = vperm.xlu0 %3575, %v4910_v0   ;;  %1877 = vperm.xlu2 %3577, %v4914_v39  }
 0x41b   : >> { %v4917_v49 = vpop.permute.xlu1 %1686 }
 0x41c   : >> { %6387 = vst [vmem:[#allocation87_spill] sm:$0xff] %v4917_v49  ;;  %v4919_v57 = vpop.permute.xlu2 %1706  ;;  %v4921_v48 = vpop.permute.xlu0 %1684 }
 0x41d   : >> { %6388 = vst [vmem:[#allocation88_spill] sm:$0xff] %v4919_v57 }
 0x41e   : >> { %6389 = vst [vmem:[#allocation89_spill] sm:$0xff] %v4921_v48 }
 0x421   : >> { %1885 = vperm.xlu1 %3576, %v4924_v52  }
 0x422   : >> { %1893 = vperm.xlu0 %3575, %v4928_v53   ;;  %1889 = vperm.xlu2 %3577, %v4932_v43  }
 0x423   : >> { %v4935_v9 = vpop.permute.xlu1 %1692 }
 0x424   : >> { %6393 = vst [vmem:[#allocation93_spill] sm:$0xff] %v4935_v9  ;;  %v1759_v44 = vpop.permute.xlu2 %1758  ;;  %v4937_v58 = vpop.permute.xlu0 %1690 }
 0x425   : >> { %6394 = vst [vmem:[#allocation94_spill] sm:$0xff] %v4937_v58  ;;  %v1826_v16 = vsel %vm729_vm8, %v1759_v44, 0.0 }
 0x429   : >> { %1897 = vperm.xlu1 %3576, %v4940_v40  }
 0x42a   : >> { %1905 = vperm.xlu0 %3575, %v4944_v51   ;;  %1901 = vperm.xlu2 %3577, %v4948_v56  }
 0x42b   : >> { %v4951_v55 = vpop.permute.xlu1 %1698 }
 0x42c   : >> { %6398 = vst [vmem:[#allocation98_spill] sm:$0xff] %v4951_v55  ;;  %v1765_v60 = vpop.permute.xlu2 %1764  ;;  %v4953_v62 = vpop.permute.xlu0 %1696 }
 0x42d   : >> { %6399 = vst [vmem:[#allocation99_spill] sm:$0xff] %v4953_v62  ;;  %v1829_v62 = vsel %vm729_vm8, %v1765_v60, 0.0 }
 0x431   : >> { %1909 = vperm.xlu1 %3576, %v4956_v29  }
 0x432   : >> { %1917 = vperm.xlu0 %3575, %v4960_v41   ;;  %1913 = vperm.xlu2 %3577, %v4964_v23  }
 0x433   : >> { %v4967_v45 = vpop.permute.xlu1 %1704 }
 0x434   : >> { %6403 = vst [vmem:[#allocation103_spill] sm:$0xff] %v4967_v45  ;;  %v1771_v46 = vpop.permute.xlu2 %1770  ;;  %v4969_v27 = vpop.permute.xlu0 %1702 }
 0x435   : >> { %6404 = vst [vmem:[#allocation104_spill] sm:$0xff] %v4969_v27  ;;  %v1832_v60 = vsel %vm729_vm8, %v1771_v46, 0.0 }
 0x439   : >> { %1921 = vperm.xlu1 %3576, %v4972_v25  }
 0x43a   : >> { %1929 = vperm.xlu0 %3575, %v4976_v61   ;;  %1925 = vperm.xlu2 %3577, %v4980_v26  }
 0x43b   : >> { %v1757_v54 = vpop.permute.xlu1 %1756 }
 0x43c   : >> { %v1777_v47 = vpop.permute.xlu2 %1776  ;;  %v4983_v50 = vpop.permute.xlu0 %1708 }
 0x43d   : >> { %6408 = vst [vmem:[#allocation108_spill] sm:$0xff] %v4983_v50 }
 0x441   : >> { %1933 = vperm.xlu1 %3576, %v4986_v59  }
 0x442   : >> { %1937 = vperm.xlu2 %3577, %v4990_v35  }
 0x443   : >> { %v1763_v42 = vpop.permute.xlu1 %1762 }
 0x444   : >> { %v4993_v34 = vpop.permute.xlu2 %1782  ;;  %v1761_v28 = vpop.permute.xlu0 %1760  ;;  %v1828_v22 = vsel %vm729_vm8, %v1763_v42, 0.0 }
 0x445   : >> { %v1827_v4 = vsel %vm729_vm8, %v1761_v28, 0.0  ;;  %v1825_v28 = vsel %vm729_vm8, %v1757_v54, 0.0 }
 0x44b   : >> { %v1769_v30 = vpop.permute.xlu1 %1768 }
 0x44c   : >> { %v4995_v21 = vpop.permute.xlu2 %1788  ;;  %v1767_v9 = vpop.permute.xlu0 %1766  ;;  %v1831_v42 = vsel %vm729_vm8, %v1769_v30, 0.0 }
 0x44d   : >> { %v1830_v44 = vsel %vm729_vm8, %v1767_v9, 0.0 }
 0x453   : >> { %v1775_v49 = vpop.permute.xlu1 %1774 }
 0x454   : >> { %v4997_v19 = vpop.permute.xlu2 %1794  ;;  %v1773_v33 = vpop.permute.xlu0 %1772  ;;  %v1834_v46 = vsel %vm729_vm8, %v1775_v49, 0.0 }
 0x455   : >> { %v1833_v9 = vsel %vm729_vm8, %v1773_v33, 0.0 }
 0x45b   : >> { %v1781_v14 = vpop.permute.xlu1 %1780 }
 0x45c   : >> { %v4999_v12 = vpop.permute.xlu2 %1800  ;;  %v1779_v11 = vpop.permute.xlu0 %1778  ;;  %v1837_v49 = vsel %vm729_vm8, %v1781_v14, 0.0 }
 0x45d   : >> { %v1836_v33 = vsel %vm729_vm8, %v1779_v11, 0.0 }
 0x463   : >> { %v5001_v8 = vpop.permute.xlu1 %1786 }
 0x464   : >> { %v1858_v6 = vpop.permute.xlu2 %1857  ;;  %v1785_v2 = vpop.permute.xlu0 %1784  ;;  %v1840_v14 = vsel %vm729_vm8, %v5001_v8, 0.0  ;;  %v1844_v8 = vsel %vm729_vm8, %v4997_v19, 0.0  ;;  %v1847_v19 = vsel %vm729_vm8, %v4999_v12, 0.0  ;;  %v5095_v12 = vld [vmem:[%s4307_s30 + $0x10] sm:$0xff] }
 0x465   : >> { %v1942_v1 = vmul.f32 %v1858_v6, %v1827_v4  ;;  %v1839_v11 = vsel %vm729_vm8, %v1785_v2, 0.0 }
 0x467   : >> { %1990 = vrot.lane.b32.xlu2 %v1942_v1, %s3717_s3 }
 0x46b   : >> { %v5006_v3 = vpop.permute.xlu1 %1792 }
 0x46c   : >> { %v5008_v15 = vpop.permute.xlu0 %1790  ;;  %v1866_v55 = vpop.permute.xlu2 %1865 }
 0x46d   : >> { %v1944_v63 = vmul.f32 %v1866_v55, %v1829_v62 }
 0x473   : >> { %v5010_v45 = vpop.permute.xlu1 %1798 }
 0x474   : >> { %v5012_v57 = vpop.permute.xlu0 %1796  ;;  %v1878_v1 = vpop.permute.xlu2 %1877 }
 0x47b   : >> { %v1854_v50 = vpop.permute.xlu1 %1853 }
 0x47c   : >> { %v1941_v27 = vmul.f32 %v1854_v50, %v1826_v16  ;;  %v1850_v6 = vpop.permute.xlu0 %1849 }
 0x47d   : >> { %v1940_v4 = vmul.f32 %v1850_v6, %v1825_v28 }
 0x47e   : >> { %1988 = vrot.lane.b32.xlu1 %v1941_v27, %s3717_s3  ;;  %v1890_v27 = vpop.permute.xlu2 %1889 }
 0x47f   : >> { %1986 = vrot.lane.b32.xlu0 %v1940_v4, %s3717_s3 }
 0x483   : >> { %v1862_v58 = vpop.permute.xlu1 %1861 }
 0x484   : >> { %v1943_v54 = vmul.f32 %v1862_v58, %v1828_v22  ;;  %v1870_v16 = vpop.permute.xlu0 %1869  ;;  %v1947_v22 = vmul.f32 %v1878_v1, %v1832_v60 }
 0x485   : >> { %v1945_v50 = vmul.f32 %v1870_v16, %v1830_v44 }
 0x486   : >> { %1994 = vrot.lane.b32.xlu1 %v1944_v63, %s3717_s3  ;;  %v1835_v63 = vsel %vm729_vm8, %v1777_v47, 0.0  ;;  %v1902_v30 = vpop.permute.xlu2 %1901  ;;  %v1838_v47 = vsel %vm729_vm8, %v4993_v34, 0.0  ;;  %v1841_v34 = vsel %vm729_vm8, %v4995_v21, 0.0  ;;  %v1843_v21 = vsel %vm729_vm8, %v5006_v3, 0.0 }
 0x487   : >> { %1992 = vrot.lane.b32.xlu0 %v1943_v54, %s3717_s3  ;;  %1996 = vrot.lane.b32.xlu2 %v1945_v50, %s3717_s3  ;;  %v1950_v4 = vmul.f32 %v1890_v27, %v1835_v63  ;;  %v1953_v50 = vmul.f32 %v1902_v30, %v1838_v47  ;;  %v5090_v47 = vld [vmem:[%s4307_s30] sm:$0xff] }
 0x48b   : >> { %v1874_v28 = vpop.permute.xlu1 %1873 }
 0x48c   : >> { %v1946_v58 = vmul.f32 %v1874_v28, %v1831_v42  ;;  %v1882_v55 = vpop.permute.xlu0 %1881 }
 0x48d   : >> { %v1948_v62 = vmul.f32 %v1882_v55, %v1833_v9  ;;  %v1842_v9 = vsel %vm729_vm8, %v5008_v15, 0.0 }
 0x48e   : >> { %2000 = vrot.lane.b32.xlu1 %v1947_v22, %s3717_s3  ;;  %v1914_v42 = vpop.permute.xlu2 %1913 }
 0x48f   : >> { %1998 = vrot.lane.b32.xlu0 %v1946_v58, %s3717_s3  ;;  %2002 = vrot.lane.b32.xlu2 %v1948_v62, %s3717_s3  ;;  %v1956_v22 = vmul.f32 %v1914_v42, %v1841_v34  ;;  %v5135_v42 = vld [vmem:[%s4307_s30 + $0x48] sm:$0xff]  ;;  %v5140_v34 = vld [vmem:[%s4307_s30 + $0x58] sm:$0xff] }
 0x493   : >> { %v1886_v6 = vpop.permute.xlu1 %1885 }
 0x494   : >> { %v1949_v1 = vmul.f32 %v1886_v6, %v1834_v46  ;;  %v1894_v44 = vpop.permute.xlu0 %1893  ;;  %v1845_v46 = vsel %vm729_vm8, %v5012_v57, 0.0  ;;  %v1846_v57 = vsel %vm729_vm8, %v5010_v45, 0.0  ;;  %v5100_v45 = vld [vmem:[%s4307_s30 + $0x8] sm:$0xff] }
 0x495   : >> { %v1951_v54 = vmul.f32 %v1894_v44, %v1836_v33 }
 0x496   : >> { %2006 = vrot.lane.b32.xlu1 %v1950_v4, %s3717_s3  ;;  %v1926_v63 = vpop.permute.xlu2 %1925 }
 0x497   : >> { %2004 = vrot.lane.b32.xlu0 %v1949_v1, %s3717_s3  ;;  %2008 = vrot.lane.b32.xlu2 %v1951_v54, %s3717_s3  ;;  %v1959_v30 = vmul.f32 %v1926_v63, %v1844_v8  ;;  %v5174_v63 = vld [vmem:[%s4307_s30 + $0x88] sm:$0xff]  ;;  %v5179_v8 = vld [vmem:[%s4307_s30 + $0x80] sm:$0xff] }
 0x49b   : >> { %v1898_v16 = vpop.permute.xlu1 %1897 }
 0x49c   : >> { %v1952_v27 = vmul.f32 %v1898_v16, %v1837_v49  ;;  %v1906_v60 = vpop.permute.xlu0 %1905  ;;  %v5105_v49 = vld [vmem:[%s4307_s30 + $0x18] sm:$0xff]  ;;  %v5110_v16 = vld [vmem:[%s4307_s30 + $0x28] sm:$0xff] }
 0x49d   : >> { %v1954_v28 = vmul.f32 %v1906_v60, %v1839_v11  ;;  %v5115_v11 = vld [vmem:[%s4307_s30 + $0x20] sm:$0xff]  ;;  %v5130_v60 = vld [vmem:[%s4307_s30 + $0x38] sm:$0xff] }
 0x49e   : >> { %2012 = vrot.lane.b32.xlu1 %v1953_v50, %s3717_s3  ;;  %v1938_v3 = vpop.permute.xlu2 %1937  ;;  %v5120_v50 = vld [vmem:[%s4307_s30 + $0x30] sm:$0xff] }
 0x49f   : >> { %2010 = vrot.lane.b32.xlu0 %v1952_v27, %s3717_s3  ;;  %2014 = vrot.lane.b32.xlu2 %v1954_v28, %s3717_s3  ;;  %v1962_v44 = vmul.f32 %v1938_v3, %v1847_v19  ;;  %v5125_v27 = vld [vmem:[%s4307_s30 + $0x40] sm:$0xff]  ;;  %v3725_v28 = vmov 5   ;;  %v5213_v19 = vld [vmem:[%s4307_s30 + $0xb0] sm:$0xff] }
 0x4a0   : >> { %3578 = vset.pattern.permute.xlu1 %v3725_v28  ;;  %3579 = vset.pattern.permute.xlu2 %v3725_v28 }
 0x4a1   : >> { %3580 = vset.pattern.permute.xlu0 %v3725_v28 }
 0x4a3   : >> { %v1910_v2 = vpop.permute.xlu1 %1909 }
 0x4a4   : >> { %v1955_v58 = vmul.f32 %v1910_v2, %v1840_v14  ;;  %v1918_v55 = vpop.permute.xlu0 %1917  ;;  %v5145_v14 = vld [vmem:[%s4307_s30 + $0x50] sm:$0xff]  ;;  %v5150_v2 = vld [vmem:[%s4307_s30 + $0x60] sm:$0xff] }
 0x4a5   : >> { %v1957_v62 = vmul.f32 %v1918_v55, %v1842_v9  ;;  %v5167_v55 = vld [vmem:[%s4307_s30 + $0x78] sm:$0xff] }
 0x4a6   : >> { %2018 = vrot.lane.b32.xlu1 %v1956_v22, %s3717_s3  ;;  %v5157_v22 = vld [vmem:[%s4307_s30 + $0x70] sm:$0xff] }
 0x4a7   : >> { %2016 = vrot.lane.b32.xlu0 %v1955_v58, %s3717_s3  ;;  %2020 = vrot.lane.b32.xlu2 %v1957_v62, %s3717_s3  ;;  %v5162_v58 = vld [vmem:[%s4307_s30 + $0x68] sm:$0xff] }
 0x4ab   : >> { %v1922_v15 = vpop.permute.xlu1 %1921 }
 0x4ac   : >> { %v1958_v6 = vmul.f32 %v1922_v15, %v1843_v21  ;;  %v1930_v33 = vpop.permute.xlu0 %1929  ;;  %v5184_v21 = vld [vmem:[%s4307_s30 + $0x90] sm:$0xff] }
 0x4ad   : >> { %v1960_v4 = vmul.f32 %v1930_v33, %v1845_v46  ;;  %v5191_v46 = vld [vmem:[%s4307_s30 + $0xa0] sm:$0xff] }
 0x4ae   : >> { %2024 = vrot.lane.b32.xlu1 %v1959_v30, %s3717_s3  ;;  %v5196_v30 = vld [vmem:[%s4307_s30 + $0x98] sm:$0xff] }
 0x4af   : >> { %2022 = vrot.lane.b32.xlu0 %v1958_v6, %s3717_s3  ;;  %2026 = vrot.lane.b32.xlu2 %v1960_v4, %s3717_s3  ;;  %v5201_v6 = vld [vmem:[%s4307_s30 + $0xa8] sm:$0xff] }
 0x4b3   : >> { %v1934_v1 = vpop.permute.xlu1 %1933 }
 0x4b4   : >> { %v1961_v54 = vmul.f32 %v1934_v1, %v1846_v57 }
 0x4b6   : >> { %2030 = vrot.lane.b32.xlu1 %v1962_v44, %s3717_s3 }
 0x4b7   : >> { %2028 = vrot.lane.b32.xlu0 %v1961_v54, %s3717_s3  ;;  %2078 = vrot.lane.b32.xlu2 %v5090_v47, %s3724_s7 }
 0x4be   : >> { %2082 = vrot.lane.b32.xlu1 %v5095_v12, %s3724_s7 }
 0x4bf   : >> { %2080 = vrot.lane.b32.xlu0 %v5100_v45, %s3724_s7  ;;  %2084 = vrot.lane.b32.xlu2 %v5105_v49, %s3724_s7 }
 0x4c1   : >> { %v5154_v9 = vpop.permute.xlu2 %1990 }
 0x4c2   : >> { %6411 = vst [vmem:[#allocation111_spill] sm:$0xff] %v5154_v9 }
 0x4c6   : >> { %2088 = vrot.lane.b32.xlu1 %v5110_v16, %s3724_s7 }
 0x4c7   : >> { %2086 = vrot.lane.b32.xlu0 %v5115_v11, %s3724_s7  ;;  %2090 = vrot.lane.b32.xlu2 %v5120_v50, %s3724_s7 }
 0x4ce   : >> { %2094 = vrot.lane.b32.xlu1 %v5125_v27, %s3724_s7 }
 0x4cf   : >> { %2092 = vrot.lane.b32.xlu0 %v5130_v60, %s3724_s7  ;;  %2096 = vrot.lane.b32.xlu2 %v5135_v42, %s3724_s7 }
 0x4d6   : >> { %2100 = vrot.lane.b32.xlu1 %v5140_v34, %s3724_s7 }
 0x4d7   : >> { %2098 = vrot.lane.b32.xlu0 %v5145_v14, %s3724_s7  ;;  %2102 = vrot.lane.b32.xlu2 %v5150_v2, %s3724_s7 }
 0x4de   : >> { %2106 = vrot.lane.b32.xlu1 %v5157_v22, %s3724_s7 }
 0x4df   : >> { %2104 = vrot.lane.b32.xlu0 %v5162_v58, %s3724_s7  ;;  %2108 = vrot.lane.b32.xlu2 %v5167_v55, %s3724_s7 }
 0x4e1   : >> { %v5171_v62 = vpop.permute.xlu2 %1996 }
 0x4e2   : >> { %6412 = vst [vmem:[#allocation112_spill] sm:$0xff] %v5171_v62 }
 0x4e6   : >> { %2112 = vrot.lane.b32.xlu1 %v5174_v63, %s3724_s7 }
 0x4e7   : >> { %2110 = vrot.lane.b32.xlu0 %v5179_v8, %s3724_s7  ;;  %2114 = vrot.lane.b32.xlu2 %v5184_v21, %s3724_s7 }
 0x4e9   : >> { %v5188_v15 = vpop.permute.xlu2 %2002 }
 0x4ea   : >> { %6413 = vst [vmem:[#allocation113_spill] sm:$0xff] %v5188_v15 }
 0x4ee   : >> { %2118 = vrot.lane.b32.xlu1 %v5191_v46, %s3724_s7 }
 0x4ef   : >> { %2116 = vrot.lane.b32.xlu0 %v5196_v30, %s3724_s7  ;;  %2120 = vrot.lane.b32.xlu2 %v5201_v6, %s3724_s7 }
 0x4f0   : >> { %v5205_v33 = vpop.permute.xlu1 %1988 }
 0x4f1   : >> { %6414 = vst [vmem:[#allocation114_spill] sm:$0xff] %v5205_v33  ;;  %v5207_v4 = vpop.permute.xlu2 %2008  ;;  %v5209_v3 = vpop.permute.xlu0 %1986 }
 0x4f2   : >> { %6415 = vst [vmem:[#allocation115_spill] sm:$0xff] %v5207_v4 }
 0x4f3   : >> { %6416 = vst [vmem:[#allocation116_spill] sm:$0xff] %v5209_v3 }
 0x4f6   : >> { %2171 = vperm.xlu1 %3578, %v4874_v10  }
 0x4f7   : >> { %2122 = vrot.lane.b32.xlu0 %v5213_v19, %s3724_s7  ;;  %2175 = vperm.xlu2 %3579, %v4870_v7  }
 0x4f8   : >> { %v5218_v57 = vpop.permute.xlu1 %1994 }
 0x4f9   : >> { %6417 = vst [vmem:[#allocation117_spill] sm:$0xff] %v5218_v57  ;;  %v5220_v1 = vpop.permute.xlu2 %2014  ;;  %v5222_v44 = vpop.permute.xlu0 %1992 }
 0x4fa   : >> { %6418 = vst [vmem:[#allocation118_spill] sm:$0xff] %v5220_v1 }
 0x4fb   : >> { %6419 = vst [vmem:[#allocation119_spill] sm:$0xff] %v5222_v44 }
 0x4fe   : >> { %2183 = vperm.xlu1 %3578, %v4888_v18  }
 0x4ff   : >> { %2179 = vperm.xlu0 %3580, %v4878_v5   ;;  %2187 = vperm.xlu2 %3579, %v4896_v32  }
 0x500   : >> { %v5227_v54 = vpop.permute.xlu1 %2000 }
 0x501   : >> { %6420 = vst [vmem:[#allocation120_spill] sm:$0xff] %v5227_v54  ;;  %v5229_v28 = vpop.permute.xlu2 %2020  ;;  %v5231_v4 = vpop.permute.xlu0 %1998 }
 0x502   : >> { %6421 = vst [vmem:[#allocation121_spill] sm:$0xff] %v5229_v28 }
 0x503   : >> { %6422 = vst [vmem:[#allocation122_spill] sm:$0xff] %v5231_v4 }
 0x506   : >> { %2191 = vperm.xlu1 %3578, %v4892_v24  }
 0x507   : >> { %2199 = vperm.xlu0 %3580, %v4914_v39   ;;  %2195 = vperm.xlu2 %3579, %v4906_v20  }
 0x508   : >> { %v5236_v1 = vpop.permute.xlu1 %2006 }
 0x509   : >> { %6423 = vst [vmem:[#allocation123_spill] sm:$0xff] %v5236_v1  ;;  %v5238_v15 = vpop.permute.xlu2 %2026  ;;  %v5240_v57 = vpop.permute.xlu0 %2004 }
 0x50a   : >> { %6424 = vst [vmem:[#allocation124_spill] sm:$0xff] %v5238_v15 }
 0x50b   : >> { %6425 = vst [vmem:[#allocation125_spill] sm:$0xff] %v5240_v57 }
 0x50e   : >> { %2203 = vperm.xlu1 %3578, %v4910_v0  }
 0x50f   : >> { %2211 = vperm.xlu0 %3580, %v4932_v43   ;;  %2207 = vperm.xlu2 %3579, %v4924_v52  }
 0x510   : >> { %v5245_v54 = vpop.permute.xlu1 %2012 }
 0x511   : >> { %6426 = vst [vmem:[#allocation126_spill] sm:$0xff] %v5245_v54  ;;  %v2079_v62 = vpop.permute.xlu2 %2078  ;;  %v5247_v33 = vpop.permute.xlu0 %2010 }
 0x512   : >> { %6427 = vst [vmem:[#allocation127_spill] sm:$0xff] %v5247_v33 }
 0x516   : >> { %2215 = vperm.xlu1 %3578, %v4928_v53  }
 0x517   : >> { %2223 = vperm.xlu0 %3580, %v4948_v56   ;;  %2219 = vperm.xlu2 %3579, %v4940_v40  }
 0x518   : >> { %v5252_v9 = vpop.permute.xlu1 %2018 }
 0x519   : >> { %6428 = vst [vmem:[#allocation128_spill] sm:$0xff] %v5252_v9  ;;  %v2085_v57 = vpop.permute.xlu2 %2084  ;;  %v5254_v4 = vpop.permute.xlu0 %2016 }
 0x51a   : >> { %6429 = vst [vmem:[#allocation129_spill] sm:$0xff] %v5254_v4 }
 0x51e   : >> { %2227 = vperm.xlu1 %3578, %v4944_v51  }
 0x51f   : >> { %2235 = vperm.xlu0 %3580, %v4964_v23   ;;  %2231 = vperm.xlu2 %3579, %v4956_v29  }
 0x520   : >> { %v5259_v44 = vpop.permute.xlu1 %2024 }
 0x521   : >> { %6430 = vst [vmem:[#allocation130_spill] sm:$0xff] %v5259_v44  ;;  %v2091_v33 = vpop.permute.xlu2 %2090  ;;  %v5261_v3 = vpop.permute.xlu0 %2022 }
 0x522   : >> { %6431 = vst [vmem:[#allocation131_spill] sm:$0xff] %v5261_v3 }
 0x526   : >> { %2239 = vperm.xlu1 %3578, %v4960_v41  }
 0x527   : >> { %2247 = vperm.xlu0 %3580, %v4980_v26   ;;  %2243 = vperm.xlu2 %3579, %v4972_v25  }
 0x528   : >> { %v5266_v15 = vpop.permute.xlu1 %2030 }
 0x529   : >> { %6432 = vst [vmem:[#allocation132_spill] sm:$0xff] %v5266_v15  ;;  %v2097_v4 = vpop.permute.xlu2 %2096  ;;  %v5268_v28 = vpop.permute.xlu0 %2028 }
 0x52a   : >> { %6433 = vst [vmem:[#allocation133_spill] sm:$0xff] %v5268_v28 }
 0x52e   : >> { %2251 = vperm.xlu1 %3578, %v4976_v61  }
 0x52f   : >> { %2259 = vperm.xlu0 %3580, %v4990_v35   ;;  %2255 = vperm.xlu2 %3579, %v4986_v59  }
 0x530   : >> { %v2083_v44 = vpop.permute.xlu1 %2082 }
 0x531   : >> { %v5273_v9 = vpop.permute.xlu2 %2102  ;;  %v2081_v3 = vpop.permute.xlu0 %2080 }
 0x532   : >> { %v2148_v35 = vsel %vm730_vm9, %v2081_v3, 0.0  ;;  %v2147_v3 = vsel %vm730_vm9, %v2079_v62, 0.0 }
 0x538   : >> { %v2089_v54 = vpop.permute.xlu1 %2088 }
 0x539   : >> { %v5275_v31 = vpop.permute.xlu2 %2108  ;;  %v2087_v1 = vpop.permute.xlu0 %2086 }
 0x53a   : >> { %v2151_v25 = vsel %vm730_vm9, %v2087_v1, 0.0  ;;  %v2150_v1 = vsel %vm730_vm9, %v2085_v57, 0.0 }
 0x540   : >> { %v2095_v17 = vpop.permute.xlu1 %2094 }
 0x541   : >> { %v5277_v48 = vpop.permute.xlu2 %2114  ;;  %v2093_v15 = vpop.permute.xlu0 %2092 }
 0x542   : >> { %v2154_v57 = vsel %vm730_vm9, %v2093_v15, 0.0 }
 0x548   : >> { %v2101_v36 = vpop.permute.xlu1 %2100 }
 0x549   : >> { %v5279_v28 = vpop.permute.xlu2 %2120  ;;  %v2099_v38 = vpop.permute.xlu0 %2098 }
 0x550   : >> { %v5281_v13 = vpop.permute.xlu1 %2106 }
 0x551   : >> { %v2176_v61 = vpop.permute.xlu2 %2175  ;;  %v2105_v59 = vpop.permute.xlu0 %2104 }
 0x552   : >> { %v2263_v26 = vmul.f32 %v2176_v61, %v2148_v35 }
 0x554   : >> { %2310 = vrot.lane.b32.xlu2 %v2263_v26, %s3717_s3 }
 0x558   : >> { %v5286_v41 = vpop.permute.xlu1 %2112 }
 0x559   : >> { %v2188_v23 = vpop.permute.xlu2 %2187  ;;  %v2111_v51 = vpop.permute.xlu0 %2110 }
 0x55a   : >> { %v2266_v29 = vmul.f32 %v2188_v23, %v2151_v25 }
 0x55c   : >> { %2316 = vrot.lane.b32.xlu2 %v2266_v29, %s3717_s3  ;;  %v2149_v29 = vsel %vm730_vm9, %v2083_v44, 0.0 }
 0x560   : >> { %v5291_v56 = vpop.permute.xlu1 %2118 }
 0x561   : >> { %v5293_v53 = vpop.permute.xlu0 %2116  ;;  %v2196_v40 = vpop.permute.xlu2 %2195 }
 0x568   : >> { %v2172_v61 = vpop.permute.xlu1 %2171 }
 0x569   : >> { %v2262_v35 = vmul.f32 %v2172_v61, %v2147_v3  ;;  %v5297_v26 = vpop.permute.xlu0 %2122  ;;  %v2208_v62 = vpop.permute.xlu2 %2207  ;;  %v2153_v3 = vsel %vm730_vm9, %v2091_v33, 0.0  ;;  %v2152_v61 = vsel %vm730_vm9, %v2089_v54, 0.0 }
 0x56a   : >> { %v2268_v52 = vmul.f32 %v2196_v40, %v2153_v3  ;;  %v2157_v40 = vsel %vm730_vm9, %v2099_v38, 0.0  ;;  %v2160_v38 = vsel %vm730_vm9, %v2105_v59, 0.0 }
 0x56b   : >> { %2308 = vrot.lane.b32.xlu1 %v2262_v35, %s3717_s3 }
 0x570   : >> { %v2184_v23 = vpop.permute.xlu1 %2183 }
 0x571   : >> { %v2265_v25 = vmul.f32 %v2184_v23, %v2150_v1  ;;  %v2180_v43 = vpop.permute.xlu0 %2179  ;;  %v2220_v33 = vpop.permute.xlu2 %2219 }
 0x572   : >> { %v2264_v0 = vmul.f32 %v2180_v43, %v2149_v29  ;;  %v2155_v43 = vsel %vm730_vm9, %v2095_v17, 0.0  ;;  %v2158_v17 = vsel %vm730_vm9, %v2101_v36, 0.0  ;;  %v2161_v36 = vsel %vm730_vm9, %v5281_v13, 0.0 }
 0x573   : >> { %2314 = vrot.lane.b32.xlu1 %v2265_v25, %s3717_s3  ;;  %v2164_v13 = vsel %vm730_vm9, %v5286_v41, 0.0  ;;  %v2168_v41 = vsel %vm730_vm9, %v5279_v28, 0.0 }
 0x574   : >> { %2312 = vrot.lane.b32.xlu0 %v2264_v0, %s3717_s3  ;;  %v2156_v0 = vsel %vm730_vm9, %v2097_v4, 0.0 }
 0x575   : >> { %v2271_v15 = vmul.f32 %v2208_v62, %v2156_v0 }
 0x578   : >> { %v2192_v35 = vpop.permute.xlu1 %2191 }
 0x579   : >> { %v2267_v44 = vmul.f32 %v2192_v35, %v2152_v61  ;;  %v2200_v1 = vpop.permute.xlu0 %2199 }
 0x57a   : >> { %v2269_v23 = vmul.f32 %v2200_v1, %v2154_v57  ;;  %v2232_v57 = vpop.permute.xlu2 %2231  ;;  %v2163_v1 = vsel %vm730_vm9, %v2111_v51, 0.0 }
 0x57b   : >> { %2320 = vrot.lane.b32.xlu1 %v2268_v52, %s3717_s3  ;;  %v2159_v52 = vsel %vm730_vm9, %v5273_v9, 0.0  ;;  %v2162_v9 = vsel %vm730_vm9, %v5275_v31, 0.0  ;;  %v2165_v31 = vsel %vm730_vm9, %v5277_v48, 0.0 }
 0x57c   : >> { %2318 = vrot.lane.b32.xlu0 %v2267_v44, %s3717_s3  ;;  %2322 = vrot.lane.b32.xlu2 %v2269_v23, %s3717_s3  ;;  %v2274_v62 = vmul.f32 %v2220_v33, %v2159_v52  ;;  %v2277_v23 = vmul.f32 %v2232_v57, %v2162_v9  ;;  %v2167_v52 = vsel %vm730_vm9, %v5291_v56, 0.0  ;;  %v3727_v56 = vmov 6  }
 0x57d   : >> { %3581 = vset.pattern.permute.xlu2 %v3727_v56  ;;  %3583 = vset.pattern.permute.xlu1 %v3727_v56 }
 0x57e   : >> { %3582 = vset.pattern.permute.xlu0 %v3727_v56  ;;  %v6463_v56 = vld [vmem:[#allocation106_spill] sm:$0xff] }
 0x580   : >> { %v2204_v54 = vpop.permute.xlu1 %2203 }
 0x581   : >> { %v2270_v29 = vmul.f32 %v2204_v54, %v2155_v43  ;;  %v2212_v25 = vpop.permute.xlu0 %2211 }
 0x582   : >> { %v2272_v3 = vmul.f32 %v2212_v25, %v2157_v40  ;;  %v2244_v54 = vpop.permute.xlu2 %2243  ;;  %v2166_v40 = vsel %vm730_vm9, %v5293_v53, 0.0 }
 0x583   : >> { %2326 = vrot.lane.b32.xlu1 %v2271_v15, %s3717_s3  ;;  %v2280_v15 = vmul.f32 %v2244_v54, %v2165_v31  ;;  %v6450_v31 = vld [vmem:[#allocation91_spill] sm:$0xff] }
 0x584   : >> { %2324 = vrot.lane.b32.xlu0 %v2270_v29, %s3717_s3  ;;  %2328 = vrot.lane.b32.xlu2 %v2272_v3, %s3717_s3 }
 0x588   : >> { %v2216_v4 = vpop.permute.xlu1 %2215 }
 0x589   : >> { %v2273_v61 = vmul.f32 %v2216_v4, %v2158_v17  ;;  %v2224_v35 = vpop.permute.xlu0 %2223  ;;  %v2169_v17 = vsel %vm730_vm9, %v5297_v26, 0.0 }
 0x58a   : >> { %v2275_v44 = vmul.f32 %v2224_v35, %v2160_v38  ;;  %v2256_v48 = vpop.permute.xlu2 %2255 }
 0x58b   : >> { %2332 = vrot.lane.b32.xlu1 %v2274_v62, %s3717_s3  ;;  %v2283_v4 = vmul.f32 %v2256_v48, %v2168_v41  ;;  %v6456_v41 = vld [vmem:[#allocation102_spill] sm:$0xff] }
 0x58c   : >> { %2330 = vrot.lane.b32.xlu0 %v2273_v61, %s3717_s3  ;;  %2334 = vrot.lane.b32.xlu2 %v2275_v44, %s3717_s3 }
 0x590   : >> { %v2228_v59 = vpop.permute.xlu1 %2227 }
 0x591   : >> { %v2276_v0 = vmul.f32 %v2228_v59, %v2161_v36  ;;  %v2236_v43 = vpop.permute.xlu0 %2235 }
 0x592   : >> { %v2278_v33 = vmul.f32 %v2236_v43, %v2163_v1 }
 0x593   : >> { %2338 = vrot.lane.b32.xlu1 %v2277_v23, %s3717_s3 }
 0x594   : >> { %2336 = vrot.lane.b32.xlu0 %v2276_v0, %s3717_s3  ;;  %2340 = vrot.lane.b32.xlu2 %v2278_v33, %s3717_s3 }
 0x598   : >> { %v2240_v51 = vpop.permute.xlu1 %2239 }
 0x599   : >> { %v2279_v29 = vmul.f32 %v2240_v51, %v2164_v13  ;;  %v2248_v25 = vpop.permute.xlu0 %2247 }
 0x59a   : >> { %v2281_v3 = vmul.f32 %v2248_v25, %v2166_v40  ;;  %v6453_v40 = vld [vmem:[#allocation97_spill] sm:$0xff] }
 0x59b   : >> { %2344 = vrot.lane.b32.xlu1 %v2280_v15, %s3717_s3  ;;  %v6454_v15 = vld [vmem:[#allocation100_spill] sm:$0xff] }
 0x59c   : >> { %2342 = vrot.lane.b32.xlu0 %v2279_v29, %s3717_s3  ;;  %2346 = vrot.lane.b32.xlu2 %v2281_v3, %s3717_s3  ;;  %v6455_v29 = vld [vmem:[#allocation96_spill] sm:$0xff] }
 0x5a0   : >> { %v2252_v53 = vpop.permute.xlu1 %2251 }
 0x5a1   : >> { %v2282_v38 = vmul.f32 %v2252_v53, %v2167_v52  ;;  %v2260_v62 = vpop.permute.xlu0 %2259  ;;  %v6457_v52 = vld [vmem:[#allocation105_spill] sm:$0xff] }
 0x5a2   : >> { %v2284_v61 = vmul.f32 %v2260_v62, %v2169_v17  ;;  %v6458_v53 = vld [vmem:[#allocation101_spill] sm:$0xff]  ;;  %v6461_v62 = vld [vmem:[#allocation107_spill] sm:$0xff] }
 0x5a3   : >> { %2350 = vrot.lane.b32.xlu1 %v2283_v4, %s3717_s3 }
 0x5a4   : >> { %2348 = vrot.lane.b32.xlu0 %v2282_v38, %s3717_s3  ;;  %2352 = vrot.lane.b32.xlu2 %v2284_v61, %s3717_s3  ;;  %v6462_v61 = vld [vmem:[#allocation109_spill] sm:$0xff] }
 0x5ab   : >> { %2402 = vrot.lane.b32.xlu1 %v5100_v45, %s3726_s8 }
 0x5ac   : >> { %2400 = vrot.lane.b32.xlu0 %v5090_v47, %s3726_s8  ;;  %2404 = vrot.lane.b32.xlu2 %v5095_v12, %s3726_s8 }
 0x5ae   : >> { %v5389_v28 = vpop.permute.xlu2 %2310 }
 0x5af   : >> { %6434 = vst [vmem:[#allocation134_spill] sm:$0xff] %v5389_v28 }
 0x5b3   : >> { %2408 = vrot.lane.b32.xlu1 %v5115_v11, %s3726_s8 }
 0x5b4   : >> { %2406 = vrot.lane.b32.xlu0 %v5105_v49, %s3726_s8  ;;  %2410 = vrot.lane.b32.xlu2 %v5110_v16, %s3726_s8 }
 0x5b6   : >> { %v5401_v26 = vpop.permute.xlu2 %2316 }
 0x5b7   : >> { %6435 = vst [vmem:[#allocation135_spill] sm:$0xff] %v5401_v26 }
 0x5bb   : >> { %2414 = vrot.lane.b32.xlu1 %v5130_v60, %s3726_s8 }
 0x5bc   : >> { %2412 = vrot.lane.b32.xlu0 %v5120_v50, %s3726_s8  ;;  %2416 = vrot.lane.b32.xlu2 %v5125_v27, %s3726_s8 }
 0x5c3   : >> { %2420 = vrot.lane.b32.xlu1 %v5145_v14, %s3726_s8 }
 0x5c4   : >> { %2418 = vrot.lane.b32.xlu0 %v5135_v42, %s3726_s8  ;;  %2422 = vrot.lane.b32.xlu2 %v5140_v34, %s3726_s8 }
 0x5cb   : >> { %2426 = vrot.lane.b32.xlu1 %v5162_v58, %s3726_s8 }
 0x5cc   : >> { %2424 = vrot.lane.b32.xlu0 %v5150_v2, %s3726_s8  ;;  %2428 = vrot.lane.b32.xlu2 %v5157_v22, %s3726_s8 }
 0x5d3   : >> { %2432 = vrot.lane.b32.xlu1 %v5179_v8, %s3726_s8 }
 0x5d4   : >> { %2430 = vrot.lane.b32.xlu0 %v5167_v55, %s3726_s8  ;;  %2434 = vrot.lane.b32.xlu2 %v5174_v63, %s3726_s8 }
 0x5d6   : >> { %v5409_v35 = vpop.permute.xlu2 %2322 }
 0x5d7   : >> { %6436 = vst [vmem:[#allocation136_spill] sm:$0xff] %v5409_v35 }
 0x5db   : >> { %2438 = vrot.lane.b32.xlu1 %v5196_v30, %s3726_s8 }
 0x5dc   : >> { %2436 = vrot.lane.b32.xlu0 %v5184_v21, %s3726_s8  ;;  %2440 = vrot.lane.b32.xlu2 %v5191_v46, %s3726_s8 }
 0x5dd   : >> { %v5417_v57 = vpop.permute.xlu1 %2308 }
 0x5de   : >> { %6437 = vst [vmem:[#allocation137_spill] sm:$0xff] %v5417_v57  ;;  %v5419_v44 = vpop.permute.xlu2 %2328 }
 0x5e3   : >> { %2444 = vrot.lane.b32.xlu1 %v5213_v19, %s3726_s8 }
 0x5e4   : >> { %2442 = vrot.lane.b32.xlu0 %v5201_v6, %s3726_s8  ;;  %2493 = vperm.xlu2 %3581, %v4874_v10  }
 0x5e5   : >> { %v5426_v9 = vpop.permute.xlu1 %2314 }
 0x5e6   : >> { %6438 = vst [vmem:[#allocation138_spill] sm:$0xff] %v5426_v9  ;;  %v5428_v36 = vpop.permute.xlu2 %2334  ;;  %v5430_v59 = vpop.permute.xlu0 %2312 }
 0x5e7   : >> { %6439 = vst [vmem:[#allocation139_spill] sm:$0xff] %v5430_v59 }
 0x5eb   : >> { %2501 = vperm.xlu1 %3583, %v4878_v5  }
 0x5ec   : >> { %2497 = vperm.xlu0 %3582, %v4870_v7   ;;  %2505 = vperm.xlu2 %3581, %v4888_v18   ;;  %v6444_v7 = vld [vmem:[#allocation90_spill] sm:$0xff] }
 0x5ed   : >> { %v5435_v1 = vpop.permute.xlu1 %2320  ;;  %v6445_v18 = vld [vmem:[#allocation86_spill] sm:$0xff] }
 0x5ee   : >> { %6440 = vst [vmem:[#allocation140_spill] sm:$0xff] %v5435_v1  ;;  %v5437_v23 = vpop.permute.xlu2 %2340  ;;  %v5439_v0 = vpop.permute.xlu0 %2318 }
 0x5ef   : >> { %6441 = vst [vmem:[#allocation141_spill] sm:$0xff] %v5439_v0 }
 0x5f3   : >> { %2509 = vperm.xlu1 %3583, %v4896_v32  }
 0x5f4   : >> { %2517 = vperm.xlu0 %3582, %v4906_v20   ;;  %2513 = vperm.xlu2 %3581, %v4892_v24   ;;  %v6448_v20 = vld [vmem:[#allocation92_spill] sm:$0xff]  ;;  %v6449_v24 = vld [vmem:[#allocation95_spill] sm:$0xff] }
 0x5f5   : >> { %v5444_v10 = vpop.permute.xlu1 %2326 }
 0x5f6   : >> { %6442 = vst [vmem:[#allocation142_spill] sm:$0xff] %v5444_v10  ;;  %v5446_v43 = vpop.permute.xlu2 %2346  ;;  %v5448_v5 = vpop.permute.xlu0 %2324 }
 0x5f7   : >> { %6443 = vst [vmem:[#allocation143_spill] sm:$0xff] %v5448_v5 }
 0x5fb   : >> { %2521 = vperm.xlu1 %3583, %v4914_v39  }
 0x5fc   : >> { %2529 = vperm.xlu0 %3582, %v6444_v7   ;;  %2525 = vperm.xlu2 %3581, %v6445_v18  }
 0x5fd   : >> { %v5453_v33 = vpop.permute.xlu1 %2332 }
 0x5fe   : >> { %6446 = vst [vmem:[#allocation90_spill] sm:$0xff] %v5453_v33  ;;  %v5455_v54 = vpop.permute.xlu2 %2352  ;;  %v5457_v32 = vpop.permute.xlu0 %2330 }
 0x5ff   : >> { %6447 = vst [vmem:[#allocation86_spill] sm:$0xff] %v5457_v32 }
 0x603   : >> { %2533 = vperm.xlu1 %3583, %v6448_v20  }
 0x604   : >> { %2541 = vperm.xlu0 %3582, %v6449_v24   ;;  %2537 = vperm.xlu2 %3581, %v6450_v31   ;;  %v6464_v24 = vld [vmem:[#allocation110_spill] sm:$0xff] }
 0x605   : >> { %v5462_v13 = vpop.permute.xlu1 %2338 }
 0x606   : >> { %6451 = vst [vmem:[#allocation92_spill] sm:$0xff] %v5462_v13  ;;  %v2405_v51 = vpop.permute.xlu2 %2404  ;;  %v5464_v39 = vpop.permute.xlu0 %2336 }
 0x607   : >> { %6452 = vst [vmem:[#allocation95_spill] sm:$0xff] %v5464_v39 }
 0x60b   : >> { %2545 = vperm.xlu1 %3583, %v6453_v40  }
 0x60c   : >> { %2553 = vperm.xlu0 %3582, %v6454_v15   ;;  %2549 = vperm.xlu2 %3581, %v6455_v29  }
 0x60d   : >> { %v5469_v25 = vpop.permute.xlu1 %2344 }
 0x60e   : >> { %v2411_v3 = vpop.permute.xlu2 %2410  ;;  %v5471_v48 = vpop.permute.xlu0 %2342 }
 0x60f   : >> { %v2474_v9 = vsel %vm729_vm8, %v2411_v3, 0.0 }
 0x613   : >> { %2557 = vperm.xlu1 %3583, %v6456_v41  }
 0x614   : >> { %2565 = vperm.xlu0 %3582, %v6457_v52   ;;  %2561 = vperm.xlu2 %3581, %v6458_v53  }
 0x615   : >> { %v5476_v17 = vpop.permute.xlu1 %2350 }
 0x616   : >> { %6459 = vst [vmem:[#allocation91_spill] sm:$0xff] %v5476_v17  ;;  %v2417_v4 = vpop.permute.xlu2 %2416  ;;  %v5478_v38 = vpop.permute.xlu0 %2348 }
 0x617   : >> { %6460 = vst [vmem:[#allocation97_spill] sm:$0xff] %v5478_v38 }
 0x61b   : >> { %2569 = vperm.xlu1 %3583, %v6461_v62  }
 0x61c   : >> { %2577 = vperm.xlu0 %3582, %v6462_v61   ;;  %2573 = vperm.xlu2 %3581, %v6463_v56  }
 0x61d   : >> { %v2403_v7 = vpop.permute.xlu1 %2402 }
 0x61e   : >> { %v2423_v18 = vpop.permute.xlu2 %2422  ;;  %v2401_v20 = vpop.permute.xlu0 %2400 }
 0x61f   : >> { %v2469_v56 = vsel %vm729_vm8, %v2401_v20, 0.0 }
 0x623   : >> { %2581 = vperm.xlu1 %3583, %v6464_v24  }
 0x625   : >> { %v2409_v31 = vpop.permute.xlu1 %2408 }
 0x626   : >> { %v5484_v40 = vpop.permute.xlu2 %2428  ;;  %v2407_v15 = vpop.permute.xlu0 %2406  ;;  %v2473_v57 = vsel %vm729_vm8, %v2409_v31, 0.0 }
 0x627   : >> { %v2472_v13 = vsel %vm729_vm8, %v2407_v15, 0.0  ;;  %v2470_v15 = vsel %vm729_vm8, %v2403_v7, 0.0 }
 0x62d   : >> { %v2415_v29 = vpop.permute.xlu1 %2414 }
 0x62e   : >> { %v5486_v41 = vpop.permute.xlu2 %2434  ;;  %v2413_v52 = vpop.permute.xlu0 %2412  ;;  %v2476_v3 = vsel %vm729_vm8, %v2415_v29, 0.0 }
 0x635   : >> { %v2421_v53 = vpop.permute.xlu1 %2420 }
 0x636   : >> { %v5488_v39 = vpop.permute.xlu2 %2440  ;;  %v2419_v62 = vpop.permute.xlu0 %2418 }
 0x63d   : >> { %v5490_v61 = vpop.permute.xlu1 %2426 }
 0x63e   : >> { %v2494_v32 = vpop.permute.xlu2 %2493  ;;  %v2425_v35 = vpop.permute.xlu0 %2424 }
 0x63f   : >> { %v2584_v24 = vmul.f32 %v2494_v32, %v2469_v56  ;;  %v2471_v56 = vsel %vm729_vm8, %v2405_v51, 0.0  ;;  %v2475_v51 = vsel %vm729_vm8, %v2413_v52, 0.0 }
 0x641   : >> { %2630 = vrot.lane.b32.xlu2 %v2584_v24, %s3717_s3 }
 0x645   : >> { %v5495_v5 = vpop.permute.xlu1 %2432 }
 0x646   : >> { %v2506_v26 = vpop.permute.xlu2 %2505  ;;  %v2431_v0 = vpop.permute.xlu0 %2430 }
 0x647   : >> { %v2587_v33 = vmul.f32 %v2506_v26, %v2472_v13 }
 0x649   : >> { %2636 = vrot.lane.b32.xlu2 %v2587_v33, %s3717_s3 }
 0x64d   : >> { %v5500_v28 = vpop.permute.xlu1 %2438 }
 0x64e   : >> { %v5502_v59 = vpop.permute.xlu0 %2436  ;;  %v2514_v32 = vpop.permute.xlu2 %2513 }
 0x64f   : >> { %v2589_v17 = vmul.f32 %v2514_v32, %v2474_v9  ;;  %v2478_v9 = vsel %vm729_vm8, %v2419_v62, 0.0  ;;  %v2481_v62 = vsel %vm729_vm8, %v2425_v35, 0.0  ;;  %v2482_v35 = vsel %vm729_vm8, %v5490_v61, 0.0 }
 0x650   : >> { %v2485_v61 = vsel %vm729_vm8, %v5495_v5, 0.0  ;;  %v2489_v5 = vsel %vm729_vm8, %v5488_v39, 0.0 }
 0x655   : >> { %v5504_v20 = vpop.permute.xlu1 %2444 }
 0x656   : >> { %v5506_v10 = vpop.permute.xlu0 %2442  ;;  %v2526_v33 = vpop.permute.xlu2 %2525 }
 0x65d   : >> { %v2502_v24 = vpop.permute.xlu1 %2501 }
 0x65e   : >> { %v2586_v1 = vmul.f32 %v2502_v24, %v2471_v56  ;;  %v2498_v26 = vpop.permute.xlu0 %2497  ;;  %v2538_v31 = vpop.permute.xlu2 %2537 }
 0x65f   : >> { %v2585_v13 = vmul.f32 %v2498_v26, %v2470_v15 }
 0x660   : >> { %2634 = vrot.lane.b32.xlu1 %v2586_v1, %s3717_s3  ;;  %v2477_v1 = vsel %vm729_vm8, %v2417_v4, 0.0  ;;  %v2479_v4 = vsel %vm729_vm8, %v2421_v53, 0.0 }
 0x661   : >> { %2632 = vrot.lane.b32.xlu0 %v2585_v13, %s3717_s3 }
 0x665   : >> { %v2510_v38 = vpop.permute.xlu1 %2509 }
 0x666   : >> { %v2588_v7 = vmul.f32 %v2510_v38, %v2473_v57  ;;  %v2518_v56 = vpop.permute.xlu0 %2517  ;;  %v2592_v57 = vmul.f32 %v2526_v33, %v2477_v1 }
 0x667   : >> { %v2590_v24 = vmul.f32 %v2518_v56, %v2475_v51  ;;  %v2550_v51 = vpop.permute.xlu2 %2549  ;;  %v3728_v56 = vmov 7  }
 0x668   : >> { %2640 = vrot.lane.b32.xlu1 %v2589_v17, %s3717_s3  ;;  %v2480_v17 = vsel %vm729_vm8, %v2423_v18, 0.0  ;;  %3585 = vset.pattern.permute.xlu2 %v3728_v56  ;;  %v2483_v18 = vsel %vm729_vm8, %v5484_v40, 0.0  ;;  %v2486_v40 = vsel %vm729_vm8, %v5486_v41, 0.0 }
 0x669   : >> { %2638 = vrot.lane.b32.xlu0 %v2588_v7, %s3717_s3  ;;  %2642 = vrot.lane.b32.xlu2 %v2590_v24, %s3717_s3  ;;  %v2595_v26 = vmul.f32 %v2538_v31, %v2480_v17  ;;  %v2484_v24 = vsel %vm729_vm8, %v2431_v0, 0.0  ;;  %v2598_v1 = vmul.f32 %v2550_v51, %v2483_v18  ;;  %v5580_v51 = vld [vmem:[%s4159_s29] sm:$0xff] }
 0x66a   : >> { %3584 = vset.pattern.permute.xlu1 %v3728_v56  ;;  %3586 = vset.pattern.permute.xlu0 %v3728_v56  ;;  %v5589_v56 = vld [vmem:[%s4159_s29 + $0x18] sm:$0xff]  ;;  %v5597_v18 = vld [vmem:[%s4159_s29 + $0x20] sm:$0xff] }
 0x66d   : >> { %v2522_v15 = vpop.permute.xlu1 %2521 }
 0x66e   : >> { %v2591_v38 = vmul.f32 %v2522_v15, %v2476_v3  ;;  %v2530_v52 = vpop.permute.xlu0 %2529 }
 0x66f   : >> { %v2593_v32 = vmul.f32 %v2530_v52, %v2478_v9  ;;  %v2562_v9 = vpop.permute.xlu2 %2561 }
 0x670   : >> { %2646 = vrot.lane.b32.xlu1 %v2592_v57, %s3717_s3  ;;  %v2487_v57 = vsel %vm729_vm8, %v5502_v59, 0.0  ;;  %v2488_v59 = vsel %vm729_vm8, %v5500_v28, 0.0  ;;  %v2491_v28 = vsel %vm729_vm8, %v5504_v20, 0.0  ;;  %v5593_v20 = vld [vmem:[%s4159_s29 + $0x10] sm:$0xff] }
 0x671   : >> { %2644 = vrot.lane.b32.xlu0 %v2591_v38, %s3717_s3  ;;  %2648 = vrot.lane.b32.xlu2 %v2593_v32, %s3717_s3  ;;  %v2601_v38 = vmul.f32 %v2562_v9, %v2486_v40  ;;  %v5627_v9 = vld [vmem:[%s4159_s29 + $0x58] sm:$0xff]  ;;  %v5631_v40 = vld [vmem:[%s4159_s29 + $0x68] sm:$0xff] }
 0x675   : >> { %v2534_v29 = vpop.permute.xlu1 %2533 }
 0x676   : >> { %v2594_v13 = vmul.f32 %v2534_v29, %v2479_v4  ;;  %v2542_v33 = vpop.permute.xlu0 %2541  ;;  %v2490_v29 = vsel %vm729_vm8, %v5506_v10, 0.0 }
 0x677   : >> { %v2596_v7 = vmul.f32 %v2542_v33, %v2481_v62  ;;  %v2574_v41 = vpop.permute.xlu2 %2573 }
 0x678   : >> { %2652 = vrot.lane.b32.xlu1 %v2595_v26, %s3717_s3  ;;  %v2604_v62 = vmul.f32 %v2574_v41, %v2489_v5  ;;  %v5659_v41 = vld [vmem:[%s4159_s29 + $0x98] sm:$0xff]  ;;  %v5663_v5 = vld [vmem:[%s4159_s29 + $0x90] sm:$0xff] }
 0x679   : >> { %2650 = vrot.lane.b32.xlu0 %v2594_v13, %s3717_s3  ;;  %2654 = vrot.lane.b32.xlu2 %v2596_v7, %s3717_s3  ;;  %v5585_v7 = vld [vmem:[%s4159_s29 + $0x8] sm:$0xff]  ;;  %6470 = vst [vmem:[#allocation107_spill] sm:$0xff] %v5659_v41 }
 0x67a   : >> { %6471 = vst [vmem:[#allocation109_spill] sm:$0xff] %v5663_v5 }
 0x67d   : >> { %v2546_v53 = vpop.permute.xlu1 %2545 }
 0x67e   : >> { %v2597_v3 = vmul.f32 %v2546_v53, %v2482_v35  ;;  %v2554_v31 = vpop.permute.xlu0 %2553  ;;  %v5601_v35 = vld [vmem:[%s4159_s29 + $0x28] sm:$0xff]  ;;  %v5605_v53 = vld [vmem:[%s4159_s29 + $0x38] sm:$0xff] }
 0x67f   : >> { %v2599_v15 = vmul.f32 %v2554_v31, %v2484_v24  ;;  %v5609_v24 = vld [vmem:[%s4159_s29 + $0x30] sm:$0xff] }
 0x680   : >> { %2658 = vrot.lane.b32.xlu1 %v2598_v1, %s3717_s3  ;;  %v5613_v1 = vld [vmem:[%s4159_s29 + $0x40] sm:$0xff]  ;;  %v5619_v31 = vld [vmem:[%s4159_s29 + $0x50] sm:$0xff] }
 0x681   : >> { %2656 = vrot.lane.b32.xlu0 %v2597_v3, %s3717_s3  ;;  %2660 = vrot.lane.b32.xlu2 %v2599_v15, %s3717_s3  ;;  %v5623_v15 = vld [vmem:[%s4159_s29 + $0x48] sm:$0xff] }
 0x685   : >> { %v2558_v0 = vpop.permute.xlu1 %2557 }
 0x686   : >> { %v2600_v52 = vmul.f32 %v2558_v0, %v2485_v61  ;;  %v2566_v32 = vpop.permute.xlu0 %2565  ;;  %v5635_v61 = vld [vmem:[%s4159_s29 + $0x60] sm:$0xff] }
 0x687   : >> { %v2602_v17 = vmul.f32 %v2566_v32, %v2487_v57  ;;  %v5641_v57 = vld [vmem:[%s4159_s29 + $0x70] sm:$0xff] }
 0x688   : >> { %2664 = vrot.lane.b32.xlu1 %v2601_v38, %s3717_s3  ;;  %v5645_v38 = vld [vmem:[%s4159_s29 + $0x80] sm:$0xff] }
 0x689   : >> { %2662 = vrot.lane.b32.xlu0 %v2600_v52, %s3717_s3  ;;  %2666 = vrot.lane.b32.xlu2 %v2602_v17, %s3717_s3  ;;  %6467 = vst [vmem:[#allocation102_spill] sm:$0xff] %v5645_v38  ;;  %v5649_v52 = vld [vmem:[%s4159_s29 + $0x78] sm:$0xff]  ;;  %v5655_v17 = vld [vmem:[%s4159_s29 + $0x88] sm:$0xff] }
 0x68a   : >> { %6469 = vst [vmem:[#allocation101_spill] sm:$0xff] %v5655_v17 }
 0x68d   : >> { %v2570_v4 = vpop.permute.xlu1 %2569 }
 0x68e   : >> { %v2603_v26 = vmul.f32 %v2570_v4, %v2488_v59  ;;  %v2578_v13 = vpop.permute.xlu0 %2577  ;;  %v5669_v4 = vld [vmem:[%s4159_s29 + $0xa0] sm:$0xff] }
 0x68f   : >> { %v2605_v33 = vmul.f32 %v2578_v13, %v2490_v29  ;;  %6473 = vst [vmem:[#allocation110_spill] sm:$0xff] %v5669_v4  ;;  %v5673_v29 = vld [vmem:[%s4159_s29 + $0xb0] sm:$0xff] }
 0x690   : >> { %2670 = vrot.lane.b32.xlu1 %v2604_v62, %s3717_s3  ;;  %6474 = vst [vmem:[#allocation144_spill] sm:$0xff] %v5673_v29  ;;  %v5677_v62 = vld [vmem:[%s4159_s29 + $0xa8] sm:$0xff] }
 0x691   : >> { %2668 = vrot.lane.b32.xlu0 %v2603_v26, %s3717_s3  ;;  %2672 = vrot.lane.b32.xlu2 %v2605_v33, %s3717_s3  ;;  %6475 = vst [vmem:[#allocation145_spill] sm:$0xff] %v5677_v62 }
 0x695   : >> { %v2582_v10 = vpop.permute.xlu1 %2581 }
 0x696   : >> { %v2606_v39 = vmul.f32 %v2582_v10, %v2491_v28 }
 0x698   : >> { %2723 = vperm.xlu1 %3584, %v5580_v51  }
 0x699   : >> { %2674 = vrot.lane.b32.xlu0 %v2606_v39, %s3717_s3  ;;  %2727 = vperm.xlu2 %3585, %v5585_v7  }
 0x69b   : >> { %v5616_v3 = vpop.permute.xlu2 %2630 }
 0x69c   : >> { %6465 = vst [vmem:[#allocation100_spill] sm:$0xff] %v5616_v3 }
 0x6a0   : >> { %2735 = vperm.xlu1 %3584, %v5589_v56  }
 0x6a1   : >> { %2731 = vperm.xlu0 %3586, %v5593_v20   ;;  %2739 = vperm.xlu2 %3585, %v5597_v18  }
 0x6a3   : >> { %v5638_v0 = vpop.permute.xlu2 %2636 }
 0x6a4   : >> { %6466 = vst [vmem:[#allocation96_spill] sm:$0xff] %v5638_v0 }
 0x6a8   : >> { %2743 = vperm.xlu1 %3584, %v5601_v35  }
 0x6a9   : >> { %2751 = vperm.xlu0 %3586, %v5605_v53   ;;  %2747 = vperm.xlu2 %3585, %v5609_v24  }
 0x6b0   : >> { %2755 = vperm.xlu1 %3584, %v5613_v1  }
 0x6b1   : >> { %2763 = vperm.xlu0 %3586, %v5619_v31   ;;  %2759 = vperm.xlu2 %3585, %v5623_v15  }
 0x6b8   : >> { %2767 = vperm.xlu1 %3584, %v5627_v9  }
 0x6b9   : >> { %2775 = vperm.xlu0 %3586, %v5631_v40   ;;  %2771 = vperm.xlu2 %3585, %v5635_v61  }
 0x6c0   : >> { %2779 = vperm.xlu1 %3584, %v5641_v57  }
 0x6c1   : >> { %2787 = vperm.xlu0 %3586, %v5645_v38   ;;  %2783 = vperm.xlu2 %3585, %v5649_v52  }
 0x6c3   : >> { %v5652_v32 = vpop.permute.xlu2 %2642 }
 0x6c4   : >> { %6468 = vst [vmem:[#allocation105_spill] sm:$0xff] %v5652_v32 }
 0x6c8   : >> { %2791 = vperm.xlu1 %3584, %v5655_v17  }
 0x6c9   : >> { %2799 = vperm.xlu0 %3586, %v5659_v41   ;;  %2795 = vperm.xlu2 %3585, %v5663_v5  }
 0x6cb   : >> { %v5666_v59 = vpop.permute.xlu2 %2648 }
 0x6cc   : >> { %6472 = vst [vmem:[#allocation106_spill] sm:$0xff] %v5666_v59 }
 0x6d0   : >> { %2803 = vperm.xlu1 %3584, %v5669_v4  }
 0x6d1   : >> { %2811 = vperm.xlu0 %3586, %v5673_v29   ;;  %2807 = vperm.xlu2 %3585, %v5677_v62  }
 0x6d2   : >> { %v5680_v26 = vpop.permute.xlu1 %2634 }
 0x6d3   : >> { %6476 = vst [vmem:[#allocation146_spill] sm:$0xff] %v5680_v26  ;;  %v5682_v13 = vpop.permute.xlu2 %2654  ;;  %v5684_v33 = vpop.permute.xlu0 %2632 }
 0x6d4   : >> { %6477 = vst [vmem:[#allocation147_spill] sm:$0xff] %v5682_v13 }
 0x6d5   : >> { %6478 = vst [vmem:[#allocation148_spill] sm:$0xff] %v5684_v33 }
 0x6da   : >> { %v5686_v28 = vpop.permute.xlu1 %2640 }
 0x6db   : >> { %6479 = vst [vmem:[#allocation149_spill] sm:$0xff] %v5686_v28  ;;  %v5688_v10 = vpop.permute.xlu2 %2660  ;;  %v5690_v39 = vpop.permute.xlu0 %2638 }
 0x6dc   : >> { %6480 = vst [vmem:[#allocation150_spill] sm:$0xff] %v5688_v10 }
 0x6dd   : >> { %6481 = vst [vmem:[#allocation151_spill] sm:$0xff] %v5690_v39 }
 0x6e2   : >> { %v5692_v59 = vpop.permute.xlu1 %2646 }
 0x6e3   : >> { %6482 = vst [vmem:[#allocation152_spill] sm:$0xff] %v5692_v59  ;;  %v5694_v32 = vpop.permute.xlu2 %2666  ;;  %v5696_v0 = vpop.permute.xlu0 %2644 }
 0x6e4   : >> { %6483 = vst [vmem:[#allocation153_spill] sm:$0xff] %v5696_v0 }
 0x6ea   : >> { %v5698_v3 = vpop.permute.xlu1 %2652 }
 0x6eb   : >> { %6484 = vst [vmem:[#allocation154_spill] sm:$0xff] %v5698_v3  ;;  %v5700_v37 = vpop.permute.xlu2 %2672  ;;  %v5702_v26 = vpop.permute.xlu0 %2650 }
 0x6ec   : >> { %6485 = vst [vmem:[#allocation155_spill] sm:$0xff] %v5700_v37 }
 0x6f2   : >> { %v5704_v13 = vpop.permute.xlu1 %2658 }
 0x6f3   : >> { %6486 = vst [vmem:[#allocation156_spill] sm:$0xff] %v5704_v13  ;;  %v2728_v33 = vpop.permute.xlu2 %2727  ;;  %v5706_v28 = vpop.permute.xlu0 %2656 }
 0x6f4   : >> { %v2815_v10 = vmul.f32 %v5100_v45, %v2728_v33 }
 0x6f6   : >> { %2862 = vrot.lane.b32.xlu2 %v2815_v10, %s3722_s6 }
 0x6fa   : >> { %v5710_v59 = vpop.permute.xlu1 %2664 }
 0x6fb   : >> { %6487 = vst [vmem:[#allocation157_spill] sm:$0xff] %v5710_v59  ;;  %v2740_v39 = vpop.permute.xlu2 %2739  ;;  %v5712_v29 = vpop.permute.xlu0 %2662 }
 0x6fc   : >> { %v2818_v3 = vmul.f32 %v5115_v11, %v2740_v39 }
 0x6fe   : >> { %2868 = vrot.lane.b32.xlu2 %v2818_v3, %s3722_s6 }
 0x702   : >> { %v5716_v0 = vpop.permute.xlu1 %2670 }
 0x703   : >> { %6488 = vst [vmem:[#allocation158_spill] sm:$0xff] %v5716_v0  ;;  %v5718_v4 = vpop.permute.xlu0 %2668  ;;  %v2748_v33 = vpop.permute.xlu2 %2747 }
 0x704   : >> { %v2820_v37 = vmul.f32 %v5120_v50, %v2748_v33 }
 0x70a   : >> { %v2724_v13 = vpop.permute.xlu1 %2723 }
 0x70b   : >> { %v2814_v62 = vmul.f32 %v5090_v47, %v2724_v13  ;;  %v5721_v41 = vpop.permute.xlu0 %2674  ;;  %v2760_v3 = vpop.permute.xlu2 %2759 }
 0x70d   : >> { %2860 = vrot.lane.b32.xlu1 %v2814_v62, %s3722_s6 }
 0x712   : >> { %v2736_v10 = vpop.permute.xlu1 %2735 }
 0x713   : >> { %v2817_v17 = vmul.f32 %v5105_v49, %v2736_v10  ;;  %v2732_v5 = vpop.permute.xlu0 %2731 }
 0x714   : >> { %v2816_v39 = vmul.f32 %v5095_v12, %v2732_v5  ;;  %v2772_v5 = vpop.permute.xlu2 %2771 }
 0x715   : >> { %2866 = vrot.lane.b32.xlu1 %v2817_v17, %s3722_s6  ;;  %v2823_v17 = vmul.f32 %v5135_v42, %v2760_v3 }
 0x716   : >> { %2864 = vrot.lane.b32.xlu0 %v2816_v39, %s3722_s6 }
 0x71a   : >> { %v2744_v0 = vpop.permute.xlu1 %2743 }
 0x71b   : >> { %v2819_v13 = vmul.f32 %v5110_v16, %v2744_v0  ;;  %v2752_v38 = vpop.permute.xlu0 %2751  ;;  %v2826_v0 = vmul.f32 %v5150_v2, %v2772_v5 }
 0x71c   : >> { %v2821_v62 = vmul.f32 %v5130_v60, %v2752_v38 }
 0x71d   : >> { %2872 = vrot.lane.b32.xlu1 %v2820_v37, %s3722_s6 }
 0x71e   : >> { %2870 = vrot.lane.b32.xlu0 %v2819_v13, %s3722_s6  ;;  %2874 = vrot.lane.b32.xlu2 %v2821_v62, %s3722_s6  ;;  %v2784_v62 = vpop.permute.xlu2 %2783 }
 0x722   : >> { %v2756_v10 = vpop.permute.xlu1 %2755 }
 0x723   : >> { %v2822_v39 = vmul.f32 %v5125_v27, %v2756_v10  ;;  %v2764_v59 = vpop.permute.xlu0 %2763  ;;  %v2829_v10 = vmul.f32 %v5167_v55, %v2784_v62 }
 0x724   : >> { %v2824_v33 = vmul.f32 %v5145_v14, %v2764_v59 }
 0x725   : >> { %2878 = vrot.lane.b32.xlu1 %v2823_v17, %s3722_s6 }
 0x726   : >> { %2876 = vrot.lane.b32.xlu0 %v2822_v39, %s3722_s6  ;;  %2880 = vrot.lane.b32.xlu2 %v2824_v33, %s3722_s6  ;;  %v2796_v33 = vpop.permute.xlu2 %2795 }
 0x72a   : >> { %v2768_v37 = vpop.permute.xlu1 %2767 }
 0x72b   : >> { %v2825_v38 = vmul.f32 %v5140_v34, %v2768_v37  ;;  %v2776_v13 = vpop.permute.xlu0 %2775 }
 0x72c   : >> { %v2827_v3 = vmul.f32 %v5162_v58, %v2776_v13 }
 0x72d   : >> { %2884 = vrot.lane.b32.xlu1 %v2826_v0, %s3722_s6  ;;  %v2832_v0 = vmul.f32 %v5184_v21, %v2796_v33 }
 0x72e   : >> { %2882 = vrot.lane.b32.xlu0 %v2825_v38, %s3722_s6  ;;  %2886 = vrot.lane.b32.xlu2 %v2827_v3, %s3722_s6  ;;  %v2808_v3 = vpop.permute.xlu2 %2807 }
 0x732   : >> { %v2780_v59 = vpop.permute.xlu1 %2779 }
 0x733   : >> { %v2828_v17 = vmul.f32 %v5157_v22, %v2780_v59  ;;  %v2788_v39 = vpop.permute.xlu0 %2787 }
 0x734   : >> { %v2830_v5 = vmul.f32 %v5179_v8, %v2788_v39 }
 0x735   : >> { %2890 = vrot.lane.b32.xlu1 %v2829_v10, %s3722_s6  ;;  %v2835_v10 = vmul.f32 %v5201_v6, %v2808_v3  ;;  %v6494_v6 = vld [vmem:[#allocation123_spill] sm:$0xff] }
 0x736   : >> { %2888 = vrot.lane.b32.xlu0 %v2828_v17, %s3722_s6  ;;  %2892 = vrot.lane.b32.xlu2 %v2830_v5, %s3722_s6 }
 0x73a   : >> { %v2792_v37 = vpop.permute.xlu1 %2791 }
 0x73b   : >> { %v2831_v38 = vmul.f32 %v5174_v63, %v2792_v37  ;;  %v2800_v13 = vpop.permute.xlu0 %2799  ;;  %v6495_v37 = vld [vmem:[#allocation44_spill] sm:$0xff] }
 0x73c   : >> { %v2833_v62 = vmul.f32 %v5196_v30, %v2800_v13 }
 0x73d   : >> { %2896 = vrot.lane.b32.xlu1 %v2832_v0, %s3722_s6 }
 0x73e   : >> { %2894 = vrot.lane.b32.xlu0 %v2831_v38, %s3722_s6  ;;  %2898 = vrot.lane.b32.xlu2 %v2833_v62, %s3722_s6  ;;  %v6497_v62 = vld [vmem:[#allocation94_spill] sm:$0xff] }
 0x742   : >> { %v2804_v59 = vpop.permute.xlu1 %2803 }
 0x743   : >> { %v2834_v17 = vmul.f32 %v5191_v46, %v2804_v59  ;;  %v2812_v39 = vpop.permute.xlu0 %2811  ;;  %v3659_v59 = vld [vmem:[%s4307_s30 + $0x80] sm:$0xff] }
 0x744   : >> { %v2836_v5 = vmul.f32 %v5213_v19, %v2812_v39  ;;  %v6500_v39 = vld [vmem:[#allocation46_spill] sm:$0xff] }
 0x745   : >> { %2902 = vrot.lane.b32.xlu1 %v2835_v10, %s3722_s6  ;;  %v6498_v10 = vld [vmem:[#allocation21_spill] sm:$0xff] }
 0x746   : >> { %2900 = vrot.lane.b32.xlu0 %v2834_v17, %s3722_s6  ;;  %2904 = vrot.lane.b32.xlu2 %v2836_v5, %s3722_s6  ;;  %v6499_v17 = vld [vmem:[#allocation126_spill] sm:$0xff] }
 0x74d   : >> { %2954 = vrot.lane.b32.xlu1 %v5100_v45, %s3729_s9 }
 0x74e   : >> { %2952 = vrot.lane.b32.xlu0 %v5090_v47, %s3729_s9  ;;  %2956 = vrot.lane.b32.xlu2 %v5095_v12, %s3729_s9  ;;  %v3730_v47 = vmov 8  }
 0x74f   : >> { %3587 = vset.pattern.permute.xlu2 %v3730_v47  ;;  %3589 = vset.pattern.permute.xlu1 %v3730_v47 }
 0x750   : >> { %3588 = vset.pattern.permute.xlu0 %v3730_v47  ;;  %v5784_v12 = vpop.permute.xlu2 %2862  ;;  %v6501_v47 = vld [vmem:[#allocation59_spill] sm:$0xff] }
 0x755   : >> { %2960 = vrot.lane.b32.xlu1 %v5115_v11, %s3729_s9  ;;  %v6490_v11 = vld [vmem:[#allocation42_spill] sm:$0xff] }
 0x756   : >> { %2958 = vrot.lane.b32.xlu0 %v5105_v49, %s3729_s9  ;;  %2962 = vrot.lane.b32.xlu2 %v5110_v16, %s3729_s9  ;;  %v6489_v49 = vld [vmem:[#allocation17_spill] sm:$0xff] }
 0x757   : >> { %v911_v16 = vmul.f32 %v5145_v14, %v6489_v49 }
 0x758   : >> { %v5796_v45 = vpop.permute.xlu2 %2868 }
 0x75d   : >> { %2966 = vrot.lane.b32.xlu1 %v5130_v60, %s3729_s9 }
 0x75e   : >> { %2964 = vrot.lane.b32.xlu0 %v5120_v50, %s3729_s9  ;;  %2968 = vrot.lane.b32.xlu2 %v5125_v27, %s3729_s9  ;;  %v1166_v50 = vadd.f32 %v6490_v11, %v911_v16  ;;  %v6491_v27 = vld [vmem:[#allocation54_spill] sm:$0xff] }
 0x760   : >> { %v1396_v60 = vadd.f32 %v6491_v27, %v1166_v50 }
 0x765   : >> { %2972 = vrot.lane.b32.xlu1 %v5145_v14, %s3729_s9 }
 0x766   : >> { %2970 = vrot.lane.b32.xlu0 %v5135_v42, %s3729_s9  ;;  %2974 = vrot.lane.b32.xlu2 %v5140_v34, %s3729_s9  ;;  %v6492_v34 = vld [vmem:[#allocation89_spill] sm:$0xff] }
 0x76d   : >> { %2978 = vrot.lane.b32.xlu1 %v5162_v58, %s3729_s9 }
 0x76e   : >> { %2976 = vrot.lane.b32.xlu0 %v5150_v2, %s3729_s9  ;;  %2980 = vrot.lane.b32.xlu2 %v5157_v22, %s3729_s9  ;;  %v1743_v2 = vadd.f32 %v6492_v34, %v1396_v60  ;;  %v6493_v22 = vld [vmem:[#allocation19_spill] sm:$0xff] }
 0x76f   : >> { %v914_v14 = vmul.f32 %v5162_v58, %v6493_v22 }
 0x770   : >> { %v2065_v33 = vadd.f32 %v6494_v6, %v1743_v2  ;;  %v6503_v2 = vld [vmem:[#allocation23_spill] sm:$0xff] }
 0x772   : >> { %v2387_v0 = vadd.f32 %v5419_v44, %v2065_v33 }
 0x774   : >> { %v2709_v58 = vadd.f32 %v5702_v26, %v2387_v0  ;;  %v5837_v26 = vld [vmem:[%s4307_s30 + $0xa8] sm:$0xff] }
 0x775   : >> { %2984 = vrot.lane.b32.xlu1 %v5179_v8, %s3729_s9  ;;  %v1169_v8 = vadd.f32 %v6495_v37, %v914_v14  ;;  %v6504_v14 = vld [vmem:[#allocation128_spill] sm:$0xff] }
 0x776   : >> { %2982 = vrot.lane.b32.xlu0 %v5167_v55, %s3729_s9  ;;  %2986 = vrot.lane.b32.xlu2 %v5174_v63, %s3729_s9  ;;  %v6496_v55 = vld [vmem:[#allocation56_spill] sm:$0xff] }
 0x777   : >> { %v1399_v63 = vadd.f32 %v6496_v55, %v1169_v8 }
 0x778   : >> { %v5808_v42 = vpop.permute.xlu2 %2874 }
 0x779   : >> { %v1746_v3 = vadd.f32 %v6497_v62, %v1399_v63 }
 0x77d   : >> { %2990 = vrot.lane.b32.xlu1 %v5196_v30, %s3729_s9  ;;  %v917_v30 = vmul.f32 %v3659_v59, %v6498_v10  ;;  %v6508_v59 = vld [vmem:[#allocation25_spill] sm:$0xff]  ;;  %v6509_v10 = vld [vmem:[#allocation130_spill] sm:$0xff] }
 0x77e   : >> { %2988 = vrot.lane.b32.xlu0 %v5184_v21, %s3729_s9  ;;  %2992 = vrot.lane.b32.xlu2 %v5191_v46, %s3729_s9  ;;  %v2068_v21 = vadd.f32 %v6499_v17, %v1746_v3 }
 0x77f   : >> { %v5824_v38 = vpop.permute.xlu1 %2860  ;;  %v1172_v5 = vadd.f32 %v6500_v39, %v917_v30  ;;  %v6510_v30 = vld [vmem:[#allocation49_spill] sm:$0xff] }
 0x780   : >> { %v2881_v13 = vpop.permute.xlu2 %2880  ;;  %v2390_v46 = vadd.f32 %v5428_v36, %v2068_v21  ;;  %v6502_v36 = vld [vmem:[#allocation99_spill] sm:$0xff] }
 0x781   : >> { %v5827_v44 = vadd.f32 %v2881_v13, %v2709_v58  ;;  %v1402_v49 = vadd.f32 %v6501_v47, %v1172_v5  ;;  %v6507_v13 = vld [vmem:[#allocation104_spill] sm:$0xff] }
 0x782   : >> { %v2712_v16 = vadd.f32 %v5706_v28, %v2390_v46  ;;  %v6506_v28 = vld [vmem:[#allocation62_spill] sm:$0xff] }
 0x783   : >> { %v1749_v60 = vadd.f32 %v6502_v36, %v1402_v49  ;;  %v6512_v49 = vld [vmem:[#allocation108_spill] sm:$0xff] }
 0x785   : >> { %2996 = vrot.lane.b32.xlu1 %v5213_v19, %s3729_s9  ;;  %v3661_v19 = vld [vmem:[%s4307_s30 + $0x98] sm:$0xff]  ;;  %v2071_v6 = vadd.f32 %v6504_v14, %v1749_v60 }
 0x786   : >> { %2994 = vrot.lane.b32.xlu0 %v5837_v26, %s3729_s9  ;;  %3045 = vperm.xlu2 %3587, %v5580_v51   ;;  %v920_v22 = vmul.f32 %v3661_v19, %v6503_v2  ;;  %v6505_v51 = vld [vmem:[#allocation48_spill] sm:$0xff] }
 0x787   : >> { %v5844_v11 = vpop.permute.xlu1 %2866  ;;  %v2393_v37 = vadd.f32 %v5437_v23, %v2071_v6  ;;  %v3662_v23 = vld [vmem:[%s4307_s30 + $0xb0] sm:$0xff]  ;;  %v3664_v6 = vld [vmem:[%s4307_s30 + $0x88] sm:$0xff] }
 0x788   : >> { %v2887_v50 = vpop.permute.xlu2 %2886  ;;  %v5846_v27 = vpop.permute.xlu0 %2864  ;;  %v1175_v33 = vadd.f32 %v6505_v51, %v920_v22  ;;  %v3663_v2 = vld [vmem:[%s4307_s30 + $0x90] sm:$0xff]  ;;  %v6516_v51 = vld [vmem:[#allocation38_spill] sm:$0xff] }
 0x789   : >> { %v5849_v34 = vadd.f32 %v2887_v50, %v2712_v16  ;;  %v2715_v0 = vadd.f32 %v5712_v29, %v2393_v37  ;;  %v6511_v29 = vld [vmem:[#allocation65_spill] sm:$0xff]  ;;  %v6514_v22 = vld [vmem:[#allocation24_spill] sm:$0xff] }
 0x78a   : >> { %v1405_v8 = vadd.f32 %v6506_v28, %v1175_v33  ;;  %v919_v14 = vmul.f32 %v3663_v2, %v6514_v22  ;;  %v6517_v33 = vld [vmem:[#allocation45_spill] sm:$0xff]  ;;  %v6519_v28 = vld [vmem:[#allocation70_spill] sm:$0xff] }
 0x78b   : >> { %v6530_v2 = vld [vmem:[#allocation157_spill] sm:$0xff] }
 0x78c   : >> { %v1752_v62 = vadd.f32 %v6507_v13, %v1405_v8 }
 0x78d   : >> { %3053 = vperm.xlu1 %3589, %v5593_v20   ;;  %v923_v20 = vmul.f32 %v3662_v23, %v6508_v59  ;;  %v6521_v59 = vld [vmem:[#allocation98_spill] sm:$0xff] }
 0x78e   : >> { %3049 = vperm.xlu0 %3588, %v5585_v7   ;;  %3057 = vperm.xlu2 %3587, %v5589_v56   ;;  %v2074_v7 = vadd.f32 %v6509_v10, %v1752_v62  ;;  %v6522_v10 = vld [vmem:[#allocation26_spill] sm:$0xff] }
 0x78f   : >> { %v5861_v55 = vpop.permute.xlu1 %2872  ;;  %v1178_v56 = vadd.f32 %v6510_v30, %v923_v20 }
 0x790   : >> { %v2893_v63 = vpop.permute.xlu2 %2892  ;;  %v5863_v58 = vpop.permute.xlu0 %2870  ;;  %v2396_v17 = vadd.f32 %v5446_v43, %v2074_v7  ;;  %v6523_v7 = vld [vmem:[#allocation131_spill] sm:$0xff] }
 0x791   : >> { %v5866_v3 = vadd.f32 %v2893_v63, %v2715_v0  ;;  %v1408_v21 = vadd.f32 %v6511_v29, %v1178_v56  ;;  %v6520_v63 = vld [vmem:[#allocation84_spill] sm:$0xff] }
 0x792   : >> { %v2718_v39 = vadd.f32 %v5718_v4, %v2396_v17  ;;  %v6524_v56 = vld [vmem:[#allocation16_spill] sm:$0xff]  ;;  %v6525_v17 = vld [vmem:[#allocation121_spill] sm:$0xff] }
 0x793   : >> { %v1755_v16 = vadd.f32 %v6512_v49, %v1408_v21  ;;  %v6526_v21 = vld [vmem:[#allocation41_spill] sm:$0xff]  ;;  %v6527_v49 = vld [vmem:[#allocation47_spill] sm:$0xff] }
 0x795   : >> { %3061 = vperm.xlu1 %3589, %v5597_v18   ;;  %v6513_v18 = vld [vmem:[#allocation132_spill] sm:$0xff] }
 0x796   : >> { %3069 = vperm.xlu0 %3588, %v5609_v24   ;;  %3065 = vperm.xlu2 %3587, %v5601_v35   ;;  %v2077_v50 = vadd.f32 %v6513_v18, %v1755_v16 }
 0x797   : >> { %v5878_v5 = vpop.permute.xlu1 %2878 }
 0x798   : >> { %v2899_v46 = vpop.permute.xlu2 %2898  ;;  %v5880_v47 = vpop.permute.xlu0 %2876  ;;  %v2399_v24 = vadd.f32 %v5455_v54, %v2077_v50  ;;  %v6515_v54 = vld [vmem:[#allocation13_spill] sm:$0xff]  ;;  %v6528_v50 = vld [vmem:[#allocation71_spill] sm:$0xff] }
 0x799   : >> { %v5883_v43 = vadd.f32 %v2899_v46, %v2718_v39 }
 0x79a   : >> { %v2721_v35 = vadd.f32 %v5721_v41, %v2399_v24  ;;  %v6518_v41 = vld [vmem:[#allocation69_spill] sm:$0xff] }
 0x79d   : >> { %3073 = vperm.xlu1 %3589, %v5605_v53   ;;  %v918_v53 = vmul.f32 %v3664_v6, %v6515_v54 }
 0x79e   : >> { %3081 = vperm.xlu0 %3588, %v5623_v15   ;;  %3077 = vperm.xlu2 %3587, %v5613_v1   ;;  %v1174_v15 = vadd.f32 %v6516_v51, %v919_v14 }
 0x79f   : >> { %v5891_v4 = vpop.permute.xlu1 %2884  ;;  %v1173_v1 = vadd.f32 %v6517_v33, %v918_v53 }
 0x7a0   : >> { %v2905_v36 = vpop.permute.xlu2 %2904  ;;  %v5893_v60 = vpop.permute.xlu0 %2882  ;;  %v1404_v37 = vadd.f32 %v6518_v41, %v1174_v15 }
 0x7a1   : >> { %v5895_v19 = vadd.f32 %v2905_v36, %v2721_v35  ;;  %v1403_v8 = vadd.f32 %v6519_v28, %v1173_v1  ;;  %v6529_v35 = vld [vmem:[#allocation72_spill] sm:$0xff] }
 0x7a2   : >> { %v1751_v13 = vadd.f32 %v6520_v63, %v1404_v37  ;;  %v6536_v37 = vld [vmem:[#allocation97_spill] sm:$0xff]  ;;  %v6538_v63 = vld [vmem:[#allocation155_spill] sm:$0xff] }
 0x7a3   : >> { %v1750_v20 = vadd.f32 %v6521_v59, %v1403_v8  ;;  %v6537_v8 = vld [vmem:[#allocation102_spill] sm:$0xff]  ;;  %v6539_v59 = vld [vmem:[#allocation109_spill] sm:$0xff] }
 0x7a4   : >> { %v2073_v30 = vadd.f32 %v6523_v7, %v1751_v13 }
 0x7a5   : >> { %3085 = vperm.xlu1 %3589, %v5619_v31   ;;  %v922_v31 = vmul.f32 %v5837_v26, %v6522_v10  ;;  %v2072_v29 = vadd.f32 %v6525_v17, %v1750_v20  ;;  %v6540_v20 = vld [vmem:[#allocation101_spill] sm:$0xff]  ;;  %v6541_v10 = vld [vmem:[#allocation158_spill] sm:$0xff]  ;;  %v6542_v17 = vld [vmem:[#allocation107_spill] sm:$0xff] }
 0x7a6   : >> { %3093 = vperm.xlu0 %3588, %v5635_v61   ;;  %3089 = vperm.xlu2 %3587, %v5627_v9   ;;  %v3665_v61 = vld [vmem:[%s4307_s30 + $0xa0] sm:$0xff]  ;;  %v2395_v46 = vadd.f32 %v5469_v25, %v2073_v30  ;;  %v6531_v25 = vld [vmem:[#allocation88_spill] sm:$0xff] }
 0x7a7   : >> { %v5908_v0 = vpop.permute.xlu1 %2890  ;;  %v921_v9 = vmul.f32 %v3665_v61, %v6524_v56  ;;  %v1177_v39 = vadd.f32 %v6526_v21, %v922_v31  ;;  %v2394_v18 = vadd.f32 %v5471_v48, %v2072_v29  ;;  %v6543_v29 = vld [vmem:[#allocation145_spill] sm:$0xff]  ;;  %v6544_v21 = vld [vmem:[#allocation110_spill] sm:$0xff] }
 0x7a8   : >> { %v5911_v62 = vpop.permute.xlu2 %2956  ;;  %v5913_v23 = vpop.permute.xlu0 %2888  ;;  %v2717_v26 = vadd.f32 %v5694_v32, %v2395_v46  ;;  %v6533_v32 = vld [vmem:[#allocation133_spill] sm:$0xff] }
 0x7a9   : >> { %v1176_v16 = vadd.f32 %v6527_v49, %v921_v9  ;;  %v1407_v24 = vadd.f32 %v6528_v50, %v1177_v39  ;;  %v2716_v22 = vadd.f32 %v6530_v2, %v2394_v18 }
 0x7ab   : >> { %v1406_v36 = vadd.f32 %v6529_v35, %v1176_v16  ;;  %v1754_v6 = vadd.f32 %v6531_v25, %v1407_v24  ;;  %v6545_v16 = vld [vmem:[#allocation144_spill] sm:$0xff] }
 0x7ad   : >> { %3097 = vperm.xlu1 %3589, %v5631_v40   ;;  %v6532_v40 = vld [vmem:[#allocation103_spill] sm:$0xff]  ;;  %v2076_v33 = vadd.f32 %v6533_v32, %v1754_v6 }
 0x7ae   : >> { %3105 = vperm.xlu0 %3588, %v5649_v52   ;;  %3101 = vperm.xlu2 %3587, %v5641_v57   ;;  %v1753_v51 = vadd.f32 %v6532_v40, %v1406_v36  ;;  %v6534_v52 = vld [vmem:[#allocation124_spill] sm:$0xff]  ;;  %v6535_v57 = vld [vmem:[#allocation91_spill] sm:$0xff] }
 0x7af   : >> { %v2897_v14 = vpop.permute.xlu1 %2896  ;;  %v2398_v41 = vadd.f32 %v6535_v57, %v2076_v33  ;;  %v6558_v6 = vld [vmem:[#allocation119_spill] sm:$0xff] }
 0x7b0   : >> { %v5934_v54 = vadd.f32 %v2897_v14, %v2717_v26  ;;  %v2963_v48 = vpop.permute.xlu2 %2962  ;;  %v2895_v53 = vpop.permute.xlu0 %2894  ;;  %v2075_v1 = vadd.f32 %v6534_v52, %v1753_v51 }
 0x7b1   : >> { %v5937_v15 = vadd.f32 %v2895_v53, %v2716_v22  ;;  %v2720_v13 = vadd.f32 %v6538_v63, %v2398_v41 }
 0x7b2   : >> { %v2397_v28 = vadd.f32 %v6536_v37, %v2075_v1 }
 0x7b4   : >> { %v2719_v31 = vadd.f32 %v6541_v10, %v2397_v28 }
 0x7b5   : >> { %3109 = vperm.xlu1 %3589, %v6537_v8  }
 0x7b6   : >> { %3117 = vperm.xlu0 %3588, %v6539_v59   ;;  %3113 = vperm.xlu2 %3587, %v6540_v20   ;;  %v3023_v59 = vsel %vm730_vm9, %v5911_v62, 0.0 }
 0x7b7   : >> { %v2903_v7 = vpop.permute.xlu1 %2902 }
 0x7b8   : >> { %v5948_v30 = vadd.f32 %v2903_v7, %v2720_v13  ;;  %v2969_v61 = vpop.permute.xlu2 %2968  ;;  %v2901_v56 = vpop.permute.xlu0 %2900 }
 0x7b9   : >> { %v5950_v9 = vadd.f32 %v2901_v56, %v2719_v31 }
 0x7bd   : >> { %3121 = vperm.xlu1 %3589, %v6542_v17  }
 0x7be   : >> { %3129 = vperm.xlu0 %3588, %v6543_v29   ;;  %3125 = vperm.xlu2 %3587, %v6544_v21   ;;  %v3026_v29 = vsel %vm730_vm9, %v2963_v48, 0.0  ;;  %v3029_v48 = vsel %vm730_vm9, %v2969_v61, 0.0 }
 0x7bf   : >> { %v2955_v39 = vpop.permute.xlu1 %2954 }
 0x7c0   : >> { %v2975_v46 = vpop.permute.xlu2 %2974  ;;  %v2953_v49 = vpop.permute.xlu0 %2952  ;;  %v3022_v10 = vsel %vm730_vm9, %v2955_v39, 0.0 }
 0x7c1   : >> { %v3021_v53 = vsel %vm730_vm9, %v2953_v49, 0.0  ;;  %v3032_v61 = vsel %vm730_vm9, %v2975_v46, 0.0 }
 0x7c5   : >> { %3133 = vperm.xlu1 %3589, %v6545_v16  }
 0x7c7   : >> { %v2961_v18 = vpop.permute.xlu1 %2960 }
 0x7c8   : >> { %v5956_v50 = vpop.permute.xlu2 %2980  ;;  %v2959_v24 = vpop.permute.xlu0 %2958  ;;  %v3025_v21 = vsel %vm730_vm9, %v2961_v18, 0.0 }
 0x7c9   : >> { %v3024_v52 = vsel %vm730_vm9, %v2959_v24, 0.0  ;;  %v3035_v46 = vsel %vm730_vm9, %v5956_v50, 0.0 }
 0x7cf   : >> { %v2967_v26 = vpop.permute.xlu1 %2966 }
 0x7d0   : >> { %v5958_v35 = vpop.permute.xlu2 %2986  ;;  %v2965_v36 = vpop.permute.xlu0 %2964  ;;  %v3028_v18 = vsel %vm730_vm9, %v2967_v26, 0.0 }
 0x7d1   : >> { %v3027_v62 = vsel %vm730_vm9, %v2965_v36, 0.0  ;;  %v3038_v50 = vsel %vm730_vm9, %v5958_v35, 0.0 }
 0x7d7   : >> { %v2973_v2 = vpop.permute.xlu1 %2972 }
 0x7d8   : >> { %v5960_v22 = vpop.permute.xlu2 %2992  ;;  %v2971_v14 = vpop.permute.xlu0 %2970  ;;  %v3031_v26 = vsel %vm730_vm9, %v2973_v2, 0.0 }
 0x7d9   : >> { %v3030_v36 = vsel %vm730_vm9, %v2971_v14, 0.0 }
 0x7df   : >> { %v2979_v25 = vpop.permute.xlu1 %2978 }
 0x7e0   : >> { %v3046_v40 = vpop.permute.xlu2 %3045  ;;  %v2977_v51 = vpop.permute.xlu0 %2976  ;;  %v3034_v2 = vsel %vm730_vm9, %v2979_v25, 0.0 }
 0x7e1   : >> { %v3136_v32 = vmul.f32 %v3046_v40, %v3021_v53  ;;  %v3033_v14 = vsel %vm730_vm9, %v2977_v51, 0.0 }
 0x7e3   : >> { %3182 = vrot.lane.b32.xlu2 %v3136_v32, %s3717_s3 }
 0x7e7   : >> { %v5965_v33 = vpop.permute.xlu1 %2984 }
 0x7e8   : >> { %v3058_v1 = vpop.permute.xlu2 %3057  ;;  %v2983_v57 = vpop.permute.xlu0 %2982  ;;  %v3037_v25 = vsel %vm730_vm9, %v5965_v33, 0.0 }
 0x7e9   : >> { %v3139_v41 = vmul.f32 %v3058_v1, %v3024_v52  ;;  %v3036_v51 = vsel %vm730_vm9, %v2983_v57, 0.0 }
 0x7eb   : >> { %3188 = vrot.lane.b32.xlu2 %v3139_v41, %s3717_s3 }
 0x7ef   : >> { %v5970_v37 = vpop.permute.xlu1 %2990 }
 0x7f0   : >> { %v5972_v28 = vpop.permute.xlu0 %2988  ;;  %v3066_v13 = vpop.permute.xlu2 %3065 }
 0x7f1   : >> { %v3141_v16 = vmul.f32 %v3066_v13, %v3026_v29 }
 0x7f7   : >> { %v5974_v8 = vpop.permute.xlu1 %2996 }
 0x7f8   : >> { %v5976_v63 = vpop.permute.xlu0 %2994  ;;  %v3078_v17 = vpop.permute.xlu2 %3077 }
 0x7f9   : >> { %v3144_v52 = vmul.f32 %v3078_v17, %v3029_v48 }
 0x7ff   : >> { %v3054_v20 = vpop.permute.xlu1 %3053 }
 0x800   : >> { %v3138_v31 = vmul.f32 %v3054_v20, %v3023_v59  ;;  %v3050_v7 = vpop.permute.xlu0 %3049  ;;  %v3090_v40 = vpop.permute.xlu2 %3089 }
 0x801   : >> { %v3137_v56 = vmul.f32 %v3050_v7, %v3022_v10  ;;  %v3147_v20 = vmul.f32 %v3090_v40, %v3032_v61  ;;  %v3666_v40 = vld [vmem:[%s4307_s30] sm:$0xff] }
 0x802   : >> { %3186 = vrot.lane.b32.xlu1 %v3138_v31, %s3717_s3 }
 0x803   : >> { %3184 = vrot.lane.b32.xlu0 %v3137_v56, %s3717_s3 }
 0x807   : >> { %v3062_v49 = vpop.permute.xlu1 %3061 }
 0x808   : >> { %v3140_v39 = vmul.f32 %v3062_v49, %v3025_v21  ;;  %v3070_v24 = vpop.permute.xlu0 %3069  ;;  %v3102_v7 = vpop.permute.xlu2 %3101 }
 0x809   : >> { %v3142_v53 = vmul.f32 %v3070_v24, %v3027_v62  ;;  %v3150_v29 = vmul.f32 %v3102_v7, %v3035_v46  ;;  %v6551_v7 = vld [vmem:[#allocation11_spill] sm:$0xff]  ;;  %v6552_v46 = vld [vmem:[#allocation116_spill] sm:$0xff] }
 0x80a   : >> { %3192 = vrot.lane.b32.xlu1 %v3141_v16, %s3717_s3 }
 0x80b   : >> { %3190 = vrot.lane.b32.xlu0 %v3140_v39, %s3717_s3  ;;  %3194 = vrot.lane.b32.xlu2 %v3142_v53, %s3717_s3  ;;  %v3039_v39 = vsel %vm730_vm9, %v5972_v28, 0.0  ;;  %v3040_v28 = vsel %vm730_vm9, %v5970_v37, 0.0 }
 0x80f   : >> { %v3074_v32 = vpop.permute.xlu1 %3073 }
 0x810   : >> { %v3143_v1 = vmul.f32 %v3074_v32, %v3028_v18  ;;  %v3082_v41 = vpop.permute.xlu0 %3081  ;;  %v3114_v16 = vpop.permute.xlu2 %3113  ;;  %v6547_v32 = vld [vmem:[#allocation9_spill] sm:$0xff] }
 0x811   : >> { %v3145_v13 = vmul.f32 %v3082_v41, %v3030_v36  ;;  %v3153_v24 = vmul.f32 %v3114_v16, %v3038_v50  ;;  %v901_v33 = vmul.f32 %v3666_v40, %v6547_v32  ;;  %v3041_v36 = vsel %vm730_vm9, %v5960_v22, 0.0  ;;  %v6550_v22 = vld [vmem:[#allocation73_spill] sm:$0xff]  ;;  %v6555_v16 = vld [vmem:[#allocation55_spill] sm:$0xff]  ;;  %v6560_v32 = vld [vmem:[#allocation96_spill] sm:$0xff] }
 0x812   : >> { %3198 = vrot.lane.b32.xlu1 %v3144_v52, %s3717_s3 }
 0x813   : >> { %3196 = vrot.lane.b32.xlu0 %v3143_v1, %s3717_s3  ;;  %3200 = vrot.lane.b32.xlu2 %v3145_v13, %s3717_s3  ;;  %v6548_v1 = vld [vmem:[#allocation27_spill] sm:$0xff]  ;;  %v3042_v13 = vsel %vm730_vm9, %v5976_v63, 0.0  ;;  %v3043_v63 = vsel %vm730_vm9, %v5974_v8, 0.0 }
 0x814   : >> { %v1156_v41 = vadd.f32 %v6548_v1, %v901_v33  ;;  %v6561_v1 = vld [vmem:[#allocation15_spill] sm:$0xff] }
 0x817   : >> { %v3086_v59 = vpop.permute.xlu1 %3085 }
 0x818   : >> { %v3146_v10 = vmul.f32 %v3086_v59, %v3031_v26  ;;  %v3094_v31 = vpop.permute.xlu0 %3093  ;;  %v3126_v35 = vpop.permute.xlu2 %3125 }
 0x819   : >> { %v3148_v56 = vmul.f32 %v3094_v31, %v3033_v14  ;;  %v3156_v61 = vmul.f32 %v3126_v35, %v3041_v36  ;;  %v3667_v31 = vld [vmem:[%s4307_s30 + $0x18] sm:$0xff]  ;;  %v6559_v35 = vld [vmem:[#allocation138_spill] sm:$0xff] }
 0x81a   : >> { %3204 = vrot.lane.b32.xlu1 %v3147_v20, %s3717_s3  ;;  %v6549_v20 = vld [vmem:[#allocation53_spill] sm:$0xff] }
 0x81b   : >> { %3202 = vrot.lane.b32.xlu0 %v3146_v10, %s3717_s3  ;;  %3206 = vrot.lane.b32.xlu2 %v3148_v56, %s3717_s3  ;;  %v1386_v10 = vadd.f32 %v6549_v20, %v1156_v41  ;;  %v904_v56 = vmul.f32 %v3667_v31, %v6551_v7  ;;  %v6567_v7 = vld [vmem:[#allocation30_spill] sm:$0xff] }
 0x81d   : >> { %v1733_v37 = vadd.f32 %v6550_v22, %v1386_v10  ;;  %v3669_v10 = vld [vmem:[%s4307_s30 + $0x48] sm:$0xff]  ;;  %v6565_v22 = vld [vmem:[#allocation18_spill] sm:$0xff] }
 0x81f   : >> { %v3098_v17 = vpop.permute.xlu1 %3097 }
 0x820   : >> { %v3149_v21 = vmul.f32 %v3098_v17, %v3034_v2  ;;  %v3106_v49 = vpop.permute.xlu0 %3105  ;;  %v2055_v2 = vadd.f32 %v6552_v46, %v1733_v37  ;;  %v910_v37 = vmul.f32 %v3669_v10, %v6565_v22  ;;  %v6568_v46 = vld [vmem:[#allocation140_spill] sm:$0xff]  ;;  %v6584_v22 = vld [vmem:[#allocation77_spill] sm:$0xff] }
 0x821   : >> { %v3151_v62 = vmul.f32 %v3106_v49, %v3036_v51  ;;  %v6553_v51 = vld [vmem:[#allocation28_spill] sm:$0xff] }
 0x822   : >> { %3210 = vrot.lane.b32.xlu1 %v3150_v29, %s3717_s3  ;;  %v1159_v29 = vadd.f32 %v6553_v51, %v904_v56  ;;  %v1165_v56 = vadd.f32 %v6567_v7, %v910_v37  ;;  %v6570_v51 = vld [vmem:[#allocation105_spill] sm:$0xff]  ;;  %v6586_v7 = vld [vmem:[#allocation79_spill] sm:$0xff] }
 0x823   : >> { %3208 = vrot.lane.b32.xlu0 %v3149_v21, %s3717_s3  ;;  %3212 = vrot.lane.b32.xlu2 %v3151_v62, %s3717_s3  ;;  %v6554_v21 = vld [vmem:[#allocation137_spill] sm:$0xff] }
 0x824   : >> { %v2377_v49 = vadd.f32 %v6554_v21, %v2055_v2  ;;  %v1389_v50 = vadd.f32 %v6555_v16, %v1159_v29  ;;  %v6571_v21 = vld [vmem:[#allocation76_spill] sm:$0xff] }
 0x825   : >> { %v3670_v16 = vld [vmem:[%s4307_s30 + $0x10] sm:$0xff] }
 0x827   : >> { %v3110_v57 = vpop.permute.xlu1 %3109 }
 0x828   : >> { %v3152_v53 = vmul.f32 %v3110_v57, %v3037_v25  ;;  %v3118_v48 = vpop.permute.xlu0 %3117  ;;  %v6556_v25 = vld [vmem:[#allocation100_spill] sm:$0xff] }
 0x829   : >> { %v3154_v18 = vmul.f32 %v3118_v48, %v3039_v39  ;;  %v2699_v57 = vadd.f32 %v6556_v25, %v2377_v49  ;;  %v6557_v39 = vld [vmem:[#allocation74_spill] sm:$0xff] }
 0x82a   : >> { %3216 = vrot.lane.b32.xlu1 %v3153_v24, %s3717_s3  ;;  %v1736_v24 = vadd.f32 %v6557_v39, %v1389_v50  ;;  %v6572_v50 = vld [vmem:[#allocation8_spill] sm:$0xff]  ;;  %v3671_v39 = vld [vmem:[%s4307_s30 + $0x8] sm:$0xff] }
 0x82b   : >> { %3214 = vrot.lane.b32.xlu0 %v3152_v53, %s3717_s3  ;;  %3218 = vrot.lane.b32.xlu2 %v3154_v18, %s3717_s3  ;;  %v2929_v53 = vadd.f32 %v5824_v38, %v2699_v57  ;;  %v3668_v38 = vld [vmem:[%s4307_s30 + $0x30] sm:$0xff]  ;;  %v903_v25 = vmul.f32 %v3670_v16, %v6572_v50  ;;  %v3675_v50 = vld [vmem:[%s4307_s30 + $0x78] sm:$0xff] }
 0x82c   : >> { %v2058_v8 = vadd.f32 %v6558_v6, %v1736_v24  ;;  %v907_v41 = vmul.f32 %v3668_v38, %v6561_v1  ;;  %v6573_v24 = vld [vmem:[#allocation12_spill] sm:$0xff]  ;;  %v6579_v38 = vld [vmem:[#allocation142_spill] sm:$0xff] }
 0x82d   : >> { %v6574_v6 = vld [vmem:[#allocation20_spill] sm:$0xff] }
 0x82e   : >> { %v2380_v40 = vadd.f32 %v6559_v35, %v2058_v8 }
 0x82f   : >> { %v3122_v52 = vpop.permute.xlu1 %3121 }
 0x830   : >> { %v3155_v26 = vmul.f32 %v3122_v52, %v3040_v28  ;;  %v3130_v59 = vpop.permute.xlu0 %3129  ;;  %v2702_v33 = vadd.f32 %v6560_v32, %v2380_v40  ;;  %v6576_v32 = vld [vmem:[#allocation31_spill] sm:$0xff] }
 0x831   : >> { %v3157_v14 = vmul.f32 %v3130_v59, %v3042_v13  ;;  %v6562_v13 = vld [vmem:[#allocation29_spill] sm:$0xff] }
 0x832   : >> { %3222 = vrot.lane.b32.xlu1 %v3156_v61, %s3717_s3  ;;  %v2932_v36 = vadd.f32 %v5844_v11, %v2702_v33  ;;  %v1162_v61 = vadd.f32 %v6562_v13, %v907_v41  ;;  %v6566_v11 = vld [vmem:[#allocation122_spill] sm:$0xff]  ;;  %v1158_v33 = vadd.f32 %v6576_v32, %v903_v25  ;;  %v6580_v41 = vld [vmem:[#allocation57_spill] sm:$0xff] }
 0x833   : >> { %3220 = vrot.lane.b32.xlu0 %v3155_v26, %s3717_s3  ;;  %3224 = vrot.lane.b32.xlu2 %v3157_v14, %s3717_s3  ;;  %v6563_v26 = vld [vmem:[#allocation58_spill] sm:$0xff]  ;;  %v6564_v14 = vld [vmem:[#allocation75_spill] sm:$0xff] }
 0x834   : >> { %v1392_v59 = vadd.f32 %v6563_v26, %v1162_v61  ;;  %v1388_v13 = vadd.f32 %v6580_v41, %v1158_v33  ;;  %v6581_v61 = vld [vmem:[#allocation50_spill] sm:$0xff]  ;;  %v6596_v33 = vld [vmem:[#allocation36_spill] sm:$0xff] }
 0x835   : >> { %v6590_v25 = vld [vmem:[#allocation22_spill] sm:$0xff] }
 0x836   : >> { %v1739_v20 = vadd.f32 %v6564_v14, %v1392_v59  ;;  %v6582_v59 = vld [vmem:[#allocation64_spill] sm:$0xff]  ;;  %v1735_v37 = vadd.f32 %v6584_v22, %v1388_v13  ;;  %v6600_v13 = vld [vmem:[#allocation146_spill] sm:$0xff] }
 0x837   : >> { %v3134_v17 = vpop.permute.xlu1 %3133 }
 0x838   : >> { %v3158_v62 = vmul.f32 %v3134_v17, %v3043_v63  ;;  %v2061_v31 = vadd.f32 %v6566_v11, %v1739_v20  ;;  %v6569_v63 = vld [vmem:[#allocation61_spill] sm:$0xff]  ;;  %v6583_v20 = vld [vmem:[#allocation106_spill] sm:$0xff] }
 0x839   : >> { %v1395_v17 = vadd.f32 %v6569_v63, %v1165_v56  ;;  %v6585_v11 = vld [vmem:[#allocation78_spill] sm:$0xff]  ;;  %v6587_v63 = vld [vmem:[#allocation4_spill] sm:$0xff] }
 0x83a   : >> { %v2383_v2 = vadd.f32 %v6568_v46, %v2061_v31 }
 0x83b   : >> { %3226 = vrot.lane.b32.xlu0 %v3158_v62, %s3717_s3  ;;  %v1742_v49 = vadd.f32 %v6571_v21, %v1395_v17 }
 0x83c   : >> { %v2705_v29 = vadd.f32 %v6570_v51, %v2383_v2  ;;  %v3673_v2 = vld [vmem:[%s4307_s30 + $0x20] sm:$0xff]  ;;  %v3674_v51 = vld [vmem:[%s4307_s30 + $0x28] sm:$0xff] }
 0x83d   : >> { %v3183_v48 = vpop.permute.xlu2 %3182  ;;  %v905_v17 = vmul.f32 %v3673_v2, %v6587_v63  ;;  %v6607_v63 = vld [vmem:[#allocation82_spill] sm:$0xff] }
 0x83e   : >> { %v3251_v18 = vadd.f32 %v3183_v48, %v2929_v53  ;;  %v2935_v62 = vadd.f32 %v5861_v55, %v2705_v29  ;;  %v902_v53 = vmul.f32 %v3671_v39, %v6573_v24  ;;  %v3672_v48 = vld [vmem:[%s4307_s30 + $0x60] sm:$0xff]  ;;  %v6578_v55 = vld [vmem:[#allocation33_spill] sm:$0xff] }
 0x83f   : >> { %v913_v8 = vmul.f32 %v3672_v48, %v6574_v6  ;;  %v6588_v29 = vld [vmem:[#allocation5_spill] sm:$0xff]  ;;  %v6591_v39 = vld [vmem:[#allocation114_spill] sm:$0xff] }
 0x840   : >> { %3297 = vrot.lane.b32.xlu1 %v3251_v18, %s3731_s13  ;;  %v6575_v18 = vld [vmem:[#allocation125_spill] sm:$0xff]  ;;  %v906_v21 = vmul.f32 %v3674_v51, %v6588_v29 }
 0x841   : >> { %v2064_v35 = vadd.f32 %v6575_v18, %v1742_v49  ;;  %v6589_v49 = vld [vmem:[#allocation111_spill] sm:$0xff] }
 0x843   : >> { %v2386_v1 = vadd.f32 %v6579_v38, %v2064_v35 }
 0x845   : >> { %v3189_v28 = vpop.permute.xlu2 %3188  ;;  %v2708_v10 = vadd.f32 %v6583_v20, %v2386_v1  ;;  %v6599_v1 = vld [vmem:[#allocation60_spill] sm:$0xff] }
 0x846   : >> { %v3254_v52 = vadd.f32 %v3189_v28, %v2932_v36  ;;  %v6577_v36 = vld [vmem:[#allocation32_spill] sm:$0xff] }
 0x847   : >> { %v1168_v28 = vadd.f32 %v6577_v36, %v913_v8  ;;  %v2938_v46 = vadd.f32 %v5878_v5, %v2708_v10  ;;  %v6593_v8 = vld [vmem:[#allocation34_spill] sm:$0xff]  ;;  %v6594_v5 = vld [vmem:[#allocation139_spill] sm:$0xff]  ;;  %v1160_v36 = vadd.f32 %v6596_v33, %v905_v17 }
 0x848   : >> { %3303 = vrot.lane.b32.xlu1 %v3254_v52, %s3731_s13  ;;  %v1157_v52 = vadd.f32 %v6578_v55, %v902_v53  ;;  %v6592_v53 = vld [vmem:[#allocation127_spill] sm:$0xff]  ;;  %v1161_v18 = vadd.f32 %v6593_v8, %v906_v21 }
 0x849   : >> { %v1398_v14 = vadd.f32 %v6582_v59, %v1168_v28  ;;  %v6597_v28 = vld [vmem:[#allocation134_spill] sm:$0xff]  ;;  %v6603_v10 = vld [vmem:[#allocation147_spill] sm:$0xff] }
 0x84a   : >> { %v1387_v26 = vadd.f32 %v6581_v61, %v1157_v52  ;;  %v6598_v52 = vld [vmem:[#allocation90_spill] sm:$0xff]  ;;  %v1391_v41 = vadd.f32 %v6599_v1, %v1161_v18  ;;  %v6612_v18 = vld [vmem:[#allocation129_spill] sm:$0xff] }
 0x84b   : >> { %v1745_v31 = vadd.f32 %v6585_v11, %v1398_v14  ;;  %v6602_v14 = vld [vmem:[#allocation67_spill] sm:$0xff] }
 0x84c   : >> { %v1734_v56 = vadd.f32 %v6586_v7, %v1387_v26  ;;  %v6601_v26 = vld [vmem:[#allocation51_spill] sm:$0xff] }
 0x84d   : >> { %v2067_v48 = vadd.f32 %v6592_v53, %v1745_v31  ;;  %v1390_v59 = vadd.f32 %v6601_v26, %v1160_v36  ;;  %v6605_v31 = vld [vmem:[#allocation80_spill] sm:$0xff]  ;;  %v6615_v36 = vld [vmem:[#allocation39_spill] sm:$0xff] }
 0x84e   : >> { %v2056_v24 = vadd.f32 %v6591_v39, %v1734_v56  ;;  %v1738_v7 = vadd.f32 %v6605_v31, %v1391_v41  ;;  %v6610_v39 = vld [vmem:[#allocation112_spill] sm:$0xff]  ;;  %v6618_v41 = vld [vmem:[#allocation63_spill] sm:$0xff] }
 0x84f   : >> { %v2389_v38 = vadd.f32 %v6598_v52, %v2067_v48  ;;  %v1737_v17 = vadd.f32 %v6607_v63, %v1390_v59  ;;  %v6620_v59 = vld [vmem:[#allocation52_spill] sm:$0xff] }
 0x850   : >> { %v2378_v55 = vadd.f32 %v6597_v28, %v2056_v24  ;;  %v2060_v24 = vadd.f32 %v6610_v39, %v1738_v7 }
 0x851   : >> { %v2711_v22 = vadd.f32 %v6603_v10, %v2389_v38  ;;  %v6617_v38 = vld [vmem:[#allocation92_spill] sm:$0xff] }
 0x853   : >> { %v2941_v29 = vadd.f32 %v5891_v4, %v2711_v22  ;;  %v6622_v22 = vld [vmem:[#allocation151_spill] sm:$0xff] }
 0x865   : >> { %v3195_v57 = vpop.permute.xlu2 %3194 }
 0x866   : >> { %v3257_v40 = vadd.f32 %v3195_v57, %v2935_v62  ;;  %v2057_v62 = vadd.f32 %v6589_v49, %v1735_v37  ;;  %v916_v57 = vmul.f32 %v3675_v50, %v6590_v25  ;;  %v6604_v37 = vld [vmem:[#allocation148_spill] sm:$0xff]  ;;  %v3676_v49 = vld [vmem:[%s4307_s30 + $0x40] sm:$0xff]  ;;  %v3677_v50 = vld [vmem:[%s4307_s30 + $0x38] sm:$0xff] }
 0x867   : >> { %v2700_v11 = vadd.f32 %v6604_v37, %v2378_v55  ;;  %v6609_v25 = vld [vmem:[#allocation14_spill] sm:$0xff]  ;;  %v6616_v55 = vld [vmem:[#allocation135_spill] sm:$0xff] }
 0x868   : >> { %3309 = vrot.lane.b32.xlu1 %v3257_v40, %s3731_s13  ;;  %v2379_v35 = vadd.f32 %v6594_v5, %v2057_v62  ;;  %v6595_v40 = vld [vmem:[#allocation35_spill] sm:$0xff]  ;;  %v6608_v62 = vld [vmem:[#allocation6_spill] sm:$0xff] }
 0x869   : >> { %v1171_v32 = vadd.f32 %v6595_v40, %v916_v57  ;;  %v2930_v51 = vadd.f32 %v5784_v12, %v2700_v11  ;;  %v908_v57 = vmul.f32 %v3677_v50, %v6609_v25  ;;  %v6613_v40 = vld [vmem:[#allocation37_spill] sm:$0xff]  ;;  %v6623_v11 = vld [vmem:[#allocation83_spill] sm:$0xff] }
 0x86a   : >> { %v2701_v61 = vadd.f32 %v6600_v13, %v2379_v35 }
 0x86b   : >> { %v1401_v20 = vadd.f32 %v6602_v14, %v1171_v32  ;;  %v6614_v32 = vld [vmem:[#allocation141_spill] sm:$0xff]  ;;  %v1163_v28 = vadd.f32 %v6615_v36, %v908_v57  ;;  %v6627_v57 = vld [vmem:[#allocation120_spill] sm:$0xff] }
 0x86c   : >> { %v2931_v56 = vadd.f32 %v5846_v27, %v2701_v61  ;;  %v2382_v33 = vadd.f32 %v6614_v32, %v2060_v24  ;;  %v6619_v61 = vld [vmem:[#allocation149_spill] sm:$0xff] }
 0x86d   : >> { %v3201_v16 = vpop.permute.xlu2 %3200  ;;  %v1393_v14 = vadd.f32 %v6620_v59, %v1163_v28 }
 0x86e   : >> { %v3260_v6 = vadd.f32 %v3201_v16, %v2938_v46  ;;  %v6606_v46 = vld [vmem:[#allocation81_spill] sm:$0xff]  ;;  %v909_v16 = vmul.f32 %v3676_v49, %v6608_v62  ;;  %v2704_v26 = vadd.f32 %v6619_v61, %v2382_v33 }
 0x86f   : >> { %v1748_v2 = vadd.f32 %v6606_v46, %v1401_v20  ;;  %v6621_v20 = vld [vmem:[#allocation150_spill] sm:$0xff]  ;;  %v6626_v49 = vld [vmem:[#allocation113_spill] sm:$0xff] }
 0x870   : >> { %3315 = vrot.lane.b32.xlu1 %v3260_v6, %s3731_s13  ;;  %v6611_v6 = vld [vmem:[#allocation117_spill] sm:$0xff]  ;;  %v1164_v4 = vadd.f32 %v6613_v40, %v909_v16  ;;  %v2934_v7 = vadd.f32 %v5863_v58, %v2704_v26 }
 0x871   : >> { %v2059_v8 = vadd.f32 %v6611_v6, %v1737_v17  ;;  %v2070_v5 = vadd.f32 %v6612_v18, %v1748_v2 }
 0x872   : >> { %v1394_v13 = vadd.f32 %v6618_v41, %v1164_v4  ;;  %v6634_v4 = vld [vmem:[#allocation87_spill] sm:$0xff] }
 0x873   : >> { %v2381_v52 = vadd.f32 %v6616_v55, %v2059_v8  ;;  %v2392_v1 = vadd.f32 %v6617_v38, %v2070_v5  ;;  %v6631_v8 = vld [vmem:[#allocation66_spill] sm:$0xff]  ;;  %v6632_v5 = vld [vmem:[#allocation152_spill] sm:$0xff] }
 0x874   : >> { %v3187_v21 = vpop.permute.xlu1 %3186  ;;  %v1741_v31 = vadd.f32 %v6623_v11, %v1394_v13  ;;  %v3679_v55 = vld [vmem:[%s4307_s30 + $0x70] sm:$0xff]  ;;  %v6640_v11 = vld [vmem:[#allocation154_spill] sm:$0xff] }
 0x875   : >> { %v3253_v53 = vadd.f32 %v3187_v21, %v2931_v56  ;;  %v3207_v48 = vpop.permute.xlu2 %3206  ;;  %v3185_v27 = vpop.permute.xlu0 %3184  ;;  %v2714_v10 = vadd.f32 %v6621_v20, %v2392_v1  ;;  %v2703_v37 = vadd.f32 %v6622_v22, %v2381_v52  ;;  %v6624_v56 = vld [vmem:[#allocation85_spill] sm:$0xff]  ;;  %v6635_v52 = vld [vmem:[#allocation10_spill] sm:$0xff]  ;;  %v6636_v1 = vld [vmem:[#allocation115_spill] sm:$0xff] }
 0x876   : >> { %v3263_v35 = vadd.f32 %v3207_v48, %v2941_v29  ;;  %v3252_v12 = vadd.f32 %v3185_v27, %v2930_v51  ;;  %v1740_v46 = vadd.f32 %v6624_v56, %v1393_v14  ;;  %v3678_v51 = vld [vmem:[%s4307_s30 + $0x58] sm:$0xff]  ;;  %v6625_v29 = vld [vmem:[#allocation7_spill] sm:$0xff]  ;;  %v2063_v62 = vadd.f32 %v6626_v49, %v1741_v31  ;;  %v6638_v22 = vld [vmem:[#allocation86_spill] sm:$0xff] }
 0x877   : >> { %3301 = vrot.lane.b32.xlu0 %v3253_v53, %s3731_s13  ;;  %v2933_v2 = vadd.f32 %v5796_v45, %v2703_v37  ;;  %v2944_v63 = vadd.f32 %v5908_v0, %v2714_v10  ;;  %v912_v21 = vmul.f32 %v3678_v51, %v6625_v29  ;;  %v6628_v53 = vld [vmem:[#allocation40_spill] sm:$0xff]  ;;  %v6629_v27 = vld [vmem:[#allocation143_spill] sm:$0xff]  ;;  %v915_v38 = vmul.f32 %v3679_v55, %v6635_v52 }
 0x878   : >> { %3321 = vrot.lane.b32.xlu1 %v3263_v35, %s3731_s13  ;;  %3299 = vrot.lane.b32.xlu2 %v3252_v12, %s3731_s13  ;;  %v2062_v39 = vadd.f32 %v6627_v57, %v1740_v46  ;;  %v2385_v45 = vadd.f32 %v6629_v27, %v2063_v62  ;;  %v6630_v0 = vld [vmem:[#allocation136_spill] sm:$0xff]  ;;  %v6633_v12 = vld [vmem:[#allocation153_spill] sm:$0xff]  ;;  %v6637_v20 = vld [vmem:[#allocation43_spill] sm:$0xff] }
 0x879   : >> { %v1167_v48 = vadd.f32 %v6628_v53, %v912_v21  ;;  %v1170_v10 = vadd.f32 %v6637_v20, %v915_v38  ;;  %v6643_v62 = vld [vmem:[#allocation95_spill] sm:$0xff] }
 0x87a   : >> { %v2384_v6 = vadd.f32 %v6630_v0, %v2062_v39  ;;  %v2707_v35 = vadd.f32 %v6632_v5, %v2385_v45 }
 0x87b   : >> { %v1397_v18 = vadd.f32 %v6631_v8, %v1167_v48 }
 0x87c   : >> { %v3193_v17 = vpop.permute.xlu1 %3192  ;;  %v2706_v40 = vadd.f32 %v6633_v12, %v2384_v6  ;;  %v2937_v33 = vadd.f32 %v5880_v47, %v2707_v35 }
 0x87d   : >> { %v3256_v16 = vadd.f32 %v3193_v17, %v2934_v7  ;;  %v3213_v50 = vpop.permute.xlu2 %3212  ;;  %v3191_v25 = vpop.permute.xlu0 %3190  ;;  %v1744_v32 = vadd.f32 %v6634_v4, %v1397_v18  ;;  %v6641_v7 = vld [vmem:[#allocation93_spill] sm:$0xff] }
 0x87e   : >> { %v3266_v24 = vadd.f32 %v3213_v50, %v2944_v63  ;;  %v3255_v58 = vadd.f32 %v3191_v25, %v2933_v2  ;;  %v2936_v36 = vadd.f32 %v5808_v42, %v2706_v40  ;;  %v6639_v42 = vld [vmem:[#allocation68_spill] sm:$0xff]  ;;  %v6642_v2 = vld [vmem:[#allocation118_spill] sm:$0xff] }
 0x87f   : >> { %3307 = vrot.lane.b32.xlu0 %v3256_v16, %s3731_s13  ;;  %v2066_v41 = vadd.f32 %v6636_v1, %v1744_v32  ;;  %v1400_v47 = vadd.f32 %v6639_v42, %v1170_v10  ;;  %v6644_v50 = vld [vmem:[#allocation156_spill] sm:$0xff] }
 0x880   : >> { %3327 = vrot.lane.b32.xlu1 %v3266_v24, %s3731_s13  ;;  %3305 = vrot.lane.b32.xlu2 %v3255_v58, %s3731_s13 }
 0x881   : >> { %v2388_v37 = vadd.f32 %v6638_v22, %v2066_v41  ;;  %v1747_v56 = vadd.f32 %v6641_v7, %v1400_v47 }
 0x883   : >> { %v2710_v31 = vadd.f32 %v6640_v11, %v2388_v37  ;;  %v2069_v63 = vadd.f32 %v6642_v2, %v1747_v56 }
 0x884   : >> { %v3199_v28 = vpop.permute.xlu1 %3198 }
 0x885   : >> { %v3259_v13 = vadd.f32 %v3199_v28, %v2937_v33  ;;  %v3219_v61 = vpop.permute.xlu2 %3218  ;;  %v3197_v26 = vpop.permute.xlu0 %3196  ;;  %v2940_v46 = vadd.f32 %v5893_v60, %v2710_v31  ;;  %v2391_v16 = vadd.f32 %v6643_v62, %v2069_v63 }
 0x886   : >> { %v3269_v59 = vadd.f32 %v3219_v61, %v5934_v54  ;;  %v3258_v14 = vadd.f32 %v3197_v26, %v2936_v36 }
 0x887   : >> { %3313 = vrot.lane.b32.xlu0 %v3259_v13, %s3731_s13  ;;  %v2713_v60 = vadd.f32 %v6644_v50, %v2391_v16 }
 0x888   : >> { %3333 = vrot.lane.b32.xlu1 %v3269_v59, %s3731_s13  ;;  %3311 = vrot.lane.b32.xlu2 %v3258_v14, %s3731_s13 }
 0x889   : >> { %v2943_v25 = vadd.f32 %v5913_v23, %v2713_v60 }
 0x88c   : >> { %v3205_v54 = vpop.permute.xlu1 %3204 }
 0x88d   : >> { %v3262_v17 = vadd.f32 %v3205_v54, %v2940_v46  ;;  %v3225_v51 = vpop.permute.xlu2 %3224  ;;  %v3203_v29 = vpop.permute.xlu0 %3202 }
 0x88e   : >> { %v3272_v21 = vadd.f32 %v3225_v51, %v5948_v30  ;;  %v3261_v49 = vadd.f32 %v3203_v29, %v5827_v44 }
 0x88f   : >> { %3319 = vrot.lane.b32.xlu0 %v3262_v17, %s3731_s13 }
 0x890   : >> { %3339 = vrot.lane.b32.xlu1 %v3272_v21, %s3731_s13  ;;  %3317 = vrot.lane.b32.xlu2 %v3261_v49, %s3731_s13 }
 0x894   : >> { %v3211_v57 = vpop.permute.xlu1 %3210 }
 0x895   : >> { %v3265_v39 = vadd.f32 %v3211_v57, %v2943_v25  ;;  %v3209_v24 = vpop.permute.xlu0 %3208 }
 0x896   : >> { %v3264_v58 = vadd.f32 %v3209_v24, %v5849_v34 }
 0x897   : >> { %3325 = vrot.lane.b32.xlu0 %v3265_v39, %s3731_s13 }
 0x898   : >> { %3323 = vrot.lane.b32.xlu2 %v3264_v58, %s3731_s13 }
 0x89c   : >> { %v3217_v44 = vpop.permute.xlu1 %3216 }
 0x89d   : >> { %v3268_v30 = vadd.f32 %v3217_v44, %v5937_v15  ;;  %v3215_v53 = vpop.permute.xlu0 %3214 }
 0x89e   : >> { %v3267_v48 = vadd.f32 %v3215_v53, %v5866_v3 }
 0x89f   : >> { %3331 = vrot.lane.b32.xlu0 %v3268_v30, %s3731_s13 }
 0x8a0   : >> { %3329 = vrot.lane.b32.xlu2 %v3267_v48, %s3731_s13 }
 0x8a4   : >> { %v3223_v23 = vpop.permute.xlu1 %3222 }
 0x8a5   : >> { %v3271_v27 = vadd.f32 %v3223_v23, %v5950_v9  ;;  %v3221_v34 = vpop.permute.xlu0 %3220 }
 0x8a6   : >> { %v3270_v45 = vadd.f32 %v3221_v34, %v5883_v43 }
 0x8a7   : >> { %3337 = vrot.lane.b32.xlu0 %v3271_v27, %s3731_s13 }
 0x8a8   : >> { %3335 = vrot.lane.b32.xlu2 %v3270_v45, %s3731_s13 }
 0x8ad   : >> { %v3227_v0 = vpop.permute.xlu0 %3226 }
 0x8ae   : >> { %v3273_v15 = vadd.f32 %v3227_v0, %v5895_v19 }
 0x8b0   : >> { %3341 = vrot.lane.b32.xlu2 %v3273_v15, %s3731_s13 }
 0x8b2   : >> { %v3298_v3 = vpop.permute.xlu1 %3297 }
 0x8b3   : >> { %3368 = vst.msk [vmem:[%s6214_s17] sm:$0xff] %vm3367_vm10, %v3298_v3 }
 0x8ba   : >> { %v3304_v43 = vpop.permute.xlu1 %3303 }
 0x8bb   : >> { %3371 = vst.msk [vmem:[%s6214_s17 + $0x18] sm:$0xff] %vm3367_vm10, %v3304_v43 }
 0x8d2   : >> { %v3300_v19 = vpop.permute.xlu2 %3299 }
 0x8d3   : >> { %3369 = vst.msk [vmem:[%s6214_s17 + $0x8] sm:$0xff] %vm3367_vm10, %v3300_v19 }
 0x8da   : >> { %v3310_v9 = vpop.permute.xlu1 %3309  ;;  %v3306_v6 = vpop.permute.xlu2 %3305 }
 0x8db   : >> { %3374 = vst.msk [vmem:[%s6214_s17 + $0x30] sm:$0xff] %vm3367_vm10, %v3310_v9 }
 0x8dc   : >> { %3372 = vst.msk [vmem:[%s6214_s17 + $0x20] sm:$0xff] %vm3367_vm10, %v3306_v6 }
 0x8e2   : >> { %v3316_v8 = vpop.permute.xlu1 %3315  ;;  %v3312_v18 = vpop.permute.xlu2 %3311 }
 0x8e3   : >> { %3377 = vst.msk [vmem:[%s6214_s17 + $0x48] sm:$0xff] %vm3367_vm10, %v3316_v8 }
 0x8e4   : >> { %3375 = vst.msk [vmem:[%s6214_s17 + $0x38] sm:$0xff] %vm3367_vm10, %v3312_v18 }
 0x8e9   : >> { %v3302_v5 = vpop.permute.xlu0 %3301 }
 0x8ea   : >> { %v3322_v35 = vpop.permute.xlu1 %3321  ;;  %v3318_v12 = vpop.permute.xlu2 %3317  ;;  %3370 = vst.msk [vmem:[%s6214_s17 + $0x10] sm:$0xff] %vm3367_vm10, %v3302_v5 }
 0x8eb   : >> { %3380 = vst.msk [vmem:[%s6214_s17 + $0x60] sm:$0xff] %vm3367_vm10, %v3322_v35 }
 0x8ec   : >> { %3378 = vst.msk [vmem:[%s6214_s17 + $0x50] sm:$0xff] %vm3367_vm10, %v3318_v12 }
 0x8f1   : >> { %v3308_v40 = vpop.permute.xlu0 %3307 }
 0x8f2   : >> { %v3328_v4 = vpop.permute.xlu1 %3327  ;;  %v3324_v32 = vpop.permute.xlu2 %3323  ;;  %3373 = vst.msk [vmem:[%s6214_s17 + $0x28] sm:$0xff] %vm3367_vm10, %v3308_v40 }
 0x8f3   : >> { %3383 = vst.msk [vmem:[%s6214_s17 + $0x78] sm:$0xff] %vm3367_vm10, %v3328_v4 }
 0x8f4   : >> { %3381 = vst.msk [vmem:[%s6214_s17 + $0x68] sm:$0xff] %vm3367_vm10, %v3324_v32 }
 0x8f9   : >> { %v3314_v33 = vpop.permute.xlu0 %3313 }
 0x8fa   : >> { %v3334_v36 = vpop.permute.xlu1 %3333  ;;  %v3330_v28 = vpop.permute.xlu2 %3329  ;;  %3376 = vst.msk [vmem:[%s6214_s17 + $0x40] sm:$0xff] %vm3367_vm10, %v3314_v33 }
 0x8fb   : >> { %3386 = vst.msk [vmem:[%s6214_s17 + $0x90] sm:$0xff] %vm3367_vm10, %v3334_v36 }
 0x8fc   : >> { %3384 = vst.msk [vmem:[%s6214_s17 + $0x80] sm:$0xff] %vm3367_vm10, %v3330_v28 }
 0x901   : >> { %v3320_v55 = vpop.permute.xlu0 %3319 }
 0x902   : >> { %v3340_v52 = vpop.permute.xlu1 %3339  ;;  %v3336_v38 = vpop.permute.xlu2 %3335  ;;  %3379 = vst.msk [vmem:[%s6214_s17 + $0x58] sm:$0xff] %vm3367_vm10, %v3320_v55 }
 0x903   : >> { %3389 = vst.msk [vmem:[%s6214_s17 + $0xa8] sm:$0xff] %vm3367_vm10, %v3340_v52 }
 0x904   : >> { %3387 = vst.msk [vmem:[%s6214_s17 + $0x98] sm:$0xff] %vm3367_vm10, %v3336_v38 }
 0x909   : >> { %v3326_v1 = vpop.permute.xlu0 %3325 }
 0x90a   : >> { %v3342_v41 = vpop.permute.xlu2 %3341  ;;  %3382 = vst.msk [vmem:[%s6214_s17 + $0x70] sm:$0xff] %vm3367_vm10, %v3326_v1 }
 0x90b   : >> { %3390 = vst.msk [vmem:[%s6214_s17 + $0xb0] sm:$0xff] %vm3367_vm10, %v3342_v41 }
 0x911   : >> { %v3332_v13 = vpop.permute.xlu0 %3331 }
 0x912   : >> { %3385 = vst.msk [vmem:[%s6214_s17 + $0x88] sm:$0xff] %vm3367_vm10, %v3332_v13 }
 0x916   : > { %735 = sbr.rel (!%p733_p5) target bundleno = 309 (0x135), region = 71 }
 0x919   : >> { %v3338_v61 = vpop.permute.xlu0 %3337 }
 0x91a   : >> { %3388 = vst.msk [vmem:[%s6214_s17 + $0xa0] sm:$0xff] %vm3367_vm10, %v3338_v61 }
 0x91b PF: > { %s12_s11 = sadd.s32 1, %s3706_s11   ;;  %s6645_s9 = smov %s3702_s10 }
 0x91c   : > { %p9_p6 = scmp.ge.s32.totalorder %s12_s11, 4   ;;  %s6646_s10 = smov %s6648_s12 }
 0x91e   :  { %11 = sbr.rel (!%p9_p6) target bundleno = 2 (0x2), region = 82 }

</bundles_post_ra>
